<compile_context>
chip_gen: v6e
topology: v6e:2x2x1
jax: 0.10.0
libtpu: 0.0.40
codegen_flags: <defaults>
</compile_context>

<pallas_src>
import math

import numpy as np

import jax
import jax.numpy as jnp
from jax.experimental import pallas as pl
from jax.experimental.pallas import tpu as pltpu

# ----------------------------------------------------------------------------
# Model configuration (small synthetic XDenseNet)
# ----------------------------------------------------------------------------
IN_CHANNELS = 3
IN_SIZE = 56                      # 56 -> 28 (conv s2) -> 14 (maxpool) -> 7 (trans)
INIT_BLOCK_CHANNELS = 8
CHANNELS = [[12, 16], [12, 16]]   # 2 stages of 2 XDenseUnits each
NUM_CLASSES = 10
BATCH = 2
BN_EPS = 1e-5

# Derived spatial / layout constants
CONV_HW = 28 * 28                 # stem conv output pixels (28x28)
S1_WP = 16                        # stage-1 padded grid (14x14 valid + border)
S1_L = S1_WP * S1_WP              # 256 lanes
S2_WP = 9                         # stage-2 padded grid (7x7 valid + border)
S2_L = S2_WP * S2_WP              # 81 lanes
FINAL_HW = 7 * 7
INIT_K = IN_CHANNELS * 49         # 147
INIT_K_PAD = 160                  # K padded for an aligned MXU dot
BANK_C = 16                       # channel capacity of the VMEM feature bank
MID_C = 16                        # bottleneck width of every unit (4 * inc)
INC_C = 4                         # channels added by every unit


def _unit_plan():
    """[(stage_idx, c_in)] for every XDenseUnit, plus config sanity checks."""
    plan = []
    in_c = INIT_BLOCK_CHANNELS
    for i, stage_channels in enumerate(CHANNELS):
        if i != 0:
            in_c //= 2
        for out_c in stage_channels:
            inc = out_c - in_c
            assert inc == INC_C and 4 * inc == MID_C and out_c <= BANK_C
            plan.append((i, in_c))
            in_c = out_c
    assert len(CHANNELS) == 2 and in_c == BANK_C and IN_SIZE == 56
    return plan


UNIT_PLAN = _unit_plan()


# ----------------------------------------------------------------------------
# In-kernel helpers (traced Python)
# ----------------------------------------------------------------------------
def _shift_lanes(z, off):
    """s[:, p] = z[:, p + off] wherever p + off is in range; zero-fill elsewhere.

    Static lane-axis shift via two slices + concat (no wrap ambiguity).  Values
    at out-of-range positions only ever feed border outputs, which get masked.
    """
    if off == 0:
        return z
    fill = jnp.zeros((z.shape[0], abs(off)), z.dtype)
    if off > 0:
        return jnp.concatenate([z[:, off:], fill], axis=1)
    return jnp.concatenate([fill, z[:, :off]], axis=1)


def _dense_unit(bank, patch_scr, urefs, c_in, length, wp, interior_ref):
    """XDenseUnit, fully in VMEM:

    BN1+ReLU -> 1x1 conv as ONE K=16 dot over the whole bank (unused rows are
    zero, unused weight columns are zero) -> BN2+ReLU -> zero the border (this
    IS the 3x3 conv's zero padding) -> in-VMEM im2col (9 lane-shifted writes)
    -> ONE K=144 dot -> append INC_C new rows to the bank.
    """
    s1, b1, w1, s2, b2, w2 = urefs
    f32 = jnp.float32

    x = bank[...]                                            # (16, L) f32
    z1 = jnp.maximum(x * s1[...] + b1[...], 0.0)
    mid = jnp.dot(w1[...], z1.astype(jnp.bfloat16),
                  preferred_element_type=f32)                # (16, L)
    z2 = jnp.maximum(mid * s2[...] + b2[...], 0.0)
    interior = interior_ref[...] > 0.5                       # (1, L) bool
    z2 = jnp.where(interior, z2, 0.0).astype(jnp.bfloat16)   # border = conv pad

    for dy in range(3):
        for dx in range(3):
            t = dy * 3 + dx
            patch_scr[pl.ds(t * MID_C, MID_C), pl.ds(0, length)] = \
                _shift_lanes(z2, (dy - 1) * wp + (dx - 1))

    conv = jnp.dot(w2[...], patch_scr[pl.ds(0, 9 * MID_C), pl.ds(0, length)],
                   preferred_element_type=f32)               # (4, L)
    # dropout_rate == 0.0 -> dropout is a no-op
    bank[pl.ds(c_in, INC_C), :] = jnp.where(interior, conv, 0.0)


def make_fused_kernel(plan):
    n_units = len(plan)
    n_fixed = 16

    def kernel(*refs):
        (patch_ref, w_init_ref, s_init_ref, b_init_ref,
         mp_masks_ref, mp_sel_ref, int16_ref, int9_ref,
         tr_s_ref, tr_b_ref, tr_w_ref, tr_pool_ref,
         post_s_ref, post_b_ref, fc_w_ref, fc_b_ref) = refs[:n_fixed]
        unit_refs = refs[n_fixed:n_fixed + 6 * n_units]
        o_ref = refs[n_fixed + 6 * n_units]
        bank1, bank2, patch_scr = refs[n_fixed + 6 * n_units + 1:]

        f32 = jnp.float32
        bank1[...] = jnp.zeros(bank1.shape, f32)
        bank2[...] = jnp.zeros(bank2.shape, f32)

        # ---- PreResInitBlock: 7x7/s2 conv as one K=160 dot, fused BN+ReLU ----
        y = jnp.dot(w_init_ref[...], patch_ref[0],
                    preferred_element_type=f32)              # (8, 784)
        y = jnp.maximum(y * s_init_ref[...] + b_init_ref[...], 0.0)

        # ---- 3x3/s2/p1 max-pool: 9 lane-shift taps (edge-masked) running max,
        #      then one MXU selection matmul = stride-2 subsample + scatter
        #      into the zero-bordered 16x16 padded-flat layout of the bank.
        m = None
        for dy in range(3):
            for dx in range(3):
                t = dy * 3 + dx
                cand = _shift_lanes(y, (dy - 1) * 28 + (dx - 1))
                valid = mp_masks_ref[pl.ds(t, 1), :] > 0.5   # (1, 784)
                cand = jnp.where(valid, cand, f32(-1e30))
                m = cand if m is None else jnp.maximum(m, cand)
        bank1[pl.ds(0, INIT_BLOCK_CHANNELS), :] = jnp.dot(
            m.astype(jnp.bfloat16), mp_sel_ref[...],
            preferred_element_type=f32)                      # (8, 256)

        # ---- stage 1 units (14x14 valid inside the 16x16 bordered grid) ----
        for ui, (si, c_in) in enumerate(plan):
            if si == 0:
                _dense_unit(bank1, patch_scr, unit_refs[6 * ui:6 * ui + 6],
                            c_in, S1_L, S1_WP, int16_ref)

        # ---- XDensTransitionBlock: BN+ReLU -> 1x1 -> 2x2/2 avg-pool.
        #      The pool + re-scatter into the 9x9 bordered grid is one
        #      selection matmul whose rows kill all border garbage.
        z = jnp.maximum(bank1[...] * tr_s_ref[...] + tr_b_ref[...], 0.0)
        yt = jnp.dot(tr_w_ref[...], z.astype(jnp.bfloat16),
                     preferred_element_type=f32)             # (8, 256)
        bank2[pl.ds(0, BANK_C // 2), :] = jnp.dot(
            yt.astype(jnp.bfloat16), tr_pool_ref[...],
            preferred_element_type=f32)                      # (8, 81)

        # ---- stage 2 units (7x7 valid inside the 9x9 bordered grid) ----
        for ui, (si, c_in) in enumerate(plan):
            if si == 1:
                _dense_unit(bank2, patch_scr, unit_refs[6 * ui:6 * ui + 6],
                            c_in, S2_L, S2_WP, int9_ref)

        # ---- PreResActivation -> global 7x7 avg-pool (lane reduce) -> FC ----
        zf = jnp.maximum(bank2[...] * post_s_ref[...] + post_b_ref[...], 0.0)
        zf = jnp.where(int9_ref[...] > 0.5, zf, 0.0)
        lt = jnp.dot(fc_w_ref[...], zf.astype(jnp.bfloat16),
                     preferred_element_type=f32)             # (10, 81)
        logits = (jnp.sum(lt, axis=-1, keepdims=True) * f32(1.0 / FINAL_HW)
                  + fc_b_ref[...])                           # (10, 1)
        o_ref[0] = logits

    return kernel


_FUSED_KERNEL = make_fused_kernel(UNIT_PLAN)


# ----------------------------------------------------------------------------
# Host-side constants (selection matrices / masks) and input preprocessing
# ----------------------------------------------------------------------------
def build_constants():
    # max-pool tap validity masks (3x3 window, pad 1) on the 28x28 grid
    masks = np.zeros((9, CONV_HW), np.float32)
    for dy in range(3):
        for dx in range(3):
            t = dy * 3 + dx
            for y in range(28):
                for x in range(28):
                    yy, xx = y + dy - 1, x + dx - 1
                    if 0 <= yy < 28 and 0 <= xx < 28:
                        masks[t, y * 28 + x] = 1.0
    # stride-2 subsample of the full-res max + scatter into bordered 16x16
    mp_sel = np.zeros((CONV_HW, S1_L), np.float32)
    for oy in range(14):
        for ox in range(14):
            mp_sel[(2 * oy) * 28 + 2 * ox, (oy + 1) * S1_WP + (ox + 1)] = 1.0
    # 2x2/2 avg-pool: bordered 16x16 -> bordered 9x9 (0.25 folded in)
    tr_pool = np.zeros((S1_L, S2_L), np.float32)
    for oy in range(7):
        for ox in range(7):
            for dy in range(2):
                for dx in range(2):
                    tr_pool[(2 * oy + dy + 1) * S1_WP + (2 * ox + dx + 1),
                            (oy + 1) * S2_WP + (ox + 1)] = 0.25
    # interior (valid-region) masks of the bordered layouts
    int16 = np.zeros((1, S1_L), np.float32)
    for y in range(14):
        for x in range(14):
            int16[0, (y + 1) * S1_WP + (x + 1)] = 1.0
    int9 = np.zeros((1, S2_L), np.float32)
    for y in range(7):
        for x in range(7):
            int9[0, (y + 1) * S2_WP + (x + 1)] = 1.0
    return {
        'mp_masks': jnp.asarray(masks),
        'mp_sel': jnp.asarray(mp_sel).astype(jnp.bfloat16),
        'tr_pool': jnp.asarray(tr_pool).astype(jnp.bfloat16),
        'int16': jnp.asarray(int16),
        'int9': jnp.asarray(int9),
    }


def build_init_patches(x_nchw):
    """Host-side im2col for the stride-2 7x7 stem conv only (input prep).

    Row ci*49 + dy*7 + dx of the (160, 784) bf16 matrix holds the value of the
    3-pixel zero-padded image at (2*oy + dy, 2*ox + dx) for output pixel
    column oy*28 + ox.  K is zero-padded 147 -> 160 for an aligned MXU dot.
    """
    n = x_nchw.shape[0]
    xp = jnp.pad(x_nchw.astype(jnp.float32),
                 ((0, 0), (0, 0), (3, 3), (3, 3)))           # (N, 3, 62, 62)
    taps = []
    for dy in range(7):
        for dx in range(7):
            taps.append(xp[:, :, dy:dy + IN_SIZE:2, dx:dx + IN_SIZE:2]
                        .reshape(n, IN_CHANNELS, 1, CONV_HW))
    p = jnp.concatenate(taps, axis=2)                        # (N, 3, 49, 784)
    p = p.reshape(n, INIT_K, CONV_HW)
    p = jnp.pad(p, ((0, 0), (0, INIT_K_PAD - INIT_K), (0, 0)))
    return p.astype(jnp.bfloat16)


# ----------------------------------------------------------------------------
# Deterministic parameter initialization (inference-mode BN)
# ----------------------------------------------------------------------------
def init_params(key):
    keys = iter(jax.random.split(key, 64))

    def bn_params(c):
        kg, kb = jax.random.split(next(keys))
        gamma = jax.random.uniform(kg, (c, 1), jnp.float32, 0.5, 1.5)
        beta = jax.random.normal(kb, (c, 1), jnp.float32) * 0.1
        # inference running stats: mean = 0, var = 1
        return gamma / jnp.sqrt(1.0 + BN_EPS), beta

    def bn_padded(c, cpad):
        s, b = bn_params(c)
        s = jnp.concatenate([s, jnp.ones((cpad - c, 1), jnp.float32)], axis=0)
        b = jnp.concatenate([b, jnp.zeros((cpad - c, 1), jnp.float32)], axis=0)
        return s, b

    def kaiming(shape, fan_in):
        bound = math.sqrt(6.0 / fan_in)
        return jax.random.uniform(next(keys), shape, jnp.float32, -bound, bound)

    p = {}
    # stem conv 7x7: (8, 3, 7, 7) -> (8, 147) -> K-pad to (8, 160), bf16
    w = kaiming((INIT_BLOCK_CHANNELS, IN_CHANNELS, 7, 7), INIT_K)
    w = w.reshape(INIT_BLOCK_CHANNELS, INIT_K)
    p['w_init'] = jnp.pad(w, ((0, 0), (0, INIT_K_PAD - INIT_K))).astype(
        jnp.bfloat16)
    p['s_init'], p['b_init'] = bn_params(INIT_BLOCK_CHANNELS)

    units = []
    in_c = INIT_BLOCK_CHANNELS
    for i, stage_channels in enumerate(CHANNELS):
        if i != 0:                                     # XDensTransitionBlock
            out_c = in_c // 2
            p['tr_s'], p['tr_b'] = bn_params(in_c)
            p['tr_w'] = kaiming((out_c, in_c), in_c).astype(jnp.bfloat16)
            in_c = out_c
        for out_c in stage_channels:                   # XDenseUnit
            inc = out_c - in_c
            mid = 4 * inc
            s1, b1 = bn_padded(in_c, BANK_C)
            w1 = jnp.pad(kaiming((mid, in_c), in_c),
                         ((0, 0), (0, BANK_C - in_c)))       # zero extra cols
            s2, b2 = bn_params(mid)
            w2 = kaiming((inc, mid, 3, 3), mid * 9)
            # (inc, mid, 3, 3) -> (inc, 3, 3, mid) -> (inc, 144): col = t*16+ci
            w2 = jnp.transpose(w2, (0, 2, 3, 1)).reshape(inc, 9 * mid)
            units.append(dict(s1=s1, b1=b1, w1=w1.astype(jnp.bfloat16),
                              s2=s2, b2=b2, w2=w2.astype(jnp.bfloat16)))
            in_c = out_c
    p['units'] = units

    p['post_s'], p['post_b'] = bn_params(in_c)
    kw, kb = jax.random.split(next(keys))
    bound = 1.0 / math.sqrt(in_c)
    p['fc_w'] = jax.random.uniform(kw, (NUM_CLASSES, in_c), jnp.float32,
                                   -bound, bound).astype(jnp.bfloat16)
    p['fc_b'] = jax.random.uniform(kb, (NUM_CLASSES, 1), jnp.float32,
                                   -bound, bound)
    return p


# ----------------------------------------------------------------------------
# Forward pass: input prep + ONE fused pallas_call
# ----------------------------------------------------------------------------
def xdensenet_forward(params, consts, x_nchw):
    n = x_nchw.shape[0]
    patches = build_init_patches(x_nchw)                 # (N, 160, 784) bf16

    args = [patches,
            params['w_init'], params['s_init'], params['b_init'],
            consts['mp_masks'], consts['mp_sel'],
            consts['int16'], consts['int9'],
            params['tr_s'], params['tr_b'], params['tr_w'], consts['tr_pool'],
            params['post_s'], params['post_b'], params['fc_w'], params['fc_b']]
    for u in params['units']:
        args += [u['s1'], u['b1'], u['w1'], u['s2'], u['b2'], u['w2']]

    def shared_spec(a):
        nd = a.ndim
        return pl.BlockSpec(a.shape, lambda i, _nd=nd: (0,) * _nd)

    in_specs = ([pl.BlockSpec((1, INIT_K_PAD, CONV_HW), lambda i: (i, 0, 0))]
                + [shared_spec(a) for a in args[1:]])

    out = pl.pallas_call(
        _FUSED_KERNEL,
        grid=(n,),
        in_specs=in_specs,
        out_specs=pl.BlockSpec((1, NUM_CLASSES, 1), lambda i: (i, 0, 0)),
        out_shape=jax.ShapeDtypeStruct((n, NUM_CLASSES, 1), jnp.float32),
        scratch_shapes=[
            pltpu.VMEM((BANK_C, S1_L), jnp.float32),        # stage-1 bank
            pltpu.VMEM((BANK_C, S2_L), jnp.float32),        # stage-2 bank
            pltpu.VMEM((9 * MID_C, S1_L), jnp.bfloat16),    # 3x3 im2col patch
        ],
        compiler_params=pltpu.CompilerParams(
            dimension_semantics=("parallel",)),
    )(*args)
    return out.reshape(n, NUM_CLASSES)


# ----------------------------------------------------------------------------
if __name__ == "__main__":
    key = jax.random.PRNGKey(0)
    k_param, k_data = jax.random.split(key)
    params = init_params(k_param)
    consts = build_constants()
    x = jax.random.normal(k_data, (BATCH, IN_CHANNELS, IN_SIZE, IN_SIZE),
                          dtype=jnp.float32)

    fwd = jax.jit(xdensenet_forward)
    logits = jax.block_until_ready(fwd(params, consts, x))

    assert logits.shape == (BATCH, NUM_CLASSES), logits.shape
    assert bool(jnp.all(jnp.isfinite(logits)))
    print("KERNEL_OK")
</pallas_src>

<mosaic_0001>
module attributes {stable_mosaic.version = 11 : i64} {
  func.func @kernel(%arg0: i32, %arg1: memref<1x160x784xbf16, #tpu.memory_space<vmem>>, %arg2: memref<8x160xbf16, #tpu.memory_space<vmem>>, %arg3: memref<8x1xf32, #tpu.memory_space<vmem>>, %arg4: memref<8x1xf32, #tpu.memory_space<vmem>>, %arg5: memref<9x784xf32, #tpu.memory_space<vmem>>, %arg6: memref<784x256xbf16, #tpu.memory_space<vmem>>, %arg7: memref<1x256xf32, #tpu.memory_space<vmem>>, %arg8: memref<1x81xf32, #tpu.memory_space<vmem>>, %arg9: memref<16x1xf32, #tpu.memory_space<vmem>>, %arg10: memref<16x1xf32, #tpu.memory_space<vmem>>, %arg11: memref<8x16xbf16, #tpu.memory_space<vmem>>, %arg12: memref<256x81xbf16, #tpu.memory_space<vmem>>, %arg13: memref<16x1xf32, #tpu.memory_space<vmem>>, %arg14: memref<16x1xf32, #tpu.memory_space<vmem>>, %arg15: memref<10x16xbf16, #tpu.memory_space<vmem>>, %arg16: memref<10x1xf32, #tpu.memory_space<vmem>>, %arg17: memref<16x1xf32, #tpu.memory_space<vmem>>, %arg18: memref<16x1xf32, #tpu.memory_space<vmem>>, %arg19: memref<16x16xbf16, #tpu.memory_space<vmem>>, %arg20: memref<16x1xf32, #tpu.memory_space<vmem>>, %arg21: memref<16x1xf32, #tpu.memory_space<vmem>>, %arg22: memref<4x144xbf16, #tpu.memory_space<vmem>>, %arg23: memref<16x1xf32, #tpu.memory_space<vmem>>, %arg24: memref<16x1xf32, #tpu.memory_space<vmem>>, %arg25: memref<16x16xbf16, #tpu.memory_space<vmem>>, %arg26: memref<16x1xf32, #tpu.memory_space<vmem>>, %arg27: memref<16x1xf32, #tpu.memory_space<vmem>>, %arg28: memref<4x144xbf16, #tpu.memory_space<vmem>>, %arg29: memref<16x1xf32, #tpu.memory_space<vmem>>, %arg30: memref<16x1xf32, #tpu.memory_space<vmem>>, %arg31: memref<16x16xbf16, #tpu.memory_space<vmem>>, %arg32: memref<16x1xf32, #tpu.memory_space<vmem>>, %arg33: memref<16x1xf32, #tpu.memory_space<vmem>>, %arg34: memref<4x144xbf16, #tpu.memory_space<vmem>>, %arg35: memref<16x1xf32, #tpu.memory_space<vmem>>, %arg36: memref<16x1xf32, #tpu.memory_space<vmem>>, %arg37: memref<16x16xbf16, #tpu.memory_space<vmem>>, %arg38: memref<16x1xf32, #tpu.memory_space<vmem>>, %arg39: memref<16x1xf32, #tpu.memory_space<vmem>>, %arg40: memref<4x144xbf16, #tpu.memory_space<vmem>>, %arg41: memref<1x10x1xf32, #tpu.memory_space<vmem>>, %arg42: memref<16x256xf32, #tpu.memory_space<vmem>>, %arg43: memref<16x81xf32, #tpu.memory_space<vmem>>, %arg44: memref<144x256xbf16, #tpu.memory_space<vmem>>) attributes {dimension_semantics = [#tpu.dimension_semantics<parallel>], iteration_bounds = array<i64: 2>, scalar_prefetch = 0 : i64, scratch_operands = 3 : i64, tpu.core_type = #tpu.core_type<tc>, window_params = [{transform_indices = @transform_0, window_bounds = array<i64: 1, 160, 784>}, {pipeline_mode = #tpu.pipeline_mode<synchronous>, transform_indices = @transform_1, window_bounds = array<i64: 8, 160>}, {pipeline_mode = #tpu.pipeline_mode<synchronous>, transform_indices = @transform_2, window_bounds = array<i64: 8, 1>}, {pipeline_mode = #tpu.pipeline_mode<synchronous>, transform_indices = @transform_3, window_bounds = array<i64: 8, 1>}, {pipeline_mode = #tpu.pipeline_mode<synchronous>, transform_indices = @transform_4, window_bounds = array<i64: 9, 784>}, {pipeline_mode = #tpu.pipeline_mode<synchronous>, transform_indices = @transform_5, window_bounds = array<i64: 784, 256>}, {pipeline_mode = #tpu.pipeline_mode<synchronous>, transform_indices = @transform_6, window_bounds = array<i64: 1, 256>}, {pipeline_mode = #tpu.pipeline_mode<synchronous>, transform_indices = @transform_7, window_bounds = array<i64: 1, 81>}, {pipeline_mode = #tpu.pipeline_mode<synchronous>, transform_indices = @transform_8, window_bounds = array<i64: 16, 1>}, {pipeline_mode = #tpu.pipeline_mode<synchronous>, transform_indices = @transform_9, window_bounds = array<i64: 16, 1>}, {pipeline_mode = #tpu.pipeline_mode<synchronous>, transform_indices = @transform_10, window_bounds = array<i64: 8, 16>}, {pipeline_mode = #tpu.pipeline_mode<synchronous>, transform_indices = @transform_11, window_bounds = array<i64: 256, 81>}, {pipeline_mode = #tpu.pipeline_mode<synchronous>, transform_indices = @transform_12, window_bounds = array<i64: 16, 1>}, {pipeline_mode = #tpu.pipeline_mode<synchronous>, transform_indices = @transform_13, window_bounds = array<i64: 16, 1>}, {pipeline_mode = #tpu.pipeline_mode<synchronous>, transform_indices = @transform_14, window_bounds = array<i64: 10, 16>}, {pipeline_mode = #tpu.pipeline_mode<synchronous>, transform_indices = @transform_15, window_bounds = array<i64: 10, 1>}, {pipeline_mode = #tpu.pipeline_mode<synchronous>, transform_indices = @transform_16, window_bounds = array<i64: 16, 1>}, {pipeline_mode = #tpu.pipeline_mode<synchronous>, transform_indices = @transform_17, window_bounds = array<i64: 16, 1>}, {pipeline_mode = #tpu.pipeline_mode<synchronous>, transform_indices = @transform_18, window_bounds = array<i64: 16, 16>}, {pipeline_mode = #tpu.pipeline_mode<synchronous>, transform_indices = @transform_19, window_bounds = array<i64: 16, 1>}, {pipeline_mode = #tpu.pipeline_mode<synchronous>, transform_indices = @transform_20, window_bounds = array<i64: 16, 1>}, {pipeline_mode = #tpu.pipeline_mode<synchronous>, transform_indices = @transform_21, window_bounds = array<i64: 4, 144>}, {pipeline_mode = #tpu.pipeline_mode<synchronous>, transform_indices = @transform_22, window_bounds = array<i64: 16, 1>}, {pipeline_mode = #tpu.pipeline_mode<synchronous>, transform_indices = @transform_23, window_bounds = array<i64: 16, 1>}, {pipeline_mode = #tpu.pipeline_mode<synchronous>, transform_indices = @transform_24, window_bounds = array<i64: 16, 16>}, {pipeline_mode = #tpu.pipeline_mode<synchronous>, transform_indices = @transform_25, window_bounds = array<i64: 16, 1>}, {pipeline_mode = #tpu.pipeline_mode<synchronous>, transform_indices = @transform_26, window_bounds = array<i64: 16, 1>}, {pipeline_mode = #tpu.pipeline_mode<synchronous>, transform_indices = @transform_27, window_bounds = array<i64: 4, 144>}, {pipeline_mode = #tpu.pipeline_mode<synchronous>, transform_indices = @transform_28, window_bounds = array<i64: 16, 1>}, {pipeline_mode = #tpu.pipeline_mode<synchronous>, transform_indices = @transform_29, window_bounds = array<i64: 16, 1>}, {pipeline_mode = #tpu.pipeline_mode<synchronous>, transform_indices = @transform_30, window_bounds = array<i64: 16, 16>}, {pipeline_mode = #tpu.pipeline_mode<synchronous>, transform_indices = @transform_31, window_bounds = array<i64: 16, 1>}, {pipeline_mode = #tpu.pipeline_mode<synchronous>, transform_indices = @transform_32, window_bounds = array<i64: 16, 1>}, {pipeline_mode = #tpu.pipeline_mode<synchronous>, transform_indices = @transform_33, window_bounds = array<i64: 4, 144>}, {pipeline_mode = #tpu.pipeline_mode<synchronous>, transform_indices = @transform_34, window_bounds = array<i64: 16, 1>}, {pipeline_mode = #tpu.pipeline_mode<synchronous>, transform_indices = @transform_35, window_bounds = array<i64: 16, 1>}, {pipeline_mode = #tpu.pipeline_mode<synchronous>, transform_indices = @transform_36, window_bounds = array<i64: 16, 16>}, {pipeline_mode = #tpu.pipeline_mode<synchronous>, transform_indices = @transform_37, window_bounds = array<i64: 16, 1>}, {pipeline_mode = #tpu.pipeline_mode<synchronous>, transform_indices = @transform_38, window_bounds = array<i64: 16, 1>}, {pipeline_mode = #tpu.pipeline_mode<synchronous>, transform_indices = @transform_39, window_bounds = array<i64: 4, 144>}, {transform_indices = @transform_40, window_bounds = array<i64: 1, 10, 1>}]} {
    %cst = arith.constant 0.000000e+00 : f32
    %0 = vector.broadcast %cst : f32 to vector<16x256xf32>
    %c0 = arith.constant 0 : index
    %c0_0 = arith.constant 0 : index
    %1 = vector.load %arg42[%c0, %c0_0] : memref<16x256xf32, #tpu.memory_space<vmem>>, vector<16x256xf32>
    tpu.vector_store %arg42[%c0, %c0_0], %0 {strides = array<i32>} : memref<16x256xf32, #tpu.memory_space<vmem>>, vector<16x256xf32>,
    %cst_1 = arith.constant 0.000000e+00 : f32
    %2 = vector.broadcast %cst_1 : f32 to vector<16x81xf32>
    %c0_2 = arith.constant 0 : index
    %c0_3 = arith.constant 0 : index
    %3 = vector.load %arg43[%c0_2, %c0_3] : memref<16x81xf32, #tpu.memory_space<vmem>>, vector<16x81xf32>
    tpu.vector_store %arg43[%c0_2, %c0_3], %2 {strides = array<i32>} : memref<16x81xf32, #tpu.memory_space<vmem>>, vector<16x81xf32>,
    %c0_4 = arith.constant 0 : index
    %c0_5 = arith.constant 0 : index
    %4 = vector.load %arg2[%c0_4, %c0_5] : memref<8x160xbf16, #tpu.memory_space<vmem>>, vector<8x160xbf16>
    %c0_6 = arith.constant 0 : index
    %c0_7 = arith.constant 0 : index
    %c0_8 = arith.constant 0 : index
    %5 = vector.load %arg1[%c0_6, %c0_7, %c0_8] : memref<1x160x784xbf16, #tpu.memory_space<vmem>>, vector<1x160x784xbf16>
    %6 = vector.shape_cast %5 : vector<1x160x784xbf16> to vector<160x784xbf16>
    %cst_9 = arith.constant dense<0.000000e+00> : vector<8x784xf32>
    %7 = tpu.matmul %4, %6, %cst_9 {dimension_numbers = #tpu.dot_dimension_numbers<[1], [0], [0], [1], [0, 0, 1, 1], [], []>} : vector<8x160xbf16>, vector<160x784xbf16>, vector<8x784xf32> -> vector<8x784xf32>
    %c0_10 = arith.constant 0 : index
    %c0_11 = arith.constant 0 : index
    %8 = vector.load %arg3[%c0_10, %c0_11] : memref<8x1xf32, #tpu.memory_space<vmem>>, vector<8x1xf32>
    %9 = vector.broadcast %8 : vector<8x1xf32> to vector<8x784xf32>
    %10 = arith.mulf %7, %9 : vector<8x784xf32>
    %c0_12 = arith.constant 0 : index
    %c0_13 = arith.constant 0 : index
    %11 = vector.load %arg4[%c0_12, %c0_13] : memref<8x1xf32, #tpu.memory_space<vmem>>, vector<8x1xf32>
    %12 = vector.broadcast %11 : vector<8x1xf32> to vector<8x784xf32>
    %13 = arith.addf %10, %12 : vector<8x784xf32>
    %cst_14 = arith.constant 0.000000e+00 : f32
    %14 = vector.broadcast %cst_14 : f32 to vector<8x784xf32>
    %15 = arith.maximumf %13, %14 : vector<8x784xf32>
    %cst_15 = arith.constant 0.000000e+00 : f32
    %16 = vector.broadcast %cst_15 : f32 to vector<8x29xf32>
    %17 = vector.extract_strided_slice %15 {offsets = [0, 0], sizes = [8, 755], strides = [1, 1]} : vector<8x784xf32> to vector<8x755xf32>
    %18 = tpu.concatenate %16, %17 in 1 : vector<8x29xf32>, vector<8x755xf32> -> vector<8x784xf32>
    %c0_16 = arith.constant 0 : index
    %c0_17 = arith.constant 0 : index
    %19 = vector.load %arg5[%c0_16, %c0_17] : memref<9x784xf32, #tpu.memory_space<vmem>>, vector<1x784xf32>
    %cst_18 = arith.constant 5.000000e-01 : f32
    %20 = vector.broadcast %cst_18 : f32 to vector<1x784xf32>
    %21 = arith.cmpf ogt, %19, %20 : vector<1x784xf32>
    %cst_19 = arith.constant -1.000000e+30 : f32
    %22 = vector.shape_cast %21 : vector<1x784xi1> to vector<1x784xi1>
    %23 = vector.broadcast %22 : vector<1x784xi1> to vector<8x784xi1>
    %24 = vector.broadcast %cst_19 : f32 to vector<8x784xf32>
    %25 = arith.select %23, %18, %24 : vector<8x784xi1>, vector<8x784xf32>
    %cst_20 = arith.constant 0.000000e+00 : f32
    %26 = vector.broadcast %cst_20 : f32 to vector<8x28xf32>
    %27 = vector.extract_strided_slice %15 {offsets = [0, 0], sizes = [8, 756], strides = [1, 1]} : vector<8x784xf32> to vector<8x756xf32>
    %28 = tpu.concatenate %26, %27 in 1 : vector<8x28xf32>, vector<8x756xf32> -> vector<8x784xf32>
    %c1 = arith.constant 1 : index
    %c0_21 = arith.constant 0 : index
    %29 = vector.load %arg5[%c1, %c0_21] : memref<9x784xf32, #tpu.memory_space<vmem>>, vector<1x784xf32>
    %cst_22 = arith.constant 5.000000e-01 : f32
    %30 = vector.broadcast %cst_22 : f32 to vector<1x784xf32>
    %31 = arith.cmpf ogt, %29, %30 : vector<1x784xf32>
    %cst_23 = arith.constant -1.000000e+30 : f32
    %32 = vector.shape_cast %31 : vector<1x784xi1> to vector<1x784xi1>
    %33 = vector.broadcast %32 : vector<1x784xi1> to vector<8x784xi1>
    %34 = vector.broadcast %cst_23 : f32 to vector<8x784xf32>
    %35 = arith.select %33, %28, %34 : vector<8x784xi1>, vector<8x784xf32>
    %36 = arith.maximumf %25, %35 : vector<8x784xf32>
    %cst_24 = arith.constant 0.000000e+00 : f32
    %37 = vector.broadcast %cst_24 : f32 to vector<8x27xf32>
    %38 = vector.extract_strided_slice %15 {offsets = [0, 0], sizes = [8, 757], strides = [1, 1]} : vector<8x784xf32> to vector<8x757xf32>
    %39 = tpu.concatenate %37, %38 in 1 : vector<8x27xf32>, vector<8x757xf32> -> vector<8x784xf32>
    %c2 = arith.constant 2 : index
    %c0_25 = arith.constant 0 : index
    %40 = vector.load %arg5[%c2, %c0_25] : memref<9x784xf32, #tpu.memory_space<vmem>>, vector<1x784xf32>
    %cst_26 = arith.constant 5.000000e-01 : f32
    %41 = vector.broadcast %cst_26 : f32 to vector<1x784xf32>
    %42 = arith.cmpf ogt, %40, %41 : vector<1x784xf32>
    %cst_27 = arith.constant -1.000000e+30 : f32
    %43 = vector.shape_cast %42 : vector<1x784xi1> to vector<1x784xi1>
    %44 = vector.broadcast %43 : vector<1x784xi1> to vector<8x784xi1>
    %45 = vector.broadcast %cst_27 : f32 to vector<8x784xf32>
    %46 = arith.select %44, %39, %45 : vector<8x784xi1>, vector<8x784xf32>
    %47 = arith.maximumf %36, %46 : vector<8x784xf32>
    %cst_28 = arith.constant 0.000000e+00 : f32
    %48 = vector.broadcast %cst_28 : f32 to vector<8x1xf32>
    %49 = vector.extract_strided_slice %15 {offsets = [0, 0], sizes = [8, 783], strides = [1, 1]} : vector<8x784xf32> to vector<8x783xf32>
    %50 = tpu.concatenate %48, %49 in 1 : vector<8x1xf32>, vector<8x783xf32> -> vector<8x784xf32>
    %c3 = arith.constant 3 : index
    %c0_29 = arith.constant 0 : index
    %51 = vector.load %arg5[%c3, %c0_29] : memref<9x784xf32, #tpu.memory_space<vmem>>, vector<1x784xf32>
    %cst_30 = arith.constant 5.000000e-01 : f32
    %52 = vector.broadcast %cst_30 : f32 to vector<1x784xf32>
    %53 = arith.cmpf ogt, %51, %52 : vector<1x784xf32>
    %cst_31 = arith.constant -1.000000e+30 : f32
    %54 = vector.shape_cast %53 : vector<1x784xi1> to vector<1x784xi1>
    %55 = vector.broadcast %54 : vector<1x784xi1> to vector<8x784xi1>
    %56 = vector.broadcast %cst_31 : f32 to vector<8x784xf32>
    %57 = arith.select %55, %50, %56 : vector<8x784xi1>, vector<8x784xf32>
    %58 = arith.maximumf %47, %57 : vector<8x784xf32>
    %c4 = arith.constant 4 : index
    %c0_32 = arith.constant 0 : index
    %59 = vector.load %arg5[%c4, %c0_32] : memref<9x784xf32, #tpu.memory_space<vmem>>, vector<1x784xf32>
    %cst_33 = arith.constant 5.000000e-01 : f32
    %60 = vector.broadcast %cst_33 : f32 to vector<1x784xf32>
    %61 = arith.cmpf ogt, %59, %60 : vector<1x784xf32>
    %cst_34 = arith.constant -1.000000e+30 : f32
    %62 = vector.shape_cast %61 : vector<1x784xi1> to vector<1x784xi1>
    %63 = vector.broadcast %62 : vector<1x784xi1> to vector<8x784xi1>
    %64 = vector.broadcast %cst_34 : f32 to vector<8x784xf32>
    %65 = arith.select %63, %15, %64 : vector<8x784xi1>, vector<8x784xf32>
    %66 = arith.maximumf %58, %65 : vector<8x784xf32>
    %cst_35 = arith.constant 0.000000e+00 : f32
    %67 = vector.broadcast %cst_35 : f32 to vector<8x1xf32>
    %68 = vector.extract_strided_slice %15 {offsets = [0, 1], sizes = [8, 783], strides = [1, 1]} : vector<8x784xf32> to vector<8x783xf32>
    %69 = tpu.concatenate %68, %67 in 1 : vector<8x783xf32>, vector<8x1xf32> -> vector<8x784xf32>
    %c5 = arith.constant 5 : index
    %c0_36 = arith.constant 0 : index
    %70 = vector.load %arg5[%c5, %c0_36] : memref<9x784xf32, #tpu.memory_space<vmem>>, vector<1x784xf32>
    %cst_37 = arith.constant 5.000000e-01 : f32
    %71 = vector.broadcast %cst_37 : f32 to vector<1x784xf32>
    %72 = arith.cmpf ogt, %70, %71 : vector<1x784xf32>
    %cst_38 = arith.constant -1.000000e+30 : f32
    %73 = vector.shape_cast %72 : vector<1x784xi1> to vector<1x784xi1>
    %74 = vector.broadcast %73 : vector<1x784xi1> to vector<8x784xi1>
    %75 = vector.broadcast %cst_38 : f32 to vector<8x784xf32>
    %76 = arith.select %74, %69, %75 : vector<8x784xi1>, vector<8x784xf32>
    %77 = arith.maximumf %66, %76 : vector<8x784xf32>
    %cst_39 = arith.constant 0.000000e+00 : f32
    %78 = vector.broadcast %cst_39 : f32 to vector<8x27xf32>
    %79 = vector.extract_strided_slice %15 {offsets = [0, 27], sizes = [8, 757], strides = [1, 1]} : vector<8x784xf32> to vector<8x757xf32>
    %80 = tpu.concatenate %79, %78 in 1 : vector<8x757xf32>, vector<8x27xf32> -> vector<8x784xf32>
    %c6 = arith.constant 6 : index
    %c0_40 = arith.constant 0 : index
    %81 = vector.load %arg5[%c6, %c0_40] : memref<9x784xf32, #tpu.memory_space<vmem>>, vector<1x784xf32>
    %cst_41 = arith.constant 5.000000e-01 : f32
    %82 = vector.broadcast %cst_41 : f32 to vector<1x784xf32>
    %83 = arith.cmpf ogt, %81, %82 : vector<1x784xf32>
    %cst_42 = arith.constant -1.000000e+30 : f32
    %84 = vector.shape_cast %83 : vector<1x784xi1> to vector<1x784xi1>
    %85 = vector.broadcast %84 : vector<1x784xi1> to vector<8x784xi1>
    %86 = vector.broadcast %cst_42 : f32 to vector<8x784xf32>
    %87 = arith.select %85, %80, %86 : vector<8x784xi1>, vector<8x784xf32>
    %88 = arith.maximumf %77, %87 : vector<8x784xf32>
    %cst_43 = arith.constant 0.000000e+00 : f32
    %89 = vector.broadcast %cst_43 : f32 to vector<8x28xf32>
    %90 = vector.extract_strided_slice %15 {offsets = [0, 28], sizes = [8, 756], strides = [1, 1]} : vector<8x784xf32> to vector<8x756xf32>
    %91 = tpu.concatenate %90, %89 in 1 : vector<8x756xf32>, vector<8x28xf32> -> vector<8x784xf32>
    %c7 = arith.constant 7 : index
    %c0_44 = arith.constant 0 : index
    %92 = vector.load %arg5[%c7, %c0_44] : memref<9x784xf32, #tpu.memory_space<vmem>>, vector<1x784xf32>
    %cst_45 = arith.constant 5.000000e-01 : f32
    %93 = vector.broadcast %cst_45 : f32 to vector<1x784xf32>
    %94 = arith.cmpf ogt, %92, %93 : vector<1x784xf32>
    %cst_46 = arith.constant -1.000000e+30 : f32
    %95 = vector.shape_cast %94 : vector<1x784xi1> to vector<1x784xi1>
    %96 = vector.broadcast %95 : vector<1x784xi1> to vector<8x784xi1>
    %97 = vector.broadcast %cst_46 : f32 to vector<8x784xf32>
    %98 = arith.select %96, %91, %97 : vector<8x784xi1>, vector<8x784xf32>
    %99 = arith.maximumf %88, %98 : vector<8x784xf32>
    %cst_47 = arith.constant 0.000000e+00 : f32
    %100 = vector.broadcast %cst_47 : f32 to vector<8x29xf32>
    %101 = vector.extract_strided_slice %15 {offsets = [0, 29], sizes = [8, 755], strides = [1, 1]} : vector<8x784xf32> to vector<8x755xf32>
    %102 = tpu.concatenate %101, %100 in 1 : vector<8x755xf32>, vector<8x29xf32> -> vector<8x784xf32>
    %c8 = arith.constant 8 : index
    %c0_48 = arith.constant 0 : index
    %103 = vector.load %arg5[%c8, %c0_48] : memref<9x784xf32, #tpu.memory_space<vmem>>, vector<1x784xf32>
    %cst_49 = arith.constant 5.000000e-01 : f32
    %104 = vector.broadcast %cst_49 : f32 to vector<1x784xf32>
    %105 = arith.cmpf ogt, %103, %104 : vector<1x784xf32>
    %cst_50 = arith.constant -1.000000e+30 : f32
    %106 = vector.shape_cast %105 : vector<1x784xi1> to vector<1x784xi1>
    %107 = vector.broadcast %106 : vector<1x784xi1> to vector<8x784xi1>
    %108 = vector.broadcast %cst_50 : f32 to vector<8x784xf32>
    %109 = arith.select %107, %102, %108 : vector<8x784xi1>, vector<8x784xf32>
    %110 = arith.maximumf %99, %109 : vector<8x784xf32>
    %111 = arith.truncf %110 : vector<8x784xf32> to vector<8x784xbf16>
    %c0_51 = arith.constant 0 : index
    %c0_52 = arith.constant 0 : index
    %112 = vector.load %arg6[%c0_51, %c0_52] : memref<784x256xbf16, #tpu.memory_space<vmem>>, vector<784x256xbf16>
    %cst_53 = arith.constant dense<0.000000e+00> : vector<8x256xf32>
    %113 = tpu.matmul %111, %112, %cst_53 {dimension_numbers = #tpu.dot_dimension_numbers<[1], [0], [0], [1], [0, 0, 1, 1], [], []>} : vector<8x784xbf16>, vector<784x256xbf16>, vector<8x256xf32> -> vector<8x256xf32>
    %c0_54 = arith.constant 0 : index
    %c0_55 = arith.constant 0 : index
    %114 = vector.load %arg42[%c0_54, %c0_55] : memref<16x256xf32, #tpu.memory_space<vmem>>, vector<8x256xf32>
    tpu.vector_store %arg42[%c0_54, %c0_55], %113 {strides = array<i32>} : memref<16x256xf32, #tpu.memory_space<vmem>>, vector<8x256xf32>,
    %c0_56 = arith.constant 0 : index
    %c0_57 = arith.constant 0 : index
    %115 = vector.load %arg42[%c0_56, %c0_57] : memref<16x256xf32, #tpu.memory_space<vmem>>, vector<16x256xf32>
    %c0_58 = arith.constant 0 : index
    %c0_59 = arith.constant 0 : index
    %116 = vector.load %arg17[%c0_58, %c0_59] : memref<16x1xf32, #tpu.memory_space<vmem>>, vector<16x1xf32>
    %117 = vector.broadcast %116 : vector<16x1xf32> to vector<16x256xf32>
    %118 = arith.mulf %115, %117 : vector<16x256xf32>
    %c0_60 = arith.constant 0 : index
    %c0_61 = arith.constant 0 : index
    %119 = vector.load %arg18[%c0_60, %c0_61] : memref<16x1xf32, #tpu.memory_space<vmem>>, vector<16x1xf32>
    %120 = vector.broadcast %119 : vector<16x1xf32> to vector<16x256xf32>
    %121 = arith.addf %118, %120 : vector<16x256xf32>
    %cst_62 = arith.constant 0.000000e+00 : f32
    %122 = vector.broadcast %cst_62 : f32 to vector<16x256xf32>
    %123 = arith.maximumf %121, %122 : vector<16x256xf32>
    %c0_63 = arith.constant 0 : index
    %c0_64 = arith.constant 0 : index
    %124 = vector.load %arg19[%c0_63, %c0_64] : memref<16x16xbf16, #tpu.memory_space<vmem>>, vector<16x16xbf16>
    %125 = arith.truncf %123 : vector<16x256xf32> to vector<16x256xbf16>
    %cst_65 = arith.constant dense<0.000000e+00> : vector<16x256xf32>
    %126 = tpu.matmul %124, %125, %cst_65 {dimension_numbers = #tpu.dot_dimension_numbers<[1], [0], [0], [1], [0, 0, 1, 1], [], []>} : vector<16x16xbf16>, vector<16x256xbf16>, vector<16x256xf32> -> vector<16x256xf32>
    %c0_66 = arith.constant 0 : index
    %c0_67 = arith.constant 0 : index
    %127 = vector.load %arg20[%c0_66, %c0_67] : memref<16x1xf32, #tpu.memory_space<vmem>>, vector<16x1xf32>
    %128 = vector.broadcast %127 : vector<16x1xf32> to vector<16x256xf32>
    %129 = arith.mulf %126, %128 : vector<16x256xf32>
    %c0_68 = arith.constant 0 : index
    %c0_69 = arith.constant 0 : index
    %130 = vector.load %arg21[%c0_68, %c0_69] : memref<16x1xf32, #tpu.memory_space<vmem>>, vector<16x1xf32>
    %131 = vector.broadcast %130 : vector<16x1xf32> to vector<16x256xf32>
    %132 = arith.addf %129, %131 : vector<16x256xf32>
    %cst_70 = arith.constant 0.000000e+00 : f32
    %133 = vector.broadcast %cst_70 : f32 to vector<16x256xf32>
    %134 = arith.maximumf %132, %133 : vector<16x256xf32>
    %c0_71 = arith.constant 0 : index
    %c0_72 = arith.constant 0 : index
    %135 = vector.load %arg7[%c0_71, %c0_72] : memref<1x256xf32, #tpu.memory_space<vmem>>, vector<1x256xf32>
    %cst_73 = arith.constant 5.000000e-01 : f32
    %136 = vector.broadcast %cst_73 : f32 to vector<1x256xf32>
    %137 = arith.cmpf ogt, %135, %136 : vector<1x256xf32>
    %cst_74 = arith.constant 0.000000e+00 : f32
    %138 = vector.shape_cast %137 : vector<1x256xi1> to vector<1x256xi1>
    %139 = vector.broadcast %138 : vector<1x256xi1> to vector<16x256xi1>
    %140 = vector.broadcast %cst_74 : f32 to vector<16x256xf32>
    %141 = arith.select %139, %134, %140 : vector<16x256xi1>, vector<16x256xf32>
    %142 = arith.truncf %141 : vector<16x256xf32> to vector<16x256xbf16>
    %cst_75 = arith.constant 0.000000e+00 : bf16
    %143 = vector.broadcast %cst_75 : bf16 to vector<16x17xbf16>
    %144 = vector.extract_strided_slice %142 {offsets = [0, 0], sizes = [16, 239], strides = [1, 1]} : vector<16x256xbf16> to vector<16x239xbf16>
    %145 = tpu.concatenate %143, %144 in 1 : vector<16x17xbf16>, vector<16x239xbf16> -> vector<16x256xbf16>
    %c0_76 = arith.constant 0 : index
    %c0_77 = arith.constant 0 : index
    %146 = vector.load %arg44[%c0_76, %c0_77] : memref<144x256xbf16, #tpu.memory_space<vmem>>, vector<16x256xbf16>
    tpu.vector_store %arg44[%c0_76, %c0_77], %145 {strides = array<i32>} : memref<144x256xbf16, #tpu.memory_space<vmem>>, vector<16x256xbf16>,
    %cst_78 = arith.constant 0.000000e+00 : bf16
    %147 = vector.broadcast %cst_78 : bf16 to vector<16x16xbf16>
    %148 = vector.extract_strided_slice %142 {offsets = [0, 0], sizes = [16, 240], strides = [1, 1]} : vector<16x256xbf16> to vector<16x240xbf16>
    %149 = tpu.concatenate %147, %148 in 1 : vector<16x16xbf16>, vector<16x240xbf16> -> vector<16x256xbf16>
    %c16 = arith.constant 16 : index
    %c0_79 = arith.constant 0 : index
    %150 = vector.load %arg44[%c16, %c0_79] : memref<144x256xbf16, #tpu.memory_space<vmem>>, vector<16x256xbf16>
    tpu.vector_store %arg44[%c16, %c0_79], %149 {strides = array<i32>} : memref<144x256xbf16, #tpu.memory_space<vmem>>, vector<16x256xbf16>,
    %cst_80 = arith.constant 0.000000e+00 : bf16
    %151 = vector.broadcast %cst_80 : bf16 to vector<16x15xbf16>
    %152 = vector.extract_strided_slice %142 {offsets = [0, 0], sizes = [16, 241], strides = [1, 1]} : vector<16x256xbf16> to vector<16x241xbf16>
    %153 = tpu.concatenate %151, %152 in 1 : vector<16x15xbf16>, vector<16x241xbf16> -> vector<16x256xbf16>
    %c32 = arith.constant 32 : index
    %c0_81 = arith.constant 0 : index
    %154 = vector.load %arg44[%c32, %c0_81] : memref<144x256xbf16, #tpu.memory_space<vmem>>, vector<16x256xbf16>
    tpu.vector_store %arg44[%c32, %c0_81], %153 {strides = array<i32>} : memref<144x256xbf16, #tpu.memory_space<vmem>>, vector<16x256xbf16>,
    %cst_82 = arith.constant 0.000000e+00 : bf16
    %155 = vector.broadcast %cst_82 : bf16 to vector<16x1xbf16>
    %156 = vector.extract_strided_slice %142 {offsets = [0, 0], sizes = [16, 255], strides = [1, 1]} : vector<16x256xbf16> to vector<16x255xbf16>
    %157 = tpu.concatenate %155, %156 in 1 : vector<16x1xbf16>, vector<16x255xbf16> -> vector<16x256xbf16>
    %c48 = arith.constant 48 : index
    %c0_83 = arith.constant 0 : index
    %158 = vector.load %arg44[%c48, %c0_83] : memref<144x256xbf16, #tpu.memory_space<vmem>>, vector<16x256xbf16>
    tpu.vector_store %arg44[%c48, %c0_83], %157 {strides = array<i32>} : memref<144x256xbf16, #tpu.memory_space<vmem>>, vector<16x256xbf16>,
    %c64 = arith.constant 64 : index
    %c0_84 = arith.constant 0 : index
    %159 = vector.load %arg44[%c64, %c0_84] : memref<144x256xbf16, #tpu.memory_space<vmem>>, vector<16x256xbf16>
    tpu.vector_store %arg44[%c64, %c0_84], %142 {strides = array<i32>} : memref<144x256xbf16, #tpu.memory_space<vmem>>, vector<16x256xbf16>,
    %cst_85 = arith.constant 0.000000e+00 : bf16
    %160 = vector.broadcast %cst_85 : bf16 to vector<16x1xbf16>
    %161 = vector.extract_strided_slice %142 {offsets = [0, 1], sizes = [16, 255], strides = [1, 1]} : vector<16x256xbf16> to vector<16x255xbf16>
    %162 = tpu.concatenate %161, %160 in 1 : vector<16x255xbf16>, vector<16x1xbf16> -> vector<16x256xbf16>
    %c80 = arith.constant 80 : index
    %c0_86 = arith.constant 0 : index
    %163 = vector.load %arg44[%c80, %c0_86] : memref<144x256xbf16, #tpu.memory_space<vmem>>, vector<16x256xbf16>
    tpu.vector_store %arg44[%c80, %c0_86], %162 {strides = array<i32>} : memref<144x256xbf16, #tpu.memory_space<vmem>>, vector<16x256xbf16>,
    %cst_87 = arith.constant 0.000000e+00 : bf16
    %164 = vector.broadcast %cst_87 : bf16 to vector<16x15xbf16>
    %165 = vector.extract_strided_slice %142 {offsets = [0, 15], sizes = [16, 241], strides = [1, 1]} : vector<16x256xbf16> to vector<16x241xbf16>
    %166 = tpu.concatenate %165, %164 in 1 : vector<16x241xbf16>, vector<16x15xbf16> -> vector<16x256xbf16>
    %c96 = arith.constant 96 : index
    %c0_88 = arith.constant 0 : index
    %167 = vector.load %arg44[%c96, %c0_88] : memref<144x256xbf16, #tpu.memory_space<vmem>>, vector<16x256xbf16>
    tpu.vector_store %arg44[%c96, %c0_88], %166 {strides = array<i32>} : memref<144x256xbf16, #tpu.memory_space<vmem>>, vector<16x256xbf16>,
    %cst_89 = arith.constant 0.000000e+00 : bf16
    %168 = vector.broadcast %cst_89 : bf16 to vector<16x16xbf16>
    %169 = vector.extract_strided_slice %142 {offsets = [0, 16], sizes = [16, 240], strides = [1, 1]} : vector<16x256xbf16> to vector<16x240xbf16>
    %170 = tpu.concatenate %169, %168 in 1 : vector<16x240xbf16>, vector<16x16xbf16> -> vector<16x256xbf16>
    %c112 = arith.constant 112 : index
    %c0_90 = arith.constant 0 : index
    %171 = vector.load %arg44[%c112, %c0_90] : memref<144x256xbf16, #tpu.memory_space<vmem>>, vector<16x256xbf16>
    tpu.vector_store %arg44[%c112, %c0_90], %170 {strides = array<i32>} : memref<144x256xbf16, #tpu.memory_space<vmem>>, vector<16x256xbf16>,
    %cst_91 = arith.constant 0.000000e+00 : bf16
    %172 = vector.broadcast %cst_91 : bf16 to vector<16x17xbf16>
    %173 = vector.extract_strided_slice %142 {offsets = [0, 17], sizes = [16, 239], strides = [1, 1]} : vector<16x256xbf16> to vector<16x239xbf16>
    %174 = tpu.concatenate %173, %172 in 1 : vector<16x239xbf16>, vector<16x17xbf16> -> vector<16x256xbf16>
    %c128 = arith.constant 128 : index
    %c0_92 = arith.constant 0 : index
    %175 = vector.load %arg44[%c128, %c0_92] : memref<144x256xbf16, #tpu.memory_space<vmem>>, vector<16x256xbf16>
    tpu.vector_store %arg44[%c128, %c0_92], %174 {strides = array<i32>} : memref<144x256xbf16, #tpu.memory_space<vmem>>, vector<16x256xbf16>,
    %c0_93 = arith.constant 0 : index
    %c0_94 = arith.constant 0 : index
    %176 = vector.load %arg22[%c0_93, %c0_94] : memref<4x144xbf16, #tpu.memory_space<vmem>>, vector<4x144xbf16>
    %c0_95 = arith.constant 0 : index
    %c0_96 = arith.constant 0 : index
    %177 = vector.load %arg44[%c0_95, %c0_96] : memref<144x256xbf16, #tpu.memory_space<vmem>>, vector<144x256xbf16>
    %cst_97 = arith.constant dense<0.000000e+00> : vector<4x256xf32>
    %178 = tpu.matmul %176, %177, %cst_97 {dimension_numbers = #tpu.dot_dimension_numbers<[1], [0], [0], [1], [0, 0, 1, 1], [], []>} : vector<4x144xbf16>, vector<144x256xbf16>, vector<4x256xf32> -> vector<4x256xf32>
    %cst_98 = arith.constant 0.000000e+00 : f32
    %179 = vector.shape_cast %137 : vector<1x256xi1> to vector<1x256xi1>
    %180 = vector.broadcast %179 : vector<1x256xi1> to vector<4x256xi1>
    %181 = vector.broadcast %cst_98 : f32 to vector<4x256xf32>
    %182 = arith.select %180, %178, %181 : vector<4x256xi1>, vector<4x256xf32>
    %c8_99 = arith.constant 8 : index
    %c0_100 = arith.constant 0 : index
    %183 = vector.load %arg42[%c8_99, %c0_100] : memref<16x256xf32, #tpu.memory_space<vmem>>, vector<4x256xf32>
    tpu.vector_store %arg42[%c8_99, %c0_100], %182 {strides = array<i32>} : memref<16x256xf32, #tpu.memory_space<vmem>>, vector<4x256xf32>,
    %c0_101 = arith.constant 0 : index
    %c0_102 = arith.constant 0 : index
    %184 = vector.load %arg42[%c0_101, %c0_102] : memref<16x256xf32, #tpu.memory_space<vmem>>, vector<16x256xf32>
    %c0_103 = arith.constant 0 : index
    %c0_104 = arith.constant 0 : index
    %185 = vector.load %arg23[%c0_103, %c0_104] : memref<16x1xf32, #tpu.memory_space<vmem>>, vector<16x1xf32>
    %186 = vector.broadcast %185 : vector<16x1xf32> to vector<16x256xf32>
    %187 = arith.mulf %184, %186 : vector<16x256xf32>
    %c0_105 = arith.constant 0 : index
    %c0_106 = arith.constant 0 : index
    %188 = vector.load %arg24[%c0_105, %c0_106] : memref<16x1xf32, #tpu.memory_space<vmem>>, vector<16x1xf32>
    %189 = vector.broadcast %188 : vector<16x1xf32> to vector<16x256xf32>
    %190 = arith.addf %187, %189 : vector<16x256xf32>
    %cst_107 = arith.constant 0.000000e+00 : f32
    %191 = vector.broadcast %cst_107 : f32 to vector<16x256xf32>
    %192 = arith.maximumf %190, %191 : vector<16x256xf32>
    %c0_108 = arith.constant 0 : index
    %c0_109 = arith.constant 0 : index
    %193 = vector.load %arg25[%c0_108, %c0_109] : memref<16x16xbf16, #tpu.memory_space<vmem>>, vector<16x16xbf16>
    %194 = arith.truncf %192 : vector<16x256xf32> to vector<16x256xbf16>
    %cst_110 = arith.constant dense<0.000000e+00> : vector<16x256xf32>
    %195 = tpu.matmul %193, %194, %cst_110 {dimension_numbers = #tpu.dot_dimension_numbers<[1], [0], [0], [1], [0, 0, 1, 1], [], []>} : vector<16x16xbf16>, vector<16x256xbf16>, vector<16x256xf32> -> vector<16x256xf32>
    %c0_111 = arith.constant 0 : index
    %c0_112 = arith.constant 0 : index
    %196 = vector.load %arg26[%c0_111, %c0_112] : memref<16x1xf32, #tpu.memory_space<vmem>>, vector<16x1xf32>
    %197 = vector.broadcast %196 : vector<16x1xf32> to vector<16x256xf32>
    %198 = arith.mulf %195, %197 : vector<16x256xf32>
    %c0_113 = arith.constant 0 : index
    %c0_114 = arith.constant 0 : index
    %199 = vector.load %arg27[%c0_113, %c0_114] : memref<16x1xf32, #tpu.memory_space<vmem>>, vector<16x1xf32>
    %200 = vector.broadcast %199 : vector<16x1xf32> to vector<16x256xf32>
    %201 = arith.addf %198, %200 : vector<16x256xf32>
    %cst_115 = arith.constant 0.000000e+00 : f32
    %202 = vector.broadcast %cst_115 : f32 to vector<16x256xf32>
    %203 = arith.maximumf %201, %202 : vector<16x256xf32>
    %c0_116 = arith.constant 0 : index
    %c0_117 = arith.constant 0 : index
    %204 = vector.load %arg7[%c0_116, %c0_117] : memref<1x256xf32, #tpu.memory_space<vmem>>, vector<1x256xf32>
    %cst_118 = arith.constant 5.000000e-01 : f32
    %205 = vector.broadcast %cst_118 : f32 to vector<1x256xf32>
    %206 = arith.cmpf ogt, %204, %205 : vector<1x256xf32>
    %cst_119 = arith.constant 0.000000e+00 : f32
    %207 = vector.shape_cast %206 : vector<1x256xi1> to vector<1x256xi1>
    %208 = vector.broadcast %207 : vector<1x256xi1> to vector<16x256xi1>
    %209 = vector.broadcast %cst_119 : f32 to vector<16x256xf32>
    %210 = arith.select %208, %203, %209 : vector<16x256xi1>, vector<16x256xf32>
    %211 = arith.truncf %210 : vector<16x256xf32> to vector<16x256xbf16>
    %cst_120 = arith.constant 0.000000e+00 : bf16
    %212 = vector.broadcast %cst_120 : bf16 to vector<16x17xbf16>
    %213 = vector.extract_strided_slice %211 {offsets = [0, 0], sizes = [16, 239], strides = [1, 1]} : vector<16x256xbf16> to vector<16x239xbf16>
    %214 = tpu.concatenate %212, %213 in 1 : vector<16x17xbf16>, vector<16x239xbf16> -> vector<16x256xbf16>
    %c0_121 = arith.constant 0 : index
    %c0_122 = arith.constant 0 : index
    %215 = vector.load %arg44[%c0_121, %c0_122] : memref<144x256xbf16, #tpu.memory_space<vmem>>, vector<16x256xbf16>
    tpu.vector_store %arg44[%c0_121, %c0_122], %214 {strides = array<i32>} : memref<144x256xbf16, #tpu.memory_space<vmem>>, vector<16x256xbf16>,
    %cst_123 = arith.constant 0.000000e+00 : bf16
    %216 = vector.broadcast %cst_123 : bf16 to vector<16x16xbf16>
    %217 = vector.extract_strided_slice %211 {offsets = [0, 0], sizes = [16, 240], strides = [1, 1]} : vector<16x256xbf16> to vector<16x240xbf16>
    %218 = tpu.concatenate %216, %217 in 1 : vector<16x16xbf16>, vector<16x240xbf16> -> vector<16x256xbf16>
    %c16_124 = arith.constant 16 : index
    %c0_125 = arith.constant 0 : index
    %219 = vector.load %arg44[%c16_124, %c0_125] : memref<144x256xbf16, #tpu.memory_space<vmem>>, vector<16x256xbf16>
    tpu.vector_store %arg44[%c16_124, %c0_125], %218 {strides = array<i32>} : memref<144x256xbf16, #tpu.memory_space<vmem>>, vector<16x256xbf16>,
    %cst_126 = arith.constant 0.000000e+00 : bf16
    %220 = vector.broadcast %cst_126 : bf16 to vector<16x15xbf16>
    %221 = vector.extract_strided_slice %211 {offsets = [0, 0], sizes = [16, 241], strides = [1, 1]} : vector<16x256xbf16> to vector<16x241xbf16>
    %222 = tpu.concatenate %220, %221 in 1 : vector<16x15xbf16>, vector<16x241xbf16> -> vector<16x256xbf16>
    %c32_127 = arith.constant 32 : index
    %c0_128 = arith.constant 0 : index
    %223 = vector.load %arg44[%c32_127, %c0_128] : memref<144x256xbf16, #tpu.memory_space<vmem>>, vector<16x256xbf16>
    tpu.vector_store %arg44[%c32_127, %c0_128], %222 {strides = array<i32>} : memref<144x256xbf16, #tpu.memory_space<vmem>>, vector<16x256xbf16>,
    %cst_129 = arith.constant 0.000000e+00 : bf16
    %224 = vector.broadcast %cst_129 : bf16 to vector<16x1xbf16>
    %225 = vector.extract_strided_slice %211 {offsets = [0, 0], sizes = [16, 255], strides = [1, 1]} : vector<16x256xbf16> to vector<16x255xbf16>
    %226 = tpu.concatenate %224, %225 in 1 : vector<16x1xbf16>, vector<16x255xbf16> -> vector<16x256xbf16>
    %c48_130 = arith.constant 48 : index
    %c0_131 = arith.constant 0 : index
    %227 = vector.load %arg44[%c48_130, %c0_131] : memref<144x256xbf16, #tpu.memory_space<vmem>>, vector<16x256xbf16>
    tpu.vector_store %arg44[%c48_130, %c0_131], %226 {strides = array<i32>} : memref<144x256xbf16, #tpu.memory_space<vmem>>, vector<16x256xbf16>,
    %c64_132 = arith.constant 64 : index
    %c0_133 = arith.constant 0 : index
    %228 = vector.load %arg44[%c64_132, %c0_133] : memref<144x256xbf16, #tpu.memory_space<vmem>>, vector<16x256xbf16>
    tpu.vector_store %arg44[%c64_132, %c0_133], %211 {strides = array<i32>} : memref<144x256xbf16, #tpu.memory_space<vmem>>, vector<16x256xbf16>,
    %cst_134 = arith.constant 0.000000e+00 : bf16
    %229 = vector.broadcast %cst_134 : bf16 to vector<16x1xbf16>
    %230 = vector.extract_strided_slice %211 {offsets = [0, 1], sizes = [16, 255], strides = [1, 1]} : vector<16x256xbf16> to vector<16x255xbf16>
    %231 = tpu.concatenate %230, %229 in 1 : vector<16x255xbf16>, vector<16x1xbf16> -> vector<16x256xbf16>
    %c80_135 = arith.constant 80 : index
    %c0_136 = arith.constant 0 : index
    %232 = vector.load %arg44[%c80_135, %c0_136] : memref<144x256xbf16, #tpu.memory_space<vmem>>, vector<16x256xbf16>
    tpu.vector_store %arg44[%c80_135, %c0_136], %231 {strides = array<i32>} : memref<144x256xbf16, #tpu.memory_space<vmem>>, vector<16x256xbf16>,
    %cst_137 = arith.constant 0.000000e+00 : bf16
    %233 = vector.broadcast %cst_137 : bf16 to vector<16x15xbf16>
    %234 = vector.extract_strided_slice %211 {offsets = [0, 15], sizes = [16, 241], strides = [1, 1]} : vector<16x256xbf16> to vector<16x241xbf16>
    %235 = tpu.concatenate %234, %233 in 1 : vector<16x241xbf16>, vector<16x15xbf16> -> vector<16x256xbf16>
    %c96_138 = arith.constant 96 : index
    %c0_139 = arith.constant 0 : index
    %236 = vector.load %arg44[%c96_138, %c0_139] : memref<144x256xbf16, #tpu.memory_space<vmem>>, vector<16x256xbf16>
    tpu.vector_store %arg44[%c96_138, %c0_139], %235 {strides = array<i32>} : memref<144x256xbf16, #tpu.memory_space<vmem>>, vector<16x256xbf16>,
    %cst_140 = arith.constant 0.000000e+00 : bf16
    %237 = vector.broadcast %cst_140 : bf16 to vector<16x16xbf16>
    %238 = vector.extract_strided_slice %211 {offsets = [0, 16], sizes = [16, 240], strides = [1, 1]} : vector<16x256xbf16> to vector<16x240xbf16>
    %239 = tpu.concatenate %238, %237 in 1 : vector<16x240xbf16>, vector<16x16xbf16> -> vector<16x256xbf16>
    %c112_141 = arith.constant 112 : index
    %c0_142 = arith.constant 0 : index
    %240 = vector.load %arg44[%c112_141, %c0_142] : memref<144x256xbf16, #tpu.memory_space<vmem>>, vector<16x256xbf16>
    tpu.vector_store %arg44[%c112_141, %c0_142], %239 {strides = array<i32>} : memref<144x256xbf16, #tpu.memory_space<vmem>>, vector<16x256xbf16>,
    %cst_143 = arith.constant 0.000000e+00 : bf16
    %241 = vector.broadcast %cst_143 : bf16 to vector<16x17xbf16>
    %242 = vector.extract_strided_slice %211 {offsets = [0, 17], sizes = [16, 239], strides = [1, 1]} : vector<16x256xbf16> to vector<16x239xbf16>
    %243 = tpu.concatenate %242, %241 in 1 : vector<16x239xbf16>, vector<16x17xbf16> -> vector<16x256xbf16>
    %c128_144 = arith.constant 128 : index
    %c0_145 = arith.constant 0 : index
    %244 = vector.load %arg44[%c128_144, %c0_145] : memref<144x256xbf16, #tpu.memory_space<vmem>>, vector<16x256xbf16>
    tpu.vector_store %arg44[%c128_144, %c0_145], %243 {strides = array<i32>} : memref<144x256xbf16, #tpu.memory_space<vmem>>, vector<16x256xbf16>,
    %c0_146 = arith.constant 0 : index
    %c0_147 = arith.constant 0 : index
    %245 = vector.load %arg28[%c0_146, %c0_147] : memref<4x144xbf16, #tpu.memory_space<vmem>>, vector<4x144xbf16>
    %c0_148 = arith.constant 0 : index
    %c0_149 = arith.constant 0 : index
    %246 = vector.load %arg44[%c0_148, %c0_149] : memref<144x256xbf16, #tpu.memory_space<vmem>>, vector<144x256xbf16>
    %cst_150 = arith.constant dense<0.000000e+00> : vector<4x256xf32>
    %247 = tpu.matmul %245, %246, %cst_150 {dimension_numbers = #tpu.dot_dimension_numbers<[1], [0], [0], [1], [0, 0, 1, 1], [], []>} : vector<4x144xbf16>, vector<144x256xbf16>, vector<4x256xf32> -> vector<4x256xf32>
    %cst_151 = arith.constant 0.000000e+00 : f32
    %248 = vector.shape_cast %206 : vector<1x256xi1> to vector<1x256xi1>
    %249 = vector.broadcast %248 : vector<1x256xi1> to vector<4x256xi1>
    %250 = vector.broadcast %cst_151 : f32 to vector<4x256xf32>
    %251 = arith.select %249, %247, %250 : vector<4x256xi1>, vector<4x256xf32>
    %c12 = arith.constant 12 : index
    %c0_152 = arith.constant 0 : index
    %252 = vector.load %arg42[%c12, %c0_152] : memref<16x256xf32, #tpu.memory_space<vmem>>, vector<4x256xf32>
    tpu.vector_store %arg42[%c12, %c0_152], %251 {strides = array<i32>} : memref<16x256xf32, #tpu.memory_space<vmem>>, vector<4x256xf32>,
    %c0_153 = arith.constant 0 : index
    %c0_154 = arith.constant 0 : index
    %253 = vector.load %arg42[%c0_153, %c0_154] : memref<16x256xf32, #tpu.memory_space<vmem>>, vector<16x256xf32>
    %c0_155 = arith.constant 0 : index
    %c0_156 = arith.constant 0 : index
    %254 = vector.load %arg9[%c0_155, %c0_156] : memref<16x1xf32, #tpu.memory_space<vmem>>, vector<16x1xf32>
    %255 = vector.broadcast %254 : vector<16x1xf32> to vector<16x256xf32>
    %256 = arith.mulf %253, %255 : vector<16x256xf32>
    %c0_157 = arith.constant 0 : index
    %c0_158 = arith.constant 0 : index
    %257 = vector.load %arg10[%c0_157, %c0_158] : memref<16x1xf32, #tpu.memory_space<vmem>>, vector<16x1xf32>
    %258 = vector.broadcast %257 : vector<16x1xf32> to vector<16x256xf32>
    %259 = arith.addf %256, %258 : vector<16x256xf32>
    %cst_159 = arith.constant 0.000000e+00 : f32
    %260 = vector.broadcast %cst_159 : f32 to vector<16x256xf32>
    %261 = arith.maximumf %259, %260 : vector<16x256xf32>
    %c0_160 = arith.constant 0 : index
    %c0_161 = arith.constant 0 : index
    %262 = vector.load %arg11[%c0_160, %c0_161] : memref<8x16xbf16, #tpu.memory_space<vmem>>, vector<8x16xbf16>
    %263 = arith.truncf %261 : vector<16x256xf32> to vector<16x256xbf16>
    %cst_162 = arith.constant dense<0.000000e+00> : vector<8x256xf32>
    %264 = tpu.matmul %262, %263, %cst_162 {dimension_numbers = #tpu.dot_dimension_numbers<[1], [0], [0], [1], [0, 0, 1, 1], [], []>} : vector<8x16xbf16>, vector<16x256xbf16>, vector<8x256xf32> -> vector<8x256xf32>
    %265 = arith.truncf %264 : vector<8x256xf32> to vector<8x256xbf16>
    %c0_163 = arith.constant 0 : index
    %c0_164 = arith.constant 0 : index
    %266 = vector.load %arg12[%c0_163, %c0_164] : memref<256x81xbf16, #tpu.memory_space<vmem>>, vector<256x81xbf16>
    %cst_165 = arith.constant dense<0.000000e+00> : vector<8x81xf32>
    %267 = tpu.matmul %265, %266, %cst_165 {dimension_numbers = #tpu.dot_dimension_numbers<[1], [0], [0], [1], [0, 0, 1, 1], [], []>} : vector<8x256xbf16>, vector<256x81xbf16>, vector<8x81xf32> -> vector<8x81xf32>
    %c0_166 = arith.constant 0 : index
    %c0_167 = arith.constant 0 : index
    %268 = vector.load %arg43[%c0_166, %c0_167] : memref<16x81xf32, #tpu.memory_space<vmem>>, vector<8x81xf32>
    tpu.vector_store %arg43[%c0_166, %c0_167], %267 {strides = array<i32>} : memref<16x81xf32, #tpu.memory_space<vmem>>, vector<8x81xf32>,
    %c0_168 = arith.constant 0 : index
    %c0_169 = arith.constant 0 : index
    %269 = vector.load %arg43[%c0_168, %c0_169] : memref<16x81xf32, #tpu.memory_space<vmem>>, vector<16x81xf32>
    %c0_170 = arith.constant 0 : index
    %c0_171 = arith.constant 0 : index
    %270 = vector.load %arg29[%c0_170, %c0_171] : memref<16x1xf32, #tpu.memory_space<vmem>>, vector<16x1xf32>
    %271 = vector.broadcast %270 : vector<16x1xf32> to vector<16x81xf32>
    %272 = arith.mulf %269, %271 : vector<16x81xf32>
    %c0_172 = arith.constant 0 : index
    %c0_173 = arith.constant 0 : index
    %273 = vector.load %arg30[%c0_172, %c0_173] : memref<16x1xf32, #tpu.memory_space<vmem>>, vector<16x1xf32>
    %274 = vector.broadcast %273 : vector<16x1xf32> to vector<16x81xf32>
    %275 = arith.addf %272, %274 : vector<16x81xf32>
    %cst_174 = arith.constant 0.000000e+00 : f32
    %276 = vector.broadcast %cst_174 : f32 to vector<16x81xf32>
    %277 = arith.maximumf %275, %276 : vector<16x81xf32>
    %c0_175 = arith.constant 0 : index
    %c0_176 = arith.constant 0 : index
    %278 = vector.load %arg31[%c0_175, %c0_176] : memref<16x16xbf16, #tpu.memory_space<vmem>>, vector<16x16xbf16>
    %279 = arith.truncf %277 : vector<16x81xf32> to vector<16x81xbf16>
    %cst_177 = arith.constant dense<0.000000e+00> : vector<16x81xf32>
    %280 = tpu.matmul %278, %279, %cst_177 {dimension_numbers = #tpu.dot_dimension_numbers<[1], [0], [0], [1], [0, 0, 1, 1], [], []>} : vector<16x16xbf16>, vector<16x81xbf16>, vector<16x81xf32> -> vector<16x81xf32>
    %c0_178 = arith.constant 0 : index
    %c0_179 = arith.constant 0 : index
    %281 = vector.load %arg32[%c0_178, %c0_179] : memref<16x1xf32, #tpu.memory_space<vmem>>, vector<16x1xf32>
    %282 = vector.broadcast %281 : vector<16x1xf32> to vector<16x81xf32>
    %283 = arith.mulf %280, %282 : vector<16x81xf32>
    %c0_180 = arith.constant 0 : index
    %c0_181 = arith.constant 0 : index
    %284 = vector.load %arg33[%c0_180, %c0_181] : memref<16x1xf32, #tpu.memory_space<vmem>>, vector<16x1xf32>
    %285 = vector.broadcast %284 : vector<16x1xf32> to vector<16x81xf32>
    %286 = arith.addf %283, %285 : vector<16x81xf32>
    %cst_182 = arith.constant 0.000000e+00 : f32
    %287 = vector.broadcast %cst_182 : f32 to vector<16x81xf32>
    %288 = arith.maximumf %286, %287 : vector<16x81xf32>
    %c0_183 = arith.constant 0 : index
    %c0_184 = arith.constant 0 : index
    %289 = vector.load %arg8[%c0_183, %c0_184] : memref<1x81xf32, #tpu.memory_space<vmem>>, vector<1x81xf32>
    %cst_185 = arith.constant 5.000000e-01 : f32
    %290 = vector.broadcast %cst_185 : f32 to vector<1x81xf32>
    %291 = arith.cmpf ogt, %289, %290 : vector<1x81xf32>
    %cst_186 = arith.constant 0.000000e+00 : f32
    %292 = vector.shape_cast %291 : vector<1x81xi1> to vector<1x81xi1>
    %293 = vector.broadcast %292 : vector<1x81xi1> to vector<16x81xi1>
    %294 = vector.broadcast %cst_186 : f32 to vector<16x81xf32>
    %295 = arith.select %293, %288, %294 : vector<16x81xi1>, vector<16x81xf32>
    %296 = arith.truncf %295 : vector<16x81xf32> to vector<16x81xbf16>
    %cst_187 = arith.constant 0.000000e+00 : bf16
    %297 = vector.broadcast %cst_187 : bf16 to vector<16x10xbf16>
    %298 = vector.extract_strided_slice %296 {offsets = [0, 0], sizes = [16, 71], strides = [1, 1]} : vector<16x81xbf16> to vector<16x71xbf16>
    %299 = tpu.concatenate %297, %298 in 1 : vector<16x10xbf16>, vector<16x71xbf16> -> vector<16x81xbf16>
    %c0_188 = arith.constant 0 : index
    %c0_189 = arith.constant 0 : index
    %300 = vector.load %arg44[%c0_188, %c0_189] : memref<144x256xbf16, #tpu.memory_space<vmem>>, vector<16x81xbf16>
    tpu.vector_store %arg44[%c0_188, %c0_189], %299 {strides = array<i32>} : memref<144x256xbf16, #tpu.memory_space<vmem>>, vector<16x81xbf16>,
    %cst_190 = arith.constant 0.000000e+00 : bf16
    %301 = vector.broadcast %cst_190 : bf16 to vector<16x9xbf16>
    %302 = vector.extract_strided_slice %296 {offsets = [0, 0], sizes = [16, 72], strides = [1, 1]} : vector<16x81xbf16> to vector<16x72xbf16>
    %303 = tpu.concatenate %301, %302 in 1 : vector<16x9xbf16>, vector<16x72xbf16> -> vector<16x81xbf16>
    %c16_191 = arith.constant 16 : index
    %c0_192 = arith.constant 0 : index
    %304 = vector.load %arg44[%c16_191, %c0_192] : memref<144x256xbf16, #tpu.memory_space<vmem>>, vector<16x81xbf16>
    tpu.vector_store %arg44[%c16_191, %c0_192], %303 {strides = array<i32>} : memref<144x256xbf16, #tpu.memory_space<vmem>>, vector<16x81xbf16>,
    %cst_193 = arith.constant 0.000000e+00 : bf16
    %305 = vector.broadcast %cst_193 : bf16 to vector<16x8xbf16>
    %306 = vector.extract_strided_slice %296 {offsets = [0, 0], sizes = [16, 73], strides = [1, 1]} : vector<16x81xbf16> to vector<16x73xbf16>
    %307 = tpu.concatenate %305, %306 in 1 : vector<16x8xbf16>, vector<16x73xbf16> -> vector<16x81xbf16>
    %c32_194 = arith.constant 32 : index
    %c0_195 = arith.constant 0 : index
    %308 = vector.load %arg44[%c32_194, %c0_195] : memref<144x256xbf16, #tpu.memory_space<vmem>>, vector<16x81xbf16>
    tpu.vector_store %arg44[%c32_194, %c0_195], %307 {strides = array<i32>} : memref<144x256xbf16, #tpu.memory_space<vmem>>, vector<16x81xbf16>,
    %cst_196 = arith.constant 0.000000e+00 : bf16
    %309 = vector.broadcast %cst_196 : bf16 to vector<16x1xbf16>
    %310 = vector.extract_strided_slice %296 {offsets = [0, 0], sizes = [16, 80], strides = [1, 1]} : vector<16x81xbf16> to vector<16x80xbf16>
    %311 = tpu.concatenate %309, %310 in 1 : vector<16x1xbf16>, vector<16x80xbf16> -> vector<16x81xbf16>
    %c48_197 = arith.constant 48 : index
    %c0_198 = arith.constant 0 : index
    %312 = vector.load %arg44[%c48_197, %c0_198] : memref<144x256xbf16, #tpu.memory_space<vmem>>, vector<16x81xbf16>
    tpu.vector_store %arg44[%c48_197, %c0_198], %311 {strides = array<i32>} : memref<144x256xbf16, #tpu.memory_space<vmem>>, vector<16x81xbf16>,
    %c64_199 = arith.constant 64 : index
    %c0_200 = arith.constant 0 : index
    %313 = vector.load %arg44[%c64_199, %c0_200] : memref<144x256xbf16, #tpu.memory_space<vmem>>, vector<16x81xbf16>
    tpu.vector_store %arg44[%c64_199, %c0_200], %296 {strides = array<i32>} : memref<144x256xbf16, #tpu.memory_space<vmem>>, vector<16x81xbf16>,
    %cst_201 = arith.constant 0.000000e+00 : bf16
    %314 = vector.broadcast %cst_201 : bf16 to vector<16x1xbf16>
    %315 = vector.extract_strided_slice %296 {offsets = [0, 1], sizes = [16, 80], strides = [1, 1]} : vector<16x81xbf16> to vector<16x80xbf16>
    %316 = tpu.concatenate %315, %314 in 1 : vector<16x80xbf16>, vector<16x1xbf16> -> vector<16x81xbf16>
    %c80_202 = arith.constant 80 : index
    %c0_203 = arith.constant 0 : index
    %317 = vector.load %arg44[%c80_202, %c0_203] : memref<144x256xbf16, #tpu.memory_space<vmem>>, vector<16x81xbf16>
    tpu.vector_store %arg44[%c80_202, %c0_203], %316 {strides = array<i32>} : memref<144x256xbf16, #tpu.memory_space<vmem>>, vector<16x81xbf16>,
    %cst_204 = arith.constant 0.000000e+00 : bf16
    %318 = vector.broadcast %cst_204 : bf16 to vector<16x8xbf16>
    %319 = vector.extract_strided_slice %296 {offsets = [0, 8], sizes = [16, 73], strides = [1, 1]} : vector<16x81xbf16> to vector<16x73xbf16>
    %320 = tpu.concatenate %319, %318 in 1 : vector<16x73xbf16>, vector<16x8xbf16> -> vector<16x81xbf16>
    %c96_205 = arith.constant 96 : index
    %c0_206 = arith.constant 0 : index
    %321 = vector.load %arg44[%c96_205, %c0_206] : memref<144x256xbf16, #tpu.memory_space<vmem>>, vector<16x81xbf16>
    tpu.vector_store %arg44[%c96_205, %c0_206], %320 {strides = array<i32>} : memref<144x256xbf16, #tpu.memory_space<vmem>>, vector<16x81xbf16>,
    %cst_207 = arith.constant 0.000000e+00 : bf16
    %322 = vector.broadcast %cst_207 : bf16 to vector<16x9xbf16>
    %323 = vector.extract_strided_slice %296 {offsets = [0, 9], sizes = [16, 72], strides = [1, 1]} : vector<16x81xbf16> to vector<16x72xbf16>
    %324 = tpu.concatenate %323, %322 in 1 : vector<16x72xbf16>, vector<16x9xbf16> -> vector<16x81xbf16>
    %c112_208 = arith.constant 112 : index
    %c0_209 = arith.constant 0 : index
    %325 = vector.load %arg44[%c112_208, %c0_209] : memref<144x256xbf16, #tpu.memory_space<vmem>>, vector<16x81xbf16>
    tpu.vector_store %arg44[%c112_208, %c0_209], %324 {strides = array<i32>} : memref<144x256xbf16, #tpu.memory_space<vmem>>, vector<16x81xbf16>,
    %cst_210 = arith.constant 0.000000e+00 : bf16
    %326 = vector.broadcast %cst_210 : bf16 to vector<16x10xbf16>
    %327 = vector.extract_strided_slice %296 {offsets = [0, 10], sizes = [16, 71], strides = [1, 1]} : vector<16x81xbf16> to vector<16x71xbf16>
    %328 = tpu.concatenate %327, %326 in 1 : vector<16x71xbf16>, vector<16x10xbf16> -> vector<16x81xbf16>
    %c128_211 = arith.constant 128 : index
    %c0_212 = arith.constant 0 : index
    %329 = vector.load %arg44[%c128_211, %c0_212] : memref<144x256xbf16, #tpu.memory_space<vmem>>, vector<16x81xbf16>
    tpu.vector_store %arg44[%c128_211, %c0_212], %328 {strides = array<i32>} : memref<144x256xbf16, #tpu.memory_space<vmem>>, vector<16x81xbf16>,
    %c0_213 = arith.constant 0 : index
    %c0_214 = arith.constant 0 : index
    %330 = vector.load %arg34[%c0_213, %c0_214] : memref<4x144xbf16, #tpu.memory_space<vmem>>, vector<4x144xbf16>
    %c0_215 = arith.constant 0 : index
    %c0_216 = arith.constant 0 : index
    %331 = vector.load %arg44[%c0_215, %c0_216] : memref<144x256xbf16, #tpu.memory_space<vmem>>, vector<144x81xbf16>
    %cst_217 = arith.constant dense<0.000000e+00> : vector<4x81xf32>
    %332 = tpu.matmul %330, %331, %cst_217 {dimension_numbers = #tpu.dot_dimension_numbers<[1], [0], [0], [1], [0, 0, 1, 1], [], []>} : vector<4x144xbf16>, vector<144x81xbf16>, vector<4x81xf32> -> vector<4x81xf32>
    %cst_218 = arith.constant 0.000000e+00 : f32
    %333 = vector.shape_cast %291 : vector<1x81xi1> to vector<1x81xi1>
    %334 = vector.broadcast %333 : vector<1x81xi1> to vector<4x81xi1>
    %335 = vector.broadcast %cst_218 : f32 to vector<4x81xf32>
    %336 = arith.select %334, %332, %335 : vector<4x81xi1>, vector<4x81xf32>
    %c8_219 = arith.constant 8 : index
    %c0_220 = arith.constant 0 : index
    %337 = vector.load %arg43[%c8_219, %c0_220] : memref<16x81xf32, #tpu.memory_space<vmem>>, vector<4x81xf32>
    tpu.vector_store %arg43[%c8_219, %c0_220], %336 {strides = array<i32>} : memref<16x81xf32, #tpu.memory_space<vmem>>, vector<4x81xf32>,
    %c0_221 = arith.constant 0 : index
    %c0_222 = arith.constant 0 : index
    %338 = vector.load %arg43[%c0_221, %c0_222] : memref<16x81xf32, #tpu.memory_space<vmem>>, vector<16x81xf32>
    %c0_223 = arith.constant 0 : index
    %c0_224 = arith.constant 0 : index
    %339 = vector.load %arg35[%c0_223, %c0_224] : memref<16x1xf32, #tpu.memory_space<vmem>>, vector<16x1xf32>
    %340 = vector.broadcast %339 : vector<16x1xf32> to vector<16x81xf32>
    %341 = arith.mulf %338, %340 : vector<16x81xf32>
    %c0_225 = arith.constant 0 : index
    %c0_226 = arith.constant 0 : index
    %342 = vector.load %arg36[%c0_225, %c0_226] : memref<16x1xf32, #tpu.memory_space<vmem>>, vector<16x1xf32>
    %343 = vector.broadcast %342 : vector<16x1xf32> to vector<16x81xf32>
    %344 = arith.addf %341, %343 : vector<16x81xf32>
    %cst_227 = arith.constant 0.000000e+00 : f32
    %345 = vector.broadcast %cst_227 : f32 to vector<16x81xf32>
    %346 = arith.maximumf %344, %345 : vector<16x81xf32>
    %c0_228 = arith.constant 0 : index
    %c0_229 = arith.constant 0 : index
    %347 = vector.load %arg37[%c0_228, %c0_229] : memref<16x16xbf16, #tpu.memory_space<vmem>>, vector<16x16xbf16>
    %348 = arith.truncf %346 : vector<16x81xf32> to vector<16x81xbf16>
    %cst_230 = arith.constant dense<0.000000e+00> : vector<16x81xf32>
    %349 = tpu.matmul %347, %348, %cst_230 {dimension_numbers = #tpu.dot_dimension_numbers<[1], [0], [0], [1], [0, 0, 1, 1], [], []>} : vector<16x16xbf16>, vector<16x81xbf16>, vector<16x81xf32> -> vector<16x81xf32>
    %c0_231 = arith.constant 0 : index
    %c0_232 = arith.constant 0 : index
    %350 = vector.load %arg38[%c0_231, %c0_232] : memref<16x1xf32, #tpu.memory_space<vmem>>, vector<16x1xf32>
    %351 = vector.broadcast %350 : vector<16x1xf32> to vector<16x81xf32>
    %352 = arith.mulf %349, %351 : vector<16x81xf32>
    %c0_233 = arith.constant 0 : index
    %c0_234 = arith.constant 0 : index
    %353 = vector.load %arg39[%c0_233, %c0_234] : memref<16x1xf32, #tpu.memory_space<vmem>>, vector<16x1xf32>
    %354 = vector.broadcast %353 : vector<16x1xf32> to vector<16x81xf32>
    %355 = arith.addf %352, %354 : vector<16x81xf32>
    %cst_235 = arith.constant 0.000000e+00 : f32
    %356 = vector.broadcast %cst_235 : f32 to vector<16x81xf32>
    %357 = arith.maximumf %355, %356 : vector<16x81xf32>
    %c0_236 = arith.constant 0 : index
    %c0_237 = arith.constant 0 : index
    %358 = vector.load %arg8[%c0_236, %c0_237] : memref<1x81xf32, #tpu.memory_space<vmem>>, vector<1x81xf32>
    %cst_238 = arith.constant 5.000000e-01 : f32
    %359 = vector.broadcast %cst_238 : f32 to vector<1x81xf32>
    %360 = arith.cmpf ogt, %358, %359 : vector<1x81xf32>
    %cst_239 = arith.constant 0.000000e+00 : f32
    %361 = vector.shape_cast %360 : vector<1x81xi1> to vector<1x81xi1>
    %362 = vector.broadcast %361 : vector<1x81xi1> to vector<16x81xi1>
    %363 = vector.broadcast %cst_239 : f32 to vector<16x81xf32>
    %364 = arith.select %362, %357, %363 : vector<16x81xi1>, vector<16x81xf32>
    %365 = arith.truncf %364 : vector<16x81xf32> to vector<16x81xbf16>
    %cst_240 = arith.constant 0.000000e+00 : bf16
    %366 = vector.broadcast %cst_240 : bf16 to vector<16x10xbf16>
    %367 = vector.extract_strided_slice %365 {offsets = [0, 0], sizes = [16, 71], strides = [1, 1]} : vector<16x81xbf16> to vector<16x71xbf16>
    %368 = tpu.concatenate %366, %367 in 1 : vector<16x10xbf16>, vector<16x71xbf16> -> vector<16x81xbf16>
    %c0_241 = arith.constant 0 : index
    %c0_242 = arith.constant 0 : index
    %369 = vector.load %arg44[%c0_241, %c0_242] : memref<144x256xbf16, #tpu.memory_space<vmem>>, vector<16x81xbf16>
    tpu.vector_store %arg44[%c0_241, %c0_242], %368 {strides = array<i32>} : memref<144x256xbf16, #tpu.memory_space<vmem>>, vector<16x81xbf16>,
    %cst_243 = arith.constant 0.000000e+00 : bf16
    %370 = vector.broadcast %cst_243 : bf16 to vector<16x9xbf16>
    %371 = vector.extract_strided_slice %365 {offsets = [0, 0], sizes = [16, 72], strides = [1, 1]} : vector<16x81xbf16> to vector<16x72xbf16>
    %372 = tpu.concatenate %370, %371 in 1 : vector<16x9xbf16>, vector<16x72xbf16> -> vector<16x81xbf16>
    %c16_244 = arith.constant 16 : index
    %c0_245 = arith.constant 0 : index
    %373 = vector.load %arg44[%c16_244, %c0_245] : memref<144x256xbf16, #tpu.memory_space<vmem>>, vector<16x81xbf16>
    tpu.vector_store %arg44[%c16_244, %c0_245], %372 {strides = array<i32>} : memref<144x256xbf16, #tpu.memory_space<vmem>>, vector<16x81xbf16>,
    %cst_246 = arith.constant 0.000000e+00 : bf16
    %374 = vector.broadcast %cst_246 : bf16 to vector<16x8xbf16>
    %375 = vector.extract_strided_slice %365 {offsets = [0, 0], sizes = [16, 73], strides = [1, 1]} : vector<16x81xbf16> to vector<16x73xbf16>
    %376 = tpu.concatenate %374, %375 in 1 : vector<16x8xbf16>, vector<16x73xbf16> -> vector<16x81xbf16>
    %c32_247 = arith.constant 32 : index
    %c0_248 = arith.constant 0 : index
    %377 = vector.load %arg44[%c32_247, %c0_248] : memref<144x256xbf16, #tpu.memory_space<vmem>>, vector<16x81xbf16>
    tpu.vector_store %arg44[%c32_247, %c0_248], %376 {strides = array<i32>} : memref<144x256xbf16, #tpu.memory_space<vmem>>, vector<16x81xbf16>,
    %cst_249 = arith.constant 0.000000e+00 : bf16
    %378 = vector.broadcast %cst_249 : bf16 to vector<16x1xbf16>
    %379 = vector.extract_strided_slice %365 {offsets = [0, 0], sizes = [16, 80], strides = [1, 1]} : vector<16x81xbf16> to vector<16x80xbf16>
    %380 = tpu.concatenate %378, %379 in 1 : vector<16x1xbf16>, vector<16x80xbf16> -> vector<16x81xbf16>
    %c48_250 = arith.constant 48 : index
    %c0_251 = arith.constant 0 : index
    %381 = vector.load %arg44[%c48_250, %c0_251] : memref<144x256xbf16, #tpu.memory_space<vmem>>, vector<16x81xbf16>
    tpu.vector_store %arg44[%c48_250, %c0_251], %380 {strides = array<i32>} : memref<144x256xbf16, #tpu.memory_space<vmem>>, vector<16x81xbf16>,
    %c64_252 = arith.constant 64 : index
    %c0_253 = arith.constant 0 : index
    %382 = vector.load %arg44[%c64_252, %c0_253] : memref<144x256xbf16, #tpu.memory_space<vmem>>, vector<16x81xbf16>
    tpu.vector_store %arg44[%c64_252, %c0_253], %365 {strides = array<i32>} : memref<144x256xbf16, #tpu.memory_space<vmem>>, vector<16x81xbf16>,
    %cst_254 = arith.constant 0.000000e+00 : bf16
    %383 = vector.broadcast %cst_254 : bf16 to vector<16x1xbf16>
    %384 = vector.extract_strided_slice %365 {offsets = [0, 1], sizes = [16, 80], strides = [1, 1]} : vector<16x81xbf16> to vector<16x80xbf16>
    %385 = tpu.concatenate %384, %383 in 1 : vector<16x80xbf16>, vector<16x1xbf16> -> vector<16x81xbf16>
    %c80_255 = arith.constant 80 : index
    %c0_256 = arith.constant 0 : index
    %386 = vector.load %arg44[%c80_255, %c0_256] : memref<144x256xbf16, #tpu.memory_space<vmem>>, vector<16x81xbf16>
    tpu.vector_store %arg44[%c80_255, %c0_256], %385 {strides = array<i32>} : memref<144x256xbf16, #tpu.memory_space<vmem>>, vector<16x81xbf16>,
    %cst_257 = arith.constant 0.000000e+00 : bf16
    %387 = vector.broadcast %cst_257 : bf16 to vector<16x8xbf16>
    %388 = vector.extract_strided_slice %365 {offsets = [0, 8], sizes = [16, 73], strides = [1, 1]} : vector<16x81xbf16> to vector<16x73xbf16>
    %389 = tpu.concatenate %388, %387 in 1 : vector<16x73xbf16>, vector<16x8xbf16> -> vector<16x81xbf16>
    %c96_258 = arith.constant 96 : index
    %c0_259 = arith.constant 0 : index
    %390 = vector.load %arg44[%c96_258, %c0_259] : memref<144x256xbf16, #tpu.memory_space<vmem>>, vector<16x81xbf16>
    tpu.vector_store %arg44[%c96_258, %c0_259], %389 {strides = array<i32>} : memref<144x256xbf16, #tpu.memory_space<vmem>>, vector<16x81xbf16>,
    %cst_260 = arith.constant 0.000000e+00 : bf16
    %391 = vector.broadcast %cst_260 : bf16 to vector<16x9xbf16>
    %392 = vector.extract_strided_slice %365 {offsets = [0, 9], sizes = [16, 72], strides = [1, 1]} : vector<16x81xbf16> to vector<16x72xbf16>
    %393 = tpu.concatenate %392, %391 in 1 : vector<16x72xbf16>, vector<16x9xbf16> -> vector<16x81xbf16>
    %c112_261 = arith.constant 112 : index
    %c0_262 = arith.constant 0 : index
    %394 = vector.load %arg44[%c112_261, %c0_262] : memref<144x256xbf16, #tpu.memory_space<vmem>>, vector<16x81xbf16>
    tpu.vector_store %arg44[%c112_261, %c0_262], %393 {strides = array<i32>} : memref<144x256xbf16, #tpu.memory_space<vmem>>, vector<16x81xbf16>,
    %cst_263 = arith.constant 0.000000e+00 : bf16
    %395 = vector.broadcast %cst_263 : bf16 to vector<16x10xbf16>
    %396 = vector.extract_strided_slice %365 {offsets = [0, 10], sizes = [16, 71], strides = [1, 1]} : vector<16x81xbf16> to vector<16x71xbf16>
    %397 = tpu.concatenate %396, %395 in 1 : vector<16x71xbf16>, vector<16x10xbf16> -> vector<16x81xbf16>
    %c128_264 = arith.constant 128 : index
    %c0_265 = arith.constant 0 : index
    %398 = vector.load %arg44[%c128_264, %c0_265] : memref<144x256xbf16, #tpu.memory_space<vmem>>, vector<16x81xbf16>
    tpu.vector_store %arg44[%c128_264, %c0_265], %397 {strides = array<i32>} : memref<144x256xbf16, #tpu.memory_space<vmem>>, vector<16x81xbf16>,
    %c0_266 = arith.constant 0 : index
    %c0_267 = arith.constant 0 : index
    %399 = vector.load %arg40[%c0_266, %c0_267] : memref<4x144xbf16, #tpu.memory_space<vmem>>, vector<4x144xbf16>
    %c0_268 = arith.constant 0 : index
    %c0_269 = arith.constant 0 : index
    %400 = vector.load %arg44[%c0_268, %c0_269] : memref<144x256xbf16, #tpu.memory_space<vmem>>, vector<144x81xbf16>
    %cst_270 = arith.constant dense<0.000000e+00> : vector<4x81xf32>
    %401 = tpu.matmul %399, %400, %cst_270 {dimension_numbers = #tpu.dot_dimension_numbers<[1], [0], [0], [1], [0, 0, 1, 1], [], []>} : vector<4x144xbf16>, vector<144x81xbf16>, vector<4x81xf32> -> vector<4x81xf32>
    %cst_271 = arith.constant 0.000000e+00 : f32
    %402 = vector.shape_cast %360 : vector<1x81xi1> to vector<1x81xi1>
    %403 = vector.broadcast %402 : vector<1x81xi1> to vector<4x81xi1>
    %404 = vector.broadcast %cst_271 : f32 to vector<4x81xf32>
    %405 = arith.select %403, %401, %404 : vector<4x81xi1>, vector<4x81xf32>
    %c12_272 = arith.constant 12 : index
    %c0_273 = arith.constant 0 : index
    %406 = vector.load %arg43[%c12_272, %c0_273] : memref<16x81xf32, #tpu.memory_space<vmem>>, vector<4x81xf32>
    tpu.vector_store %arg43[%c12_272, %c0_273], %405 {strides = array<i32>} : memref<16x81xf32, #tpu.memory_space<vmem>>, vector<4x81xf32>,
    %c0_274 = arith.constant 0 : index
    %c0_275 = arith.constant 0 : index
    %407 = vector.load %arg43[%c0_274, %c0_275] : memref<16x81xf32, #tpu.memory_space<vmem>>, vector<16x81xf32>
    %c0_276 = arith.constant 0 : index
    %c0_277 = arith.constant 0 : index
    %408 = vector.load %arg13[%c0_276, %c0_277] : memref<16x1xf32, #tpu.memory_space<vmem>>, vector<16x1xf32>
    %409 = vector.broadcast %408 : vector<16x1xf32> to vector<16x81xf32>
    %410 = arith.mulf %407, %409 : vector<16x81xf32>
    %c0_278 = arith.constant 0 : index
    %c0_279 = arith.constant 0 : index
    %411 = vector.load %arg14[%c0_278, %c0_279] : memref<16x1xf32, #tpu.memory_space<vmem>>, vector<16x1xf32>
    %412 = vector.broadcast %411 : vector<16x1xf32> to vector<16x81xf32>
    %413 = arith.addf %410, %412 : vector<16x81xf32>
    %cst_280 = arith.constant 0.000000e+00 : f32
    %414 = vector.broadcast %cst_280 : f32 to vector<16x81xf32>
    %415 = arith.maximumf %413, %414 : vector<16x81xf32>
    %c0_281 = arith.constant 0 : index
    %c0_282 = arith.constant 0 : index
    %416 = vector.load %arg8[%c0_281, %c0_282] : memref<1x81xf32, #tpu.memory_space<vmem>>, vector<1x81xf32>
    %cst_283 = arith.constant 5.000000e-01 : f32
    %417 = vector.broadcast %cst_283 : f32 to vector<1x81xf32>
    %418 = arith.cmpf ogt, %416, %417 : vector<1x81xf32>
    %cst_284 = arith.constant 0.000000e+00 : f32
    %419 = vector.shape_cast %418 : vector<1x81xi1> to vector<1x81xi1>
    %420 = vector.broadcast %419 : vector<1x81xi1> to vector<16x81xi1>
    %421 = vector.broadcast %cst_284 : f32 to vector<16x81xf32>
    %422 = arith.select %420, %415, %421 : vector<16x81xi1>, vector<16x81xf32>
    %c0_285 = arith.constant 0 : index
    %c0_286 = arith.constant 0 : index
    %423 = vector.load %arg15[%c0_285, %c0_286] : memref<10x16xbf16, #tpu.memory_space<vmem>>, vector<10x16xbf16>
    %424 = arith.truncf %422 : vector<16x81xf32> to vector<16x81xbf16>
    %cst_287 = arith.constant dense<0.000000e+00> : vector<10x81xf32>
    %425 = tpu.matmul %423, %424, %cst_287 {dimension_numbers = #tpu.dot_dimension_numbers<[1], [0], [0], [1], [0, 0, 1, 1], [], []>} : vector<10x16xbf16>, vector<16x81xbf16>, vector<10x81xf32> -> vector<10x81xf32>
    %cst_288 = arith.constant dense<0.000000e+00> : vector<10xf32>
    %426 = vector.multi_reduction <add>, %425, %cst_288 [1] : vector<10x81xf32> to vector<10xf32>
    %427 = vector.shape_cast %426 : vector<10xf32> to vector<10x1xf32>
    %cst_289 = arith.constant 0.0204081628 : f32
    %428 = vector.broadcast %cst_289 : f32 to vector<10x1xf32>
    %429 = arith.mulf %427, %428 : vector<10x1xf32>
    %c0_290 = arith.constant 0 : index
    %c0_291 = arith.constant 0 : index
    %430 = vector.load %arg16[%c0_290, %c0_291] : memref<10x1xf32, #tpu.memory_space<vmem>>, vector<10x1xf32>
    %431 = arith.addf %429, %430 : vector<10x1xf32>
    %c0_292 = arith.constant 0 : index
    %c0_293 = arith.constant 0 : index
    %c0_294 = arith.constant 0 : index
    %432 = vector.load %arg41[%c0_292, %c0_293, %c0_294] : memref<1x10x1xf32, #tpu.memory_space<vmem>>, vector<1x10x1xf32>
    %433 = vector.shape_cast %432 : vector<1x10x1xf32> to vector<10x1xf32>
    %434 = vector.shape_cast %431 : vector<10x1xf32> to vector<1x10x1xf32>
    tpu.vector_store %arg41[%c0_292, %c0_293, %c0_294], %434 {strides = array<i32>} : memref<1x10x1xf32, #tpu.memory_space<vmem>>, vector<1x10x1xf32>,
    return
  }
  func.func @transform_0(%arg0: i32) -> (i32, i32, i32) {
    %c0_i32 = arith.constant 0 : i32
    %c0_i32_0 = arith.constant 0 : i32
    %c0_i32_1 = arith.constant 0 : i32
    return %arg0, %c0_i32, %c0_i32_0 : i32, i32, i32
  }
  func.func @transform_1(%arg0: i32) -> (i32, i32) {
    %c0_i32 = arith.constant 0 : i32
    %c0_i32_0 = arith.constant 0 : i32
    %c0_i32_1 = arith.constant 0 : i32
    return %c0_i32, %c0_i32_0 : i32, i32
  }
  func.func @transform_2(%arg0: i32) -> (i32, i32) {
    %c0_i32 = arith.constant 0 : i32
    %c0_i32_0 = arith.constant 0 : i32
    %c0_i32_1 = arith.constant 0 : i32
    return %c0_i32, %c0_i32_0 : i32, i32
  }
  func.func @transform_3(%arg0: i32) -> (i32, i32) {
    %c0_i32 = arith.constant 0 : i32
    %c0_i32_0 = arith.constant 0 : i32
    %c0_i32_1 = arith.constant 0 : i32
    return %c0_i32, %c0_i32_0 : i32, i32
  }
  func.func @transform_4(%arg0: i32) -> (i32, i32) {
    %c0_i32 = arith.constant 0 : i32
    %c0_i32_0 = arith.constant 0 : i32
    %c0_i32_1 = arith.constant 0 : i32
    return %c0_i32, %c0_i32_0 : i32, i32
  }
  func.func @transform_5(%arg0: i32) -> (i32, i32) {
    %c0_i32 = arith.constant 0 : i32
    %c0_i32_0 = arith.constant 0 : i32
    %c0_i32_1 = arith.constant 0 : i32
    return %c0_i32, %c0_i32_0 : i32, i32
  }
  func.func @transform_6(%arg0: i32) -> (i32, i32) {
    %c0_i32 = arith.constant 0 : i32
    %c0_i32_0 = arith.constant 0 : i32
    %c0_i32_1 = arith.constant 0 : i32
    return %c0_i32, %c0_i32_0 : i32, i32
  }
  func.func @transform_7(%arg0: i32) -> (i32, i32) {
    %c0_i32 = arith.constant 0 : i32
    %c0_i32_0 = arith.constant 0 : i32
    %c0_i32_1 = arith.constant 0 : i32
    return %c0_i32, %c0_i32_0 : i32, i32
  }
  func.func @transform_8(%arg0: i32) -> (i32, i32) {
    %c0_i32 = arith.constant 0 : i32
    %c0_i32_0 = arith.constant 0 : i32
    %c0_i32_1 = arith.constant 0 : i32
    return %c0_i32, %c0_i32_0 : i32, i32
  }
  func.func @transform_9(%arg0: i32) -> (i32, i32) {
    %c0_i32 = arith.constant 0 : i32
    %c0_i32_0 = arith.constant 0 : i32
    %c0_i32_1 = arith.constant 0 : i32
    return %c0_i32, %c0_i32_0 : i32, i32
  }
  func.func @transform_10(%arg0: i32) -> (i32, i32) {
    %c0_i32 = arith.constant 0 : i32
    %c0_i32_0 = arith.constant 0 : i32
    %c0_i32_1 = arith.constant 0 : i32
    return %c0_i32, %c0_i32_0 : i32, i32
  }
  func.func @transform_11(%arg0: i32) -> (i32, i32) {
    %c0_i32 = arith.constant 0 : i32
    %c0_i32_0 = arith.constant 0 : i32
    %c0_i32_1 = arith.constant 0 : i32
    return %c0_i32, %c0_i32_0 : i32, i32
  }
  func.func @transform_12(%arg0: i32) -> (i32, i32) {
    %c0_i32 = arith.constant 0 : i32
    %c0_i32_0 = arith.constant 0 : i32
    %c0_i32_1 = arith.constant 0 : i32
    return %c0_i32, %c0_i32_0 : i32, i32
  }
  func.func @transform_13(%arg0: i32) -> (i32, i32) {
    %c0_i32 = arith.constant 0 : i32
    %c0_i32_0 = arith.constant 0 : i32
    %c0_i32_1 = arith.constant 0 : i32
    return %c0_i32, %c0_i32_0 : i32, i32
  }
  func.func @transform_14(%arg0: i32) -> (i32, i32) {
    %c0_i32 = arith.constant 0 : i32
    %c0_i32_0 = arith.constant 0 : i32
    %c0_i32_1 = arith.constant 0 : i32
    return %c0_i32, %c0_i32_0 : i32, i32
  }
  func.func @transform_15(%arg0: i32) -> (i32, i32) {
    %c0_i32 = arith.constant 0 : i32
    %c0_i32_0 = arith.constant 0 : i32
    %c0_i32_1 = arith.constant 0 : i32
    return %c0_i32, %c0_i32_0 : i32, i32
  }
  func.func @transform_16(%arg0: i32) -> (i32, i32) {
    %c0_i32 = arith.constant 0 : i32
    %c0_i32_0 = arith.constant 0 : i32
    %c0_i32_1 = arith.constant 0 : i32
    return %c0_i32, %c0_i32_0 : i32, i32
  }
  func.func @transform_17(%arg0: i32) -> (i32, i32) {
    %c0_i32 = arith.constant 0 : i32
    %c0_i32_0 = arith.constant 0 : i32
    %c0_i32_1 = arith.constant 0 : i32
    return %c0_i32, %c0_i32_0 : i32, i32
  }
  func.func @transform_18(%arg0: i32) -> (i32, i32) {
    %c0_i32 = arith.constant 0 : i32
    %c0_i32_0 = arith.constant 0 : i32
    %c0_i32_1 = arith.constant 0 : i32
    return %c0_i32, %c0_i32_0 : i32, i32
  }
  func.func @transform_19(%arg0: i32) -> (i32, i32) {
    %c0_i32 = arith.constant 0 : i32
    %c0_i32_0 = arith.constant 0 : i32
    %c0_i32_1 = arith.constant 0 : i32
    return %c0_i32, %c0_i32_0 : i32, i32
  }
  func.func @transform_20(%arg0: i32) -> (i32, i32) {
    %c0_i32 = arith.constant 0 : i32
    %c0_i32_0 = arith.constant 0 : i32
    %c0_i32_1 = arith.constant 0 : i32
    return %c0_i32, %c0_i32_0 : i32, i32
  }
  func.func @transform_21(%arg0: i32) -> (i32, i32) {
    %c0_i32 = arith.constant 0 : i32
    %c0_i32_0 = arith.constant 0 : i32
    %c0_i32_1 = arith.constant 0 : i32
    return %c0_i32, %c0_i32_0 : i32, i32
  }
  func.func @transform_22(%arg0: i32) -> (i32, i32) {
    %c0_i32 = arith.constant 0 : i32
    %c0_i32_0 = arith.constant 0 : i32
    %c0_i32_1 = arith.constant 0 : i32
    return %c0_i32, %c0_i32_0 : i32, i32
  }
  func.func @transform_23(%arg0: i32) -> (i32, i32) {
    %c0_i32 = arith.constant 0 : i32
    %c0_i32_0 = arith.constant 0 : i32
    %c0_i32_1 = arith.constant 0 : i32
    return %c0_i32, %c0_i32_0 : i32, i32
  }
  func.func @transform_24(%arg0: i32) -> (i32, i32) {
    %c0_i32 = arith.constant 0 : i32
    %c0_i32_0 = arith.constant 0 : i32
    %c0_i32_1 = arith.constant 0 : i32
    return %c0_i32, %c0_i32_0 : i32, i32
  }
  func.func @transform_25(%arg0: i32) -> (i32, i32) {
    %c0_i32 = arith.constant 0 : i32
    %c0_i32_0 = arith.constant 0 : i32
    %c0_i32_1 = arith.constant 0 : i32
    return %c0_i32, %c0_i32_0 : i32, i32
  }
  func.func @transform_26(%arg0: i32) -> (i32, i32) {
    %c0_i32 = arith.constant 0 : i32
    %c0_i32_0 = arith.constant 0 : i32
    %c0_i32_1 = arith.constant 0 : i32
    return %c0_i32, %c0_i32_0 : i32, i32
  }
  func.func @transform_27(%arg0: i32) -> (i32, i32) {
    %c0_i32 = arith.constant 0 : i32
    %c0_i32_0 = arith.constant 0 : i32
    %c0_i32_1 = arith.constant 0 : i32
    return %c0_i32, %c0_i32_0 : i32, i32
  }
  func.func @transform_28(%arg0: i32) -> (i32, i32) {
    %c0_i32 = arith.constant 0 : i32
    %c0_i32_0 = arith.constant 0 : i32
    %c0_i32_1 = arith.constant 0 : i32
    return %c0_i32, %c0_i32_0 : i32, i32
  }
  func.func @transform_29(%arg0: i32) -> (i32, i32) {
    %c0_i32 = arith.constant 0 : i32
    %c0_i32_0 = arith.constant 0 : i32
    %c0_i32_1 = arith.constant 0 : i32
    return %c0_i32, %c0_i32_0 : i32, i32
  }
  func.func @transform_30(%arg0: i32) -> (i32, i32) {
    %c0_i32 = arith.constant 0 : i32
    %c0_i32_0 = arith.constant 0 : i32
    %c0_i32_1 = arith.constant 0 : i32
    return %c0_i32, %c0_i32_0 : i32, i32
  }
  func.func @transform_31(%arg0: i32) -> (i32, i32) {
    %c0_i32 = arith.constant 0 : i32
    %c0_i32_0 = arith.constant 0 : i32
    %c0_i32_1 = arith.constant 0 : i32
    return %c0_i32, %c0_i32_0 : i32, i32
  }
  func.func @transform_32(%arg0: i32) -> (i32, i32) {
    %c0_i32 = arith.constant 0 : i32
    %c0_i32_0 = arith.constant 0 : i32
    %c0_i32_1 = arith.constant 0 : i32
    return %c0_i32, %c0_i32_0 : i32, i32
  }
  func.func @transform_33(%arg0: i32) -> (i32, i32) {
    %c0_i32 = arith.constant 0 : i32
    %c0_i32_0 = arith.constant 0 : i32
    %c0_i32_1 = arith.constant 0 : i32
    return %c0_i32, %c0_i32_0 : i32, i32
  }
  func.func @transform_34(%arg0: i32) -> (i32, i32) {
    %c0_i32 = arith.constant 0 : i32
    %c0_i32_0 = arith.constant 0 : i32
    %c0_i32_1 = arith.constant 0 : i32
    return %c0_i32, %c0_i32_0 : i32, i32
  }
  func.func @transform_35(%arg0: i32) -> (i32, i32) {
    %c0_i32 = arith.constant 0 : i32
    %c0_i32_0 = arith.constant 0 : i32
    %c0_i32_1 = arith.constant 0 : i32
    return %c0_i32, %c0_i32_0 : i32, i32
  }
  func.func @transform_36(%arg0: i32) -> (i32, i32) {
    %c0_i32 = arith.constant 0 : i32
    %c0_i32_0 = arith.constant 0 : i32
    %c0_i32_1 = arith.constant 0 : i32
    return %c0_i32, %c0_i32_0 : i32, i32
  }
  func.func @transform_37(%arg0: i32) -> (i32, i32) {
    %c0_i32 = arith.constant 0 : i32
    %c0_i32_0 = arith.constant 0 : i32
    %c0_i32_1 = arith.constant 0 : i32
    return %c0_i32, %c0_i32_0 : i32, i32
  }
  func.func @transform_38(%arg0: i32) -> (i32, i32) {
    %c0_i32 = arith.constant 0 : i32
    %c0_i32_0 = arith.constant 0 : i32
    %c0_i32_1 = arith.constant 0 : i32
    return %c0_i32, %c0_i32_0 : i32, i32
  }
  func.func @transform_39(%arg0: i32) -> (i32, i32) {
    %c0_i32 = arith.constant 0 : i32
    %c0_i32_0 = arith.constant 0 : i32
    %c0_i32_1 = arith.constant 0 : i32
    return %c0_i32, %c0_i32_0 : i32, i32
  }
  func.func @transform_40(%arg0: i32) -> (i32, i32, i32) {
    %c0_i32 = arith.constant 0 : i32
    %c0_i32_0 = arith.constant 0 : i32
    %c0_i32_1 = arith.constant 0 : i32
    return %arg0, %c0_i32, %c0_i32_0 : i32, i32, i32
  }
}

</mosaic_0001>

<bundles_post_ra>
// kernel: xdensenet_forward.1
= control target key start
LH: loop header
LB: loop body
LE: loop exit
PB: predicated region body
PF: predicated region fallthrough
CT: control target
= control target key end

     0   :  { %s6468_s6 = smov 1   ;;  %s6469_s10 = smov 2   ;;  %s8405_s0 = inlined_call_operand.smem [shape: u32[41], index: -1, kind: input, shape index: {}] }
   0x1   :  { %s6540_s5 = sld [smem:[%s8405_s0]]   ;;  %s6470_s14 = smov 3  }
   0x2   :  { %s6545_s9 = sld [smem:[%s8405_s0 + %s6468_s6]]   ;;  %s6471_s18 = smov 4  }
   0x3   :  { %s6550_s13 = sld [smem:[%s8405_s0 + %s6469_s10]]   ;;  %s6472_s22 = smov 5  }
   0x4   :  { %s6555_s17 = sld [smem:[%s8405_s0 + %s6470_s14]]   ;;  %s6473_s26 = smov 6  }
   0x5   :  { %s6560_s21 = sld [smem:[%s8405_s0 + %s6471_s18]]   ;;  %s6474_s30 = smov 7  }
   0x6   :  { %s6565_s25 = sld [smem:[%s8405_s0 + %s6472_s22]]   ;;  %s6475_s4 = smov 8  }
   0x7   :  { %8471 = sst [smem:[#allocation5_spill]] %s6540_s5  ;;  %s6476_s10 = smov 9  }
   0x8   :  { %8472 = sst [smem:[#allocation6_spill]] %s6545_s9  ;;  %s6477_s15 = smov 10  }
   0x9   :  { %s6570_s29 = sld [smem:[%s8405_s0 + %s6473_s26]]   ;;  %s6478_s20 = smov 11  }
   0xa   :  { %s6575_s3 = sld [smem:[%s8405_s0 + %s6474_s30]]   ;;  %s6479_s26 = smov 12  }
   0xb   :  { %s6580_s8 = sld [smem:[%s8405_s0 + %s6475_s4]]   ;;  %s6480_s1 = smov 13  }
   0xc   :  { %s6585_s14 = sld [smem:[%s8405_s0 + %s6476_s10]]   ;;  %s6481_s7 = smov 14  }
   0xd   :  { %s6590_s19 = sld [smem:[%s8405_s0 + %s6477_s15]]   ;;  %s6482_s15 = smov 15  }
   0xe   :  { %s6595_s24 = sld [smem:[%s8405_s0 + %s6478_s20]]   ;;  %s6483_s22 = smov 16  }
   0xf   :  { %s6600_s30 = sld [smem:[%s8405_s0 + %s6479_s26]]   ;;  %s6484_s28 = smov 17  }
  0x10   :  { %8473 = sst [smem:[#allocation7_spill]] %s6575_s3 }
  0x11   :  { %8474 = sst [smem:[#allocation8_spill]] %s6580_s8 }
  0x12   :  { %8475 = sst [smem:[#allocation9_spill]] %s6585_s14 }
  0x13   :  { %8476 = sst [smem:[#allocation10_spill]] %s6590_s19 }
  0x14   :  { %8477 = sst [smem:[#allocation11_spill]] %s6595_s24 }
  0x15   :  { %8478 = sst [smem:[#allocation12_spill]] %s6600_s30 }
  0x16   :  { %s6605_s6 = sld [smem:[%s8405_s0 + %s6480_s1]]  }
  0x17   :  { %s6610_s12 = sld [smem:[%s8405_s0 + %s6481_s7]]   ;;  %s6485_s7 = smov 18  }
  0x18   :  { %s6615_s20 = sld [smem:[%s8405_s0 + %s6482_s15]]   ;;  %s6486_s15 = smov 19  }
  0x19   :  { %s6620_s27 = sld [smem:[%s8405_s0 + %s6483_s22]]   ;;  %s6487_s22 = smov 20  }
  0x1a   :  { %s6625_s4 = sld [smem:[%s8405_s0 + %s6484_s28]]   ;;  %s6488_s28 = smov 21  }
  0x1b   :  { %s6645_s30 = sld [smem:[%s8405_s0 + %s6488_s28]]   ;;  %s6492_s28 = smov 25  }
  0x1c   :  { %8479 = sst [smem:[#allocation13_spill]] %s6605_s6 }
  0x1d   :  { %8480 = sst [smem:[#allocation14_spill]] %s6610_s12 }
  0x1e   :  { %8481 = sst [smem:[#allocation15_spill]] %s6615_s20 }
  0x1f   :  { %s6630_s12 = sld [smem:[%s8405_s0 + %s6485_s7]]   ;;  %s6489_s7 = smov 22  }
  0x20   :  { %8482 = sst [smem:[#allocation16_spill]] %s6625_s4 }
  0x21   :  { %s6635_s20 = sld [smem:[%s8405_s0 + %s6486_s15]]   ;;  %s6490_s15 = smov 23  }
  0x22   :  { %s6640_s6 = sld [smem:[%s8405_s0 + %s6487_s22]]   ;;  %s6491_s22 = smov 24  }
  0x23   :  { %8484 = sst [smem:[#allocation18_spill]] %s6645_s30 }
  0x24   :  { %s6650_s3 = sld [smem:[%s8405_s0 + %s6489_s7]]   ;;  %s6493_s7 = smov 26  }
  0x25   :  { %s6655_s19 = sld [smem:[%s8405_s0 + %s6490_s15]]   ;;  %s6494_s15 = smov 27  }
  0x26   :  { %s6660_s24 = sld [smem:[%s8405_s0 + %s6491_s22]]   ;;  %s6495_s22 = smov 28  }
  0x27   :  { %s6665_s14 = sld [smem:[%s8405_s0 + %s6492_s28]]   ;;  %s6496_s28 = smov 29  }
  0x28   :  { %8483 = sst [smem:[#allocation17_spill]] %s6640_s6 }
  0x29   :  { %s6670_s8 = sld [smem:[%s8405_s0 + %s6493_s7]]   ;;  %s6497_s7 = smov 30  }
  0x2a   :  { %8485 = sst [smem:[#allocation19_spill]] %s6650_s3 }
  0x2b   :  { %s6675_s30 = sld [smem:[%s8405_s0 + %s6494_s15]]   ;;  %s6498_s15 = smov 31  }
  0x2c   :  { %8486 = sst [smem:[#allocation20_spill]] %s6660_s24 }
  0x2d   :  { %8487 = sst [smem:[#allocation21_spill]] %s6665_s14 }
  0x2e   :  { %s6680_s24 = sld [smem:[%s8405_s0 + %s6495_s22]]   ;;  %s6499_s22 = smov 32  }
  0x2f   :  { %8488 = sst [smem:[#allocation22_spill]] %s6670_s8 }
  0x30   :  { %s6685_s14 = sld [smem:[%s8405_s0 + %s6496_s28]]   ;;  %s6500_s28 = smov 33  }
  0x31   :  { %8489 = sst [smem:[#allocation23_spill]] %s6675_s30 }
  0x32   :  { %s6690_s8 = sld [smem:[%s8405_s0 + %s6497_s7]]   ;;  %s6501_s7 = smov 34  }
  0x33   :  { %s6695_s30 = sld [smem:[%s8405_s0 + %s6498_s15]]   ;;  %s6502_s15 = smov 35  }
  0x34   :  { %8490 = sst [smem:[#allocation24_spill]] %s6680_s24 }
  0x35   :  { %s6700_s24 = sld [smem:[%s8405_s0 + %s6499_s22]]   ;;  %s6503_s22 = smov 36  }
  0x36   :  { %8491 = sst [smem:[#allocation25_spill]] %s6685_s14 }
  0x37   :  { %s6705_s14 = sld [smem:[%s8405_s0 + %s6500_s28]]   ;;  %s6504_s28 = smov 37  }
  0x38   :  { %8492 = sst [smem:[#allocation26_spill]] %s6690_s8 }
  0x39   :  { %8493 = sst [smem:[#allocation27_spill]] %s6695_s30 }
  0x3a   :  { %s6710_s8 = sld [smem:[%s8405_s0 + %s6501_s7]]   ;;  %s6505_s7 = smov 38  }
  0x3b   :  { %8494 = sst [smem:[#allocation28_spill]] %s6700_s24 }
  0x3c   :  { %s6715_s30 = sld [smem:[%s8405_s0 + %s6502_s15]]   ;;  %s6506_s15 = smov 39  }
  0x3d   :  { %8495 = sst [smem:[#allocation29_spill]] %s6705_s14 }
  0x3e   :  { %s6720_s24 = sld [smem:[%s8405_s0 + %s6503_s22]]   ;;  %s6507_s22 = smov 40  }
  0x3f   :  { %s6725_s14 = sld [smem:[%s8405_s0 + %s6504_s28]]   ;;  %s6742_s28 = smov 0  }
  0x40   :  { %8496 = sst [smem:[#allocation30_spill]] %s6710_s8 }
  0x41   :  { %s6730_s8 = sld [smem:[%s8405_s0 + %s6505_s7]]  }
  0x42   :  { %8497 = sst [smem:[#allocation31_spill]] %s6715_s30 }
  0x43   :  { %s6735_s30 = sld [smem:[%s8405_s0 + %s6506_s15]]  }
  0x44   :  { %8498 = sst [smem:[#allocation32_spill]] %s6720_s24 }
  0x45   :  { %s6740_s24 = sld [smem:[%s8405_s0 + %s6507_s22]]  }
  0x47   :  { %8499 = sst [smem:[#allocation33_spill]] %s6730_s8 }
  0x48 LB: > { %s8500_s8 = sld [smem:[#allocation33_spill]]  ;;  %s5517_s1 = sadd.s32 4294967295, %s6466_s28   ;;  %s6466_s28 = sphi %s6742_s28, %s91_s28  }
  0x49   : > { %s8501_s6 = sld [smem:[#allocation17_spill]]  ;;  %p5521_p0 = scmp.ge.s32.totalorder %s6466_s28, 1 }
  0x4a   : > { %s8502_s4 = sld [smem:[#allocation16_spill]]  ;;  %p1103_p1 = scmp.lt.s32.totalorder %s6466_s28, 3 }
  0x4b   : > { %s8503_s3 = sld [smem:[#allocation19_spill]] }
  0x4c   : > { %p1104_p2 = pnand %p5521_p0, %p1103_p1 }
  0x4e   : > { %1107 = sbr.rel (%p1104_p2) target bundleno = 3836 (0xefc), region = 180 }
  0x53   : > { %p1201_p3 = scmp.lt.s32.totalorder %s5517_s1, 1  ;;  %s8504_s9 = sld [smem:[#allocation6_spill]]  ;;  %vm1666_vm0 = vcmask 261120   ;;  %v1833_v1 = vld [vmem:[%s6550_s13] sm:$0xff]  ;;  %v8423_v3 = vmov 0   ;;  %vm8427_vm13 = vcmask 220160  }
  0x54   : > { %s8505_s5 = sld [smem:[#allocation5_spill]]  ;;  %6010 = vset.pattern.permute.xlu0 %v8423_v3  ;;  %v1846_v4 = vld [vmem:[%s6555_s17] sm:$0xff]  ;;  %6131 = vset.pattern.permute.xlu1 %v8423_v3  ;;  %s8453_s7 = smov 127   ;;  %vm8425_vm14 = vcmask 236544  }
  0x55   : > { %s8808_s1 = smov (!%p1201_p3, %s5517_s1), 1  ;;  %1836 = vperm.xlu0 %6010, %v1833_v1   ;;  %s6510_s10 = smov 27  }
  0x56   : > { %s5937_s0 = smul.u32 560, %s8808_s1  ;;  %s6511_s11 = smov 29  }
  0x57   : > { %s6512_s15 = smov 28   ;;  %s6513_s16 = smov 101  }
  0x58   : > { %s8455_s18 = smov 1   ;;  %s6515_s22 = smov 100  }
  0x59   : > { %v6751_v0 = vld [vmem:[%s8504_s9] sm:$0xff]  ;;  %1849 = vperm.xlu0 %6010, %v1846_v4   ;;  %s6516_s23 = smov 99   ;;  %s6519_s26 = smov 112  }
  0x5a   : > { %v6756_v2 = vcombine.high %v6751_v0, %v6751_v0  ;;  %s6769_s2 = scalar_lea.vmem %s8505_s5, %s5937_s0  ;;  %v6814_v46 = vcombine.low %v6751_v0, %v6751_v0  ;;  %s6520_s0 = smov 113  }
  0x5b   : > { %v6132_v5 = vld [vmem:[%s6769_s2 + $0x18c] ss:$28 sps:$4 sm:$0xff]   ;;  %v6134_v6 = vld [vmem:[%s6769_s2 + $0x194] ss:$28 sps:$4 sm:$0xff]   ;;  %v6140_v10 = vld [vmem:[%s6769_s2 + $0x15c] ss:$28 sps:$4 sm:$0xff]  }
  0x5c   : > { %5597 = vmatprep.mubr.msk.bf16.mxu0 %vm1666_vm0, %v6756_v2  ;;  %5598 = vmatprep.mubr.msk.bf16.mxu1 %vm1666_vm0, %v6756_v2  ;;  %v6136_v7 = vld [vmem:[%s6769_s2 + $0x188] ss:$28 sps:$4 sm:$0xff]   ;;  %v6137_v8 = vld [vmem:[%s6769_s2 + $0x190] ss:$28 sps:$4 sm:$0xff]   ;;  %v6143_v12 = vld [vmem:[%s6769_s2 + $0x158] ss:$28 sps:$4 sm:$0xff]  }
  0x5d   : > { %1670 = vmatprep.subr.bf16.mxu0 %v6132_v5  ;;  %1711 = vmatprep.subr.bf16.mxu1 %v6134_v6  ;;  %v6138_v9 = vld [vmem:[%s6769_s2 + $0x154] ss:$28 sps:$4 sm:$0xff]   ;;  %v6144_v13 = vld [vmem:[%s6769_s2 + $0x11c] ss:$28 sps:$4 sm:$0xff]   ;;  %v6146_v14 = vld [vmem:[%s6769_s2 + $0x124] ss:$28 sps:$4 sm:$0xff]  }
  0x5e   : > { %1671 = vmatpush1.bf16.msra.mxu0 %v6136_v7  ;;  %1712 = vmatpush1.bf16.msra.mxu1 %v6137_v8  ;;  %v6142_v11 = vld [vmem:[%s6769_s2 + $0x150] ss:$28 sps:$4 sm:$0xff]   ;;  %v6148_v15 = vld [vmem:[%s6769_s2 + $0x118] ss:$28 sps:$4 sm:$0xff]   ;;  %v6149_v16 = vld [vmem:[%s6769_s2 + $0x120] ss:$28 sps:$4 sm:$0xff]  }
  0x5f   : > { %1672 = vmatprep.subr.bf16.mxu0 %v6138_v9  ;;  %1713 = vmatprep.subr.bf16.mxu1 %v6140_v10  ;;  %v6150_v17 = vld [vmem:[%s6769_s2 + $0xe4] ss:$28 sps:$4 sm:$0xff]   ;;  %v6152_v18 = vld [vmem:[%s6769_s2 + $0xec] ss:$28 sps:$4 sm:$0xff]   ;;  %v6158_v22 = vld [vmem:[%s6769_s2 + $0xb4] ss:$28 sps:$4 sm:$0xff]  }
  0x60   : > { %v6154_v19 = vld [vmem:[%s6769_s2 + $0xe0] ss:$28 sps:$4 sm:$0xff]   ;;  %v6155_v20 = vld [vmem:[%s6769_s2 + $0xe8] ss:$28 sps:$4 sm:$0xff]   ;;  %v6161_v24 = vld [vmem:[%s6769_s2 + $0xb0] ss:$28 sps:$4 sm:$0xff]  }
  0x61   : > { %v6156_v21 = vld [vmem:[%s6769_s2 + $0xac] ss:$28 sps:$4 sm:$0xff]   ;;  %v6162_v25 = vld [vmem:[%s6769_s2 + $0x74] ss:$28 sps:$4 sm:$0xff]   ;;  %v6164_v26 = vld [vmem:[%s6769_s2 + $0x7c] ss:$28 sps:$4 sm:$0xff]  }
  0x62   : > { %1673 = vmatpush1.bf16.msra.mxu0 %v6142_v11  ;;  %1714 = vmatpush1.bf16.msra.mxu1 %v6143_v12  ;;  %v6160_v23 = vld [vmem:[%s6769_s2 + $0xa8] ss:$28 sps:$4 sm:$0xff]   ;;  %v6166_v27 = vld [vmem:[%s6769_s2 + $0x70] ss:$28 sps:$4 sm:$0xff]   ;;  %v6167_v28 = vld [vmem:[%s6769_s2 + $0x78] ss:$28 sps:$4 sm:$0xff]  }
  0x63   : > { %1674 = vmatprep.subr.bf16.mxu0 %v6144_v13  ;;  %1715 = vmatprep.subr.bf16.mxu1 %v6146_v14  ;;  %v6168_v29 = vld [vmem:[%s6769_s2 + $0x3c] ss:$28 sps:$4 sm:$0xff]   ;;  %v6170_v30 = vld [vmem:[%s6769_s2 + $0x44] ss:$28 sps:$4 sm:$0xff]   ;;  %v6176_v34 = vld [vmem:[%s6769_s2 + $0xc] ss:$28 sps:$4 sm:$0xff]  }
  0x64   : > { %v6172_v31 = vld [vmem:[%s6769_s2 + $0x38] ss:$28 sps:$4 sm:$0xff]   ;;  %v6173_v32 = vld [vmem:[%s6769_s2 + $0x40] ss:$28 sps:$4 sm:$0xff]   ;;  %v6179_v36 = vld [vmem:[%s6769_s2 + $0x8] ss:$28 sps:$4 sm:$0xff]  }
  0x65   : > { %v6174_v33 = vld [vmem:[%s6769_s2 + $0x4] ss:$28 sps:$4 sm:$0xff]   ;;  %v6180_v37 = vld [vmem:[%s6769_s2 + $0x1fc] ss:$28 sps:$4 sm:$0xff]   ;;  %v6188_v42 = vld [vmem:[%s6769_s2 + $0x1cc] ss:$28 sps:$4 sm:$0xff]  }
  0x66   : > { %1675 = vmatpush1.bf16.msra.mxu0 %v6148_v15  ;;  %1716 = vmatpush1.bf16.msra.mxu1 %v6149_v16  ;;  %v6178_v35 = vld [vmem:[%s6769_s2] ss:$28 sps:$4 sm:$0xff]   ;;  %v6184_v39 = vld [vmem:[%s6769_s2 + $0x1f8] ss:$28 sps:$4 sm:$0xff]   ;;  %v6191_v44 = vld [vmem:[%s6769_s2 + $0x1c8] ss:$28 sps:$4 sm:$0xff]   ;;  %v1903_v15 = vlaneseq }
  0x67   : > { %1676 = vmatprep.subr.bf16.mxu0 %v6150_v17  ;;  %1717 = vmatprep.subr.bf16.mxu1 %v6152_v18  ;;  %v6182_v38 = vld [vmem:[%s6769_s2 + $0x204] ss:$28 sps:$4 sm:$0xff]   ;;  %v6196_v45 = vld [vmem:[%s6769_s2 + $0x19c] ss:$28 sps:$4 sm:$0xff]   ;;  %v6204_v52 = vld [vmem:[%s6769_s2 + $0x12c] ss:$28 sps:$4 sm:$0xff]  }
  0x68   : > { %v6185_v40 = vld [vmem:[%s6769_s2 + $0x200] ss:$28 sps:$4 sm:$0xff]   ;;  %v6194_v47 = vld [vmem:[%s6769_s2 + $0x198] ss:$28 sps:$4 sm:$0xff]   ;;  %v6201_v51 = vld [vmem:[%s6769_s2 + $0x168] ss:$28 sps:$4 sm:$0xff]  }
  0x69   : > { %v6186_v41 = vld [vmem:[%s6769_s2 + $0x1c4] ss:$28 sps:$4 sm:$0xff]   ;;  %v6205_v54 = vld [vmem:[%s6769_s2 + $0x130] ss:$28 sps:$4 sm:$0xff]   ;;  %v6209_v57 = vld [vmem:[%s6769_s2 + $0xf8] ss:$28 sps:$4 sm:$0xff]  }
  0x6a   : > { %1677 = vmatpush1.bf16.msra.mxu0 %v6154_v19  ;;  %1718 = vmatpush1.bf16.msra.mxu1 %v6155_v20  ;;  %v6190_v43 = vld [vmem:[%s6769_s2 + $0x1c0] ss:$28 sps:$4 sm:$0xff]   ;;  %v6202_v53 = vld [vmem:[%s6769_s2 + $0x128] ss:$28 sps:$4 sm:$0xff]   ;;  %v6208_v55 = vld [vmem:[%s6769_s2 + $0xf4] ss:$28 sps:$4 sm:$0xff]  }
  0x6b   : > { %1678 = vmatprep.subr.bf16.mxu0 %v6156_v21  ;;  %1719 = vmatprep.subr.bf16.mxu1 %v6158_v22  ;;  %v6197_v48 = vld [vmem:[%s6769_s2 + $0x1a0] ss:$28 sps:$4 sm:$0xff]   ;;  %v6206_v56 = vld [vmem:[%s6769_s2 + $0xf0] ss:$28 sps:$4 sm:$0xff]   ;;  %v6210_v59 = vld [vmem:[%s6769_s2 + $0xb8] ss:$28 sps:$4 sm:$0xff]  }
  0x6c   : > { %v6200_v49 = vld [vmem:[%s6769_s2 + $0x164] ss:$28 sps:$4 sm:$0xff]   ;;  %v6212_v58 = vld [vmem:[%s6769_s2 + $0xbc] ss:$28 sps:$4 sm:$0xff]   ;;  %v6220_v0 = vld [vmem:[%s6769_s2 + $0x4c] ss:$28 sps:$4 sm:$0xff]  }
  0x6d   : > { %v6198_v50 = vld [vmem:[%s6769_s2 + $0x160] ss:$28 sps:$4 sm:$0xff]   ;;  %v6217_v63 = vld [vmem:[%s6769_s2 + $0x88] ss:$28 sps:$4 sm:$0xff]   ;;  %v6224_v4 = vld [vmem:[%s6769_s2 + $0x14] ss:$28 sps:$4 sm:$0xff]  }
  0x6e   : > { %1679 = vmatpush1.bf16.msra.mxu0 %v6160_v23  ;;  %1720 = vmatpush1.bf16.msra.mxu1 %v6161_v24  ;;  %v6213_v60 = vld [vmem:[%s6769_s2 + $0xc0] ss:$28 sps:$4 sm:$0xff]   ;;  %v6218_v1 = vld [vmem:[%s6769_s2 + $0x48] ss:$28 sps:$4 sm:$0xff]   ;;  %v6222_v5 = vld [vmem:[%s6769_s2 + $0x10] ss:$28 sps:$4 sm:$0xff]  }
  0x6f   : > { %1680 = vmatprep.subr.bf16.mxu0 %v6162_v25  ;;  %1721 = vmatprep.subr.bf16.mxu1 %v6164_v26  ;;  %v6216_v61 = vld [vmem:[%s6769_s2 + $0x84] ss:$28 sps:$4 sm:$0xff]   ;;  %v6225_v6 = vld [vmem:[%s6769_s2 + $0x18] ss:$28 sps:$4 sm:$0xff]   ;;  %v6228_v7 = vld [vmem:[%s6769_s2 + $0x20c] ss:$28 sps:$4 sm:$0xff]  }
  0x70   : > { %v6214_v62 = vld [vmem:[%s6769_s2 + $0x80] ss:$28 sps:$4 sm:$0xff]   ;;  %v6226_v8 = vld [vmem:[%s6769_s2 + $0x208] ss:$28 sps:$4 sm:$0xff]   ;;  %v6229_v9 = vld [vmem:[%s6769_s2 + $0x210] ss:$28 sps:$4 sm:$0xff]  }
  0x71   : > { %v6232_v10 = vld [vmem:[%s6769_s2 + $0x1d4] ss:$28 sps:$4 sm:$0xff]   ;;  %v6865_v17 = vshrl.u32 %v1903_v15, 7  ;;  %v6237_v23 = vld [vmem:[%s6565_s25 + $0x60] ss:$8 sps:$4 sm:$0xff]   ;;  %s8790_s5 = smov 127  }
  0x72   : > { %1681 = vmatpush1.bf16.msra.mxu0 %v6166_v27  ;;  %1722 = vmatpush1.bf16.msra.mxu1 %v6167_v28  ;;  %v6230_v11 = vld [vmem:[%s6769_s2 + $0x1d0] ss:$28 sps:$4 sm:$0xff]   ;;  %v6233_v12 = vld [vmem:[%s6769_s2 + $0x1d8] ss:$28 sps:$4 sm:$0xff]   ;;  %v6243_v28 = vld [vmem:[%s6565_s25 + $0x40] ss:$8 sps:$4 sm:$0xff]  }
  0x73   : > { %1682 = vmatprep.subr.bf16.mxu0 %v6168_v29  ;;  %1723 = vmatprep.subr.bf16.mxu1 %v6170_v30  ;;  %v5607_v13 = vld [vmem:[%s6560_s21 + $0x4] ss:$8 sm:$0xf]  ;;  %v6868_v18 = vsub.s32 4, %v6865_v17  ;;  %v6234_v21 = vld [vmem:[%s6565_s25 + $0x70] ss:$8 sps:$4 sm:$0xff]  }
  0x74   : > { %v5608_v14 = vld [vmem:[%s6560_s21 + $0x4] ss:$8 sm:$0x70]  ;;  %v6240_v26 = vld [vmem:[%s6565_s25 + $0x50] ss:$8 sps:$4 sm:$0xff]   ;;  %s8466_s9 = smov 118  }
  0x75   : > { %v2195_v16 = vor.u32 %v5608_v14, %v5607_v13  ;;  %v6236_v22 = vld [vmem:[%s6565_s25 + $0x74] ss:$8 sps:$4 sm:$0xff]   ;;  %v6239_v24 = vld [vmem:[%s6565_s25 + $0x64] ss:$8 sps:$4 sm:$0xff]   ;;  %v6246_v30 = vld [vmem:[%s6565_s25 + $0x30] ss:$8 sps:$4 sm:$0xff]  }
  0x76   : > { %1683 = vmatpush1.bf16.msra.mxu0 %v6172_v31  ;;  %1724 = vmatpush1.bf16.msra.mxu1 %v6173_v32  ;;  %v6242_v25 = vld [vmem:[%s6565_s25 + $0x54] ss:$8 sps:$4 sm:$0xff]   ;;  %v6245_v27 = vld [vmem:[%s6565_s25 + $0x44] ss:$8 sps:$4 sm:$0xff]   ;;  %v6249_v32 = vld [vmem:[%s6565_s25 + $0x20] ss:$8 sps:$4 sm:$0xff]  }
  0x77   : > { %1684 = vmatprep.subr.bf16.mxu0 %v6174_v33  ;;  %1725 = vmatprep.subr.bf16.mxu1 %v6176_v34  ;;  %vm2196_vm1 = vcmp.gt.f32.partialorder %v2195_v16, 0.5  ;;  %v6248_v29 = vld [vmem:[%s6565_s25 + $0x34] ss:$8 sps:$4 sm:$0xff]   ;;  %v6251_v31 = vld [vmem:[%s6565_s25 + $0x24] ss:$8 sps:$4 sm:$0xff]  }
  0x78   : > { %v6871_v19 = vsel %vm2196_vm1, 1, %v8423_v3  ;;  %v6254_v33 = vld [vmem:[%s6565_s25 + $0x14] ss:$8 sps:$4 sm:$0xff]   ;;  %v6252_v34 = vld [vmem:[%s6565_s25 + $0x10] ss:$8 sps:$4 sm:$0xff]  }
  0x79   : > { %v2217_v20 = vrot.slane %v6871_v19, %v6868_v18  ;;  %v6287_v14 = vld [vmem:[%s6565_s25 + $0xa4] ss:$8 sps:$4 sm:$0xff]   ;;  %v6285_v15 = vld [vmem:[%s6565_s25 + $0xa0] ss:$8 sps:$4 sm:$0xff]   ;;  %v6288_v16 = vld [vmem:[%s6565_s25 + $0x130] ss:$8 sps:$4 sm:$0xff]  }
  0x7a   : > { %1685 = vmatpush1.bf16.msra.mxu0 %v6178_v35  ;;  %1726 = vmatpush1.bf16.msra.mxu1 %v6179_v36  ;;  %v6257_v35 = vld [vmem:[%s6565_s25 + $0x4] ss:$8 sps:$4 sm:$0xff]   ;;  %v6255_v36 = vld [vmem:[%s6565_s25] ss:$8 sps:$4 sm:$0xff]  }
  0x7b   : > { %1698 = vmatprep.subr.bf16.mxu0 %v6180_v37  ;;  %1739 = vmatprep.subr.bf16.mxu1 %v6182_v38  ;;  %v6260_v37 = vld [vmem:[%s6565_s25 + $0xf4] ss:$8 sps:$4 sm:$0xff]   ;;  %v6258_v38 = vld [vmem:[%s6565_s25 + $0xf0] ss:$8 sps:$4 sm:$0xff]   ;;  %vm7011_vm5 = vcmp.eq.s32.totalorder %v2217_v20, 1 }
  0x7e   : > { %1699 = vmatpush2.bf16.msra.mxu0 %v6184_v39  ;;  %1740 = vmatpush2.bf16.msra.mxu1 %v6185_v40  ;;  %v6261_v39 = vld [vmem:[%s6565_s25 + $0xe0] ss:$8 sps:$4 sm:$0xff]   ;;  %v6263_v40 = vld [vmem:[%s6565_s25 + $0xe4] ss:$8 sps:$4 sm:$0xff]  }
  0x7f   : > { %1700 = vmatprep.subr.bf16.mxu0 %v6186_v41  ;;  %1741 = vmatprep.subr.bf16.mxu1 %v6188_v42  ;;  %v6264_v41 = vld [vmem:[%s6565_s25 + $0x170] ss:$8 sps:$4 sm:$0xff]   ;;  %v6266_v42 = vld [vmem:[%s6565_s25 + $0x174] ss:$8 sps:$4 sm:$0xff]  }
  0x82   : > { %1701 = vmatpush2.bf16.msra.mxu0 %v6190_v43  ;;  %1742 = vmatpush2.bf16.msra.mxu1 %v6191_v44 }
  0x83   : > { %1752 = vmatprep.subr.bf16.mxu0 %v6196_v45  ;;  %1793 = vmatprep.subr.bf16.mxu1 %v8423_v3 }
  0x85   : > { %1703 = vmatmul.mubr.bf16.vlgmr.msra.gmra.mxu0 %v6814_v46  ;;  %1744 = vmatmul.mubr.bf16.vlgmr.msra.gmra.mxu1 %v6814_v46 }
  0x86   : > { %1753 = vmatpush1.bf16.msra.mxu0 %v6194_v47  ;;  %1794 = vmatpush1.bf16.msra.mxu1 %v6197_v48  ;;  %v6269_v48 = vld [vmem:[%s6565_s25 + $0xd4] ss:$8 sps:$4 sm:$0xff]  }
  0x87   : > { %1754 = vmatprep.subr.bf16.mxu0 %v6200_v49  ;;  %1795 = vmatprep.subr.bf16.mxu1 %v8423_v3 }
  0x88   : > { %5599 = vmatprep.mubr.msk.bf16.mxu0 %vm1666_vm0, %v6756_v2  ;;  %5600 = vmatprep.mubr.msk.bf16.mxu1 %vm1666_vm0, %v6756_v2  ;;  %v6221_v2 = vld [vmem:[%s6769_s2 + $0x50] ss:$28 sps:$4 sm:$0xff]   ;;  %s6521_s2 = smov 15  }
  0x8a   : > { %1755 = vmatpush1.bf16.msra.mxu0 %v6198_v50  ;;  %1796 = vmatpush1.bf16.msra.mxu1 %v6201_v51  ;;  %v6267_v51 = vld [vmem:[%s6565_s25 + $0xd0] ss:$8 sps:$4 sm:$0xff]  }
  0x8b   : > { %1756 = vmatprep.subr.bf16.mxu0 %v6204_v52  ;;  %1797 = vmatprep.subr.bf16.mxu1 %v8423_v3  ;;  %v6270_v52 = vld [vmem:[%s6565_s25 + $0x160] ss:$8 sps:$4 sm:$0xff]  }
  0x8e   : > { %1757 = vmatpush1.bf16.msra.mxu0 %v6202_v53  ;;  %1798 = vmatpush1.bf16.msra.mxu1 %v6205_v54 }
  0x8f   : > { %1758 = vmatprep.subr.bf16.mxu0 %v6208_v55  ;;  %1799 = vmatprep.subr.bf16.mxu1 %v8423_v3 }
  0x92   : > { %1759 = vmatpush1.bf16.msra.mxu0 %v6206_v56  ;;  %1800 = vmatpush1.bf16.msra.mxu1 %v6209_v57  ;;  %v6272_v56 = vld [vmem:[%s6565_s25 + $0x164] ss:$8 sps:$4 sm:$0xff]  }
  0x93   : > { %1760 = vmatprep.subr.bf16.mxu0 %v6212_v58  ;;  %1801 = vmatprep.subr.bf16.mxu1 %v8423_v3 }
  0x96   : > { %1761 = vmatpush1.bf16.msra.mxu0 %v6210_v59  ;;  %1802 = vmatpush1.bf16.msra.mxu1 %v6213_v60 }
  0x97   : > { %1762 = vmatprep.subr.bf16.mxu0 %v6216_v61  ;;  %1803 = vmatprep.subr.bf16.mxu1 %v8423_v3 }
  0x9a   : > { %1763 = vmatpush1.bf16.msra.mxu0 %v6214_v62  ;;  %1804 = vmatpush1.bf16.msra.mxu1 %v6217_v63  ;;  %v6273_v63 = vld [vmem:[%s6565_s25 + $0xc0] ss:$8 sps:$4 sm:$0xff]  }
  0x9b   : > { %1764 = vmatprep.subr.bf16.mxu0 %v6220_v0  ;;  %1805 = vmatprep.subr.bf16.mxu1 %v8423_v3  ;;  %v6275_v0 = vld [vmem:[%s6565_s25 + $0xc4] ss:$8 sps:$4 sm:$0xff]  }
  0x9e   : > { %1765 = vmatpush1.bf16.msra.mxu0 %v6218_v1  ;;  %1806 = vmatpush1.bf16.msra.mxu1 %v6221_v2 }
  0x9f   : > { %1766 = vmatprep.subr.bf16.mxu0 %v6224_v4  ;;  %1807 = vmatprep.subr.bf16.mxu1 %v8423_v3  ;;  %v6278_v4 = vld [vmem:[%s6565_s25 + $0x154] ss:$8 sps:$4 sm:$0xff]  }
  0xa2   : > { %1767 = vmatpush1.bf16.msra.mxu0 %v6222_v5  ;;  %1808 = vmatpush1.bf16.msra.mxu1 %v6225_v6  ;;  %v6276_v5 = vld [vmem:[%s6565_s25 + $0x150] ss:$8 sps:$4 sm:$0xff]  }
  0xa3   : > { %1780 = vmatprep.subr.bf16.mxu0 %v6228_v7  ;;  %1821 = vmatprep.subr.bf16.mxu1 %v8423_v3  ;;  %v6281_v7 = vld [vmem:[%s6565_s25 + $0xb4] ss:$8 sps:$4 sm:$0xff]  }
  0xa6   : > { %1781 = vmatpush2.bf16.msra.mxu0 %v6226_v8  ;;  %1822 = vmatpush2.bf16.msra.mxu1 %v6229_v9  ;;  %v6279_v9 = vld [vmem:[%s6565_s25 + $0xb0] ss:$8 sps:$4 sm:$0xff]  }
  0xa7   : > { %1782 = vmatprep.subr.bf16.mxu0 %v6232_v10  ;;  %1823 = vmatprep.subr.bf16.mxu1 %v8423_v3  ;;  %v6284_v10 = vld [vmem:[%s6565_s25 + $0x144] ss:$8 sps:$4 sm:$0xff]  }
  0xaa   : > { %1783 = vmatpush2.bf16.msra.mxu0 %v6230_v11  ;;  %1824 = vmatpush2.bf16.msra.mxu1 %v6233_v12  ;;  %v6282_v11 = vld [vmem:[%s6565_s25 + $0x140] ss:$8 sps:$4 sm:$0xff]  }
  0xab   : > { %3183 = vmatprep.subr.bf16.mxu0 %v6236_v22  ;;  %3224 = vmatprep.subr.bf16.mxu1 %v6266_v42  ;;  %v6293_v22 = vld [vmem:[%s6565_s25 + $0x94] ss:$8 sps:$4 sm:$0xff]  }
  0xad   : > { %1785 = vmatmul.mubr.bf16.vlgmr.msra.gmra.mxu0 %v6814_v46  ;;  %1826 = vmatmul.mubr.bf16.vlgmr.msra.gmra.mxu1 %v6814_v46 }
  0xae   : > { %3184 = vmatpush1.bf16.msra.mxu0 %v6234_v21  ;;  %3225 = vmatpush1.bf16.msra.mxu1 %v6264_v41  ;;  %v6290_v21 = vld [vmem:[%s6565_s25 + $0x134] ss:$8 sps:$4 sm:$0xff]   ;;  %v6312_v41 = vld [vmem:[%s6565_s25 + $0x1f0] ss:$8 sps:$4 sm:$0xff]  }
  0xaf   : > { %3185 = vmatprep.subr.bf16.mxu0 %v6239_v24  ;;  %3226 = vmatprep.subr.bf16.mxu1 %v6272_v56  ;;  %v6291_v24 = vld [vmem:[%s6565_s25 + $0x90] ss:$8 sps:$4 sm:$0xff]   ;;  %v6326_v56 = vld [vmem:[%s6565_s25 + $0x1d4] ss:$8 sps:$4 sm:$0xff]  }
  0xb2   : > { %3186 = vmatpush1.bf16.msra.mxu0 %v6237_v23  ;;  %3227 = vmatpush1.bf16.msra.mxu1 %v6270_v52 }
  0xb3   : > { %3187 = vmatprep.subr.bf16.mxu0 %v6242_v25  ;;  %3228 = vmatprep.subr.bf16.mxu1 %v6278_v4  ;;  %v6296_v25 = vld [vmem:[%s6565_s25 + $0x124] ss:$8 sps:$4 sm:$0xff]  }
  0xb6   : > { %3188 = vmatpush1.bf16.msra.mxu0 %v6240_v26  ;;  %3229 = vmatpush1.bf16.msra.mxu1 %v6276_v5  ;;  %v6294_v26 = vld [vmem:[%s6565_s25 + $0x120] ss:$8 sps:$4 sm:$0xff]  }
  0xb7   : > { %3189 = vmatprep.subr.bf16.mxu0 %v6245_v27  ;;  %3230 = vmatprep.subr.bf16.mxu1 %v6284_v10  ;;  %v6299_v27 = vld [vmem:[%s6565_s25 + $0x84] ss:$8 sps:$4 sm:$0xff]  }
  0xba   : > { %3190 = vmatpush1.bf16.msra.mxu0 %v6243_v28  ;;  %3231 = vmatpush1.bf16.msra.mxu1 %v6282_v11 }
  0xbb   : > { %3191 = vmatprep.subr.bf16.mxu0 %v6248_v29  ;;  %3232 = vmatprep.subr.bf16.mxu1 %v6290_v21  ;;  %v6297_v29 = vld [vmem:[%s6565_s25 + $0x80] ss:$8 sps:$4 sm:$0xff]  }
  0xbe   : > { %3192 = vmatpush1.bf16.msra.mxu0 %v6246_v30  ;;  %3233 = vmatpush1.bf16.msra.mxu1 %v6288_v16  ;;  %v6302_v30 = vld [vmem:[%s6565_s25 + $0x114] ss:$8 sps:$4 sm:$0xff]   ;;  %v8508_v16 = vmov 0 }
  0xbf   : > { %3193 = vmatprep.subr.bf16.mxu0 %v6251_v31  ;;  %3234 = vmatprep.subr.bf16.mxu1 %v6296_v25  ;;  %v6300_v31 = vld [vmem:[%s6565_s25 + $0x110] ss:$8 sps:$4 sm:$0xff]   ;;  %v8509_v16 = vsel %vm7011_vm5, 4294967295, %v8508_v16 }
  0xc2   : > { %3194 = vmatpush1.bf16.msra.mxu0 %v6249_v32  ;;  %3235 = vmatpush1.bf16.msra.mxu1 %v6294_v26  ;;  %v6305_v32 = vld [vmem:[%s6565_s25 + $0x274] ss:$8 sps:$4 sm:$0xff]  }
  0xc3   : > { %3195 = vmatprep.subr.bf16.mxu0 %v6254_v33  ;;  %3236 = vmatprep.subr.bf16.mxu1 %v6302_v30  ;;  %v6308_v33 = vld [vmem:[%s6565_s25 + $0x104] ss:$8 sps:$4 sm:$0xff]  }
  0xc6   : > { %3196 = vmatpush1.bf16.msra.mxu0 %v6252_v34  ;;  %3237 = vmatpush1.bf16.msra.mxu1 %v6300_v31 }
  0xc7   : > { %3197 = vmatprep.subr.bf16.mxu0 %v6257_v35  ;;  %v6306_v35 = vld [vmem:[%s6565_s25 + $0x100] ss:$8 sps:$4 sm:$0xff]   ;;  %3238 = vmatprep.subr.bf16.mxu1 %v6308_v33  ;;  %v5612_v33 = vld [vmem:[%s6560_s21 + $0x6] ss:$8 sm:$0x70] }
  0xca   : > { %3198 = vmatpush1.bf16.msra.mxu0 %v6255_v36  ;;  %v1898_v36 = vld [vmem:[%s6560_s21] ss:$8 sm:$0xf]  ;;  %3239 = vmatpush1.bf16.msra.mxu1 %v6306_v35  ;;  %v6338_v35 = vld [vmem:[%s6565_s25 + $0x1b4] ss:$8 sps:$4 sm:$0xff]  }
  0xcb   : > { %3199 = vmatprep.subr.bf16.mxu0 %v6260_v37  ;;  %v1899_v37 = vld [vmem:[%s6560_s21] ss:$8 sm:$0x70] }
  0xcc   : > { %v1900_v42 = vor.u32 %v1899_v37, %v1898_v36  ;;  %v5614_v37 = vld [vmem:[%s6560_s21 + $0x7] ss:$8 sm:$0x70] }
  0xce   : > { %3200 = vmatpush2.bf16.msra.mxu0 %v6258_v38  ;;  %v6314_v38 = vld [vmem:[%s6565_s25 + $0x1f4] ss:$8 sps:$4 sm:$0xff]   ;;  %vm6980_vm2 = vcmp.gt.f32.partialorder %v1900_v42, 0.5  ;;  %v6342_v42 = vld [vmem:[%s6565_s25 + $0x1a0] ss:$8 sps:$4 sm:$0xff]  }
  0xcf   : > { %3201 = vmatprep.subr.bf16.mxu0 %v6263_v40  ;;  %v5602_v40 = vld [vmem:[%s6560_s21 + $0x1] ss:$8 sm:$0x70]  ;;  %3240 = vmatprep.subr.bf16.mxu1 %v6314_v38  ;;  %v5615_v38 = vld [vmem:[%s6560_s21 + $0x38] ss:$8 sm:$0xf] }
  0xd0   : > { %v6897_v43 = vpop.permute.xlu0 %1836  ;;  %3241 = vmatpush2.bf16.msra.mxu1 %v6312_v41 }
  0xd2   : > { %3202 = vmatpush2.bf16.msra.mxu0 %v6261_v39  ;;  %v5601_v39 = vld [vmem:[%s6560_s21 + $0x1] ss:$8 sm:$0xf] }
  0xd3   : > { %3203 = vmatprep.subr.bf16.mxu0 %v6269_v48  ;;  %v6318_v48 = vld [vmem:[%s6565_s25 + $0x1e0] ss:$8 sps:$4 sm:$0xff]  }
  0xd4   : > { %v6899_v46 = vpop.permute.xlu0 %1849 }
  0xd6   : > { %3204 = vmatpush2.bf16.msra.mxu0 %v6267_v51 }
  0xd7   : > { %3205 = vmatprep.subr.bf16.mxu0 %v6275_v0  ;;  %v6994_v0 = vsel %vm6980_vm2, 1, %v8423_v3 }
  0xda   : > { %3206 = vmatpush2.bf16.msra.mxu0 %v6273_v63 }
  0xdb   : > { %3207 = vmatprep.subr.bf16.mxu0 %v6281_v7 }
  0xde   : > { %3208 = vmatpush2.bf16.msra.mxu0 %v6279_v9 }
  0xdf   : > { %3209 = vmatprep.subr.bf16.mxu0 %v6287_v14 }
  0xe2   : > { %3210 = vmatpush2.bf16.msra.mxu0 %v6285_v15 }
  0xe3   : > { %3211 = vmatprep.subr.bf16.mxu0 %v6293_v22 }
  0xe6   : > { %3212 = vmatpush2.bf16.msra.mxu0 %v6291_v24  ;;  %v6332_v24 = vld [vmem:[%s6565_s25 + $0x1c4] ss:$8 sps:$4 sm:$0xff]  }
  0xe7   : > { %3213 = vmatprep.subr.bf16.mxu0 %v6299_v27 }
  0xea   : > { %3214 = vmatpush2.bf16.msra.mxu0 %v6297_v29 }
  0xeb   : > { %3265 = vmatprep.subr.bf16.mxu0 %v6305_v32  ;;  %v5611_v32 = vld [vmem:[%s6560_s21 + $0x6] ss:$8 sm:$0xf] }
 0x145   : > { %v1704_v44 = vpop.f32.mrf.mxu0  ;;  %v1745_v45 = vpop.f32.mrf.mxu1 }
 0x146   : > { %v1839_v47 = vmul.f32 %v6897_v43, %v1704_v44  ;;  %v1841_v54 = vmul.f32 %v6897_v43, %v1745_v45  ;;  %v6320_v44 = vld [vmem:[%s6565_s25 + $0x1e4] ss:$8 sps:$4 sm:$0xff]   ;;  %v1974_v45 = vor.u32 %v5602_v40, %v5601_v39  ;;  %v5616_v39 = vld [vmem:[%s6560_s21 + $0x38] ss:$8 sm:$0x70] }
 0x147   : > { %v1706_v49 = vpop.f32.mrf.mxu0  ;;  %v1747_v50 = vpop.f32.mrf.mxu1  ;;  %3242 = vmatprep.subr.bf16.mxu1 %v6320_v44  ;;  %v6344_v44 = vld [vmem:[%s6565_s25 + $0x1a4] ss:$8 sps:$4 sm:$0xff]  }
 0x148   : > { %v1852_v53 = vadd.f32 %v6899_v46, %v1839_v47  ;;  %v1840_v55 = vmul.f32 %v6897_v43, %v1706_v49  ;;  %v1854_v1 = vadd.f32 %v6899_v46, %v1841_v54  ;;  %v1842_v13 = vmul.f32 %v6897_v43, %v1747_v50  ;;  %v5603_v47 = vld [vmem:[%s6560_s21 + $0x2] ss:$8 sm:$0xf]  ;;  %v5606_v54 = vld [vmem:[%s6560_s21 + $0x3] ss:$8 sm:$0x70]  ;;  %3243 = vmatpush2.bf16.msra.mxu1 %v6318_v48 }
 0x149   : > { %v1708_v57 = vpop.f32.mrf.mxu0  ;;  %v1749_v58 = vpop.f32.mrf.mxu1  ;;  %v5604_v49 = vld [vmem:[%s6560_s21 + $0x2] ss:$8 sm:$0x70]  ;;  %vm1975_vm3 = vcmp.gt.f32.partialorder %v1974_v45, 0.5  ;;  %3244 = vmatprep.subr.bf16.mxu1 %v6326_v56 }
 0x14a   : > { %v6909_v59 = vmax.f32 %v1852_v53, 0.0  ;;  %v1853_v60 = vadd.f32 %v6899_v46, %v1840_v55  ;;  %v6924_v8 = vmax.f32 %v1854_v1, 0.0  ;;  %v1855_v23 = vadd.f32 %v6899_v46, %v1842_v13  ;;  %v5605_v53 = vld [vmem:[%s6560_s21 + $0x3] ss:$8 sm:$0xf] }
 0x14b   : > { %v1709_v61 = vpop.f32.mrf.mxu0  ;;  %v1750_v62 = vpop.f32.mrf.mxu1  ;;  %v2140_v1 = vor.u32 %v5606_v54, %v5605_v53  ;;  %v6998_v7 = vsel %vm1975_vm3, 1, %v8423_v3  ;;  %v6348_v56 = vld [vmem:[%s6565_s25 + $0x190] ss:$8 sps:$4 sm:$0xff]  }
 0x14c   : > { %v6915_v2 = vmax.f32 %v1853_v60, 0.0  ;;  %2247 = vrot.lane.b32.xlu1 %v6909_v59, %s8453_s7  ;;  %v6951_v28 = vmax.f32 %v1855_v23, 0.0  ;;  %v2055_v60 = vor.u32 %v5604_v49, %v5603_v47  ;;  %v6324_v61 = vld [vmem:[%s6565_s25 + $0x1d0] ss:$8 sps:$4 sm:$0xff]   ;;  %v6330_v23 = vld [vmem:[%s6565_s25 + $0x1c0] ss:$8 sps:$4 sm:$0xff]   ;;  %v2364_v47 = vor.u32 %v5612_v33, %v5611_v32 }
 0x14d   : > { %3245 = vmatpush2.bf16.msra.mxu1 %v6324_v61  ;;  %vm2141_vm6 = vcmp.gt.f32.partialorder %v2140_v1, 0.5  ;;  %v2532_v49 = vor.u32 %v5616_v39, %v5615_v38  ;;  %v6354_v61 = vld [vmem:[%s6565_s25 + $0x180] ss:$8 sps:$4 sm:$0xff]   ;;  %v7118_v32 = vsub.s32 5, %v6865_v17  ;;  %v7121_v33 = vsub.s32 6, %v6865_v17 }
 0x14e   : > { %v6021_v6 = vpack.i.bf16 %v6915_v2, %v6909_v59  ;;  %v6031_v12 = vpack.i.bf16 %v6924_v8, %v6915_v2  ;;  %v6051_v34 = vpack.i.bf16 %v6951_v28, %v6924_v8  ;;  %vm2056_vm4 = vcmp.gt.f32.partialorder %v2055_v60, 0.5  ;;  %3246 = vmatprep.subr.bf16.mxu1 %v6332_v24  ;;  %v6356_v60 = vld [vmem:[%s6565_s25 + $0x184] ss:$8 sps:$4 sm:$0xff]  }
 0x14f   : > { %v7027_v26 = vsel %vm2056_vm4, 1, %v8423_v3  ;;  %v7030_v27 = vsel %vm2141_vm6, 1, %v8423_v3  ;;  %vm2365_vm8 = vcmp.gt.f32.partialorder %v2364_v47, 0.5  ;;  %vm2533_vm10 = vcmp.gt.f32.partialorder %v2532_v49, 0.5  ;;  %v3370_v1 = vld [vmem:[%s8502_s4 + $0x8] sm:$0xff] }
 0x150   : > { %6022 = vrot.lane.b32.xlu0 %v6021_v6, %s6510_s10  ;;  %6012 = vrot.lane.b32.xlu1 %v6021_v6, %s6511_s11  ;;  %v7075_v53 = vsel %vm2533_vm10, 1, %v8423_v3 }
 0x151   : > { %3247 = vmatpush2.bf16.msra.mxu1 %v6330_v23  ;;  %v7105_v23 = vsub.s32 1, %v6865_v17 }
 0x152   : > { %3248 = vmatprep.subr.bf16.mxu1 %v6338_v35 }
 0x153   : > { %8511 = vst [vmem:[#allocation35_spill] sm:$0xff] %v7105_v23  ;;  %v2205_v24 = vrot.slane %v6871_v19, %v7105_v23  ;;  %v1910_v38 = vrot.slane %v6994_v0, %v7105_v23 }
 0x154   : > { %6032 = vrot.lane.b32.xlu0 %v6031_v12, %s8453_s7  ;;  %6017 = vrot.lane.b32.xlu1 %v6021_v6, %s6512_s15 }
 0x155   : > { %vm7133_vm11 = vcmp.eq.s32.totalorder %v2205_v24, 1  ;;  %vm7163_vm2 = vcmp.eq.s32.totalorder %v1910_v38, 1 }
 0x158   : > { %6037 = vrot.lane.b32.xlu0 %v6031_v12, %s6513_s16  ;;  %6027 = vrot.lane.b32.xlu1 %v6021_v6, %s8455_s18  ;;  %v5609_v6 = vld [vmem:[%s6560_s21 + $0x5] ss:$8 sm:$0xf] }
 0x15c   : > { %6042 = vrot.lane.b32.xlu0 %v6031_v12, %s6515_s22  ;;  %2332 = vrot.lane.b32.xlu1 %v6909_v59, %s6513_s16 }
 0x160   : > { %6047 = vrot.lane.b32.xlu0 %v6031_v12, %s6516_s23  ;;  %2416 = vrot.lane.b32.xlu1 %v6909_v59, %s6515_s22  ;;  %v5610_v12 = vld [vmem:[%s6560_s21 + $0x5] ss:$8 sm:$0x70] }
 0x161   : > { %v2280_v25 = vor.u32 %v5610_v12, %v5609_v6  ;;  %v3461_v6 = vld [vmem:[%s8501_s6 + $0x8] sm:$0xff]  ;;  %v3369_v12 = vld [vmem:[%s8502_s4] sm:$0xff]  ;;  %s8789_s4 = smov 1  }
 0x163   : > { %vm2281_vm7 = vcmp.gt.f32.partialorder %v2280_v25, 0.5 }
 0x164   : > { %6052 = vrot.lane.b32.xlu0 %v6051_v34, %s6511_s11  ;;  %2500 = vrot.lane.b32.xlu1 %v6909_v59, %s6516_s23  ;;  %v7051_v41 = vsel %vm2281_vm7, 1, %v8423_v3 }
 0x168   : > { %6062 = vrot.lane.b32.xlu0 %v6051_v34, %s6510_s10  ;;  %6057 = vrot.lane.b32.xlu1 %v6051_v34, %s6512_s15 }
 0x16c   : > { %6067 = vrot.lane.b32.xlu1 %v6051_v34, %s8455_s18  ;;  %v6336_v34 = vld [vmem:[%s6565_s25 + $0x1b0] ss:$8 sps:$4 sm:$0xff]  }
 0x16d   : > { %v1786_v51 = vpop.f32.mrf.mxu0  ;;  %v1827_v52 = vpop.f32.mrf.mxu1  ;;  %3249 = vmatpush2.bf16.msra.mxu1 %v6336_v34 }
 0x16e   : > { %v1843_v55 = vmul.f32 %v6897_v43, %v1786_v51  ;;  %v1845_v29 = vmul.f32 %v6897_v43, %v1827_v52  ;;  %3250 = vmatprep.subr.bf16.mxu1 %v6344_v44  ;;  %v7067_v51 = vsel %vm2365_vm8, 1, %v8423_v3 }
 0x16f   : > { %v1788_v57 = vpop.f32.mrf.mxu0  ;;  %v1829_v58 = vpop.f32.mrf.mxu1 }
 0x170   : > { %v1856_v62 = vadd.f32 %v6899_v46, %v1843_v55  ;;  %v1844_v63 = vmul.f32 %v6897_v43, %v1788_v57  ;;  %v5613_v43 = vld [vmem:[%s6560_s21 + $0x7] ss:$8 sm:$0xf]  ;;  %v1858_v40 = vadd.f32 %v6899_v46, %v1845_v29  ;;  %v7112_v29 = vsub.s32 2, %v6865_v17 }
 0x171   : > { %v1790_v4 = vpop.f32.mrf.mxu0  ;;  %v1830_v5 = vpop.f32.mrf.mxu1  ;;  %v2448_v48 = vor.u32 %v5614_v37, %v5613_v43  ;;  %3251 = vmatpush2.bf16.msra.mxu1 %v6342_v42  ;;  %v6350_v57 = vld [vmem:[%s6565_s25 + $0x194] ss:$8 sps:$4 sm:$0xff]   ;;  %v2065_v43 = vrot.slane %v7027_v26, %v7105_v23 }
 0x172   : > { %v7002_v10 = vmax.f32 %v1856_v62, 0.0  ;;  %v1857_v11 = vadd.f32 %v6899_v46, %v1844_v63  ;;  %v7059_v50 = vmax.f32 %v1858_v40, 0.0  ;;  %3252 = vmatprep.subr.bf16.mxu1 %v6350_v57  ;;  %v6365_v62 = vld [vmem:[%s6565_s25 + $0x304] ss:$8 sps:$4 sm:$0xff]   ;;  %v8421_v4 = vmov 0.0  }
 0x173   : > { %v1791_v14 = vpop.f32.mrf.mxu0  ;;  %v1831_v15 = vpop.f32.mrf.mxu1  ;;  %vm2449_vm9 = vcmp.gt.f32.partialorder %v2448_v48, 0.5  ;;  %v3354_v63 = vld [vmem:[%s6620_s27 + $0x8] sm:$0xff]  ;;  %1214 = vst [vmem:[#allocation2 + $0x18] sm:$0xff] %v8421_v4  ;;  %1215 = vst [vmem:[#allocation2 + $0x8] sm:$0xff] %v8421_v4  ;;  %v2209_v40 = vrot.slane %v6871_v19, %v7112_v29  ;;  %vm7153_vm0 = vcmp.eq.s32.totalorder %v2065_v43, 1  ;;  %v2374_v4 = vrot.slane %v7067_v51, %v7105_v23 }
 0x174   : > { %v7015_v21 = vmax.f32 %v1857_v11, 0.0  ;;  %v6081_v22 = vpack.i.bf16 %v7002_v10, %v6951_v28  ;;  %v7070_v52 = vsel %vm2449_vm9, 1, %v8423_v3  ;;  %v3445_v5 = vld [vmem:[%s6635_s20 + $0x8] sm:$0xff]  ;;  %v3353_v11 = vld [vmem:[%s6620_s27] sm:$0xff]  ;;  %v8561_v31 = vrot.slane %v6994_v0, %v7112_v29 }
 0x175   : > { %3253 = vmatpush2.bf16.msra.mxu1 %v6348_v56  ;;  %v3444_v14 = vld [vmem:[%s6635_s20] sm:$0xff]  ;;  %vm7184_vm7 = vcmp.eq.s32.totalorder %v2209_v40, 1  ;;  %v2458_v13 = vrot.slane %v7070_v52, %v7105_v23  ;;  %vm7253_vm5 = vcmp.eq.s32.totalorder %v2374_v4, 1 }
 0x176   : > { %6082 = vrot.lane.b32.xlu0 %v6081_v22, %s6515_s22  ;;  %6072 = vrot.lane.b32.xlu1 %v6081_v22, %s8453_s7  ;;  %v6086_v30 = vpack.i.bf16 %v7015_v21, %v7002_v10  ;;  %v6111_v46 = vpack.i.bf16 %v7059_v50, %v7015_v21  ;;  %v3460_v15 = vld [vmem:[%s8501_s6] sm:$0xff]  ;;  %s6528_s6 = smov 9  }
 0x177   : > { %3254 = vmatprep.subr.bf16.mxu1 %v6356_v60 }
 0x179   : > { %3255 = vmatpush2.bf16.msra.mxu1 %v6354_v61 }
 0x17a   : > { %6077 = vrot.lane.b32.xlu1 %v6081_v22, %s6513_s16  ;;  %6087 = vrot.lane.b32.xlu0 %v6086_v30, %s6511_s11  ;;  %s6522_s11 = smov 16  }
 0x17b   : > { %3320 = vmatprep.subr.bf16.mxu1 %v6365_v62  ;;  %v1984_v62 = vrot.slane %v6998_v7, %v7105_v23 }
 0x17d   : > { %vm7201_vm9 = vcmp.eq.s32.totalorder %v1984_v62, 1 }
 0x17e   : > { %6092 = vrot.lane.b32.xlu1 %v6086_v30, %s6512_s15  ;;  %6102 = vrot.lane.b32.xlu0 %v6086_v30, %s6510_s10  ;;  %s8742_s10 = sld [smem:[#allocation18_spill]] }
 0x17f   : > { %s8743_s15 = sld [smem:[#allocation21_spill]] }
 0x182   : > { %2120 = vrot.lane.b32.xlu1 %v7059_v50, %s8455_s18  ;;  %6107 = vrot.lane.b32.xlu0 %v6086_v30, %s8455_s18  ;;  %v7115_v30 = vsub.s32 3, %v6865_v17 }
 0x184   : > { %v2213_v42 = vrot.slane %v6871_v19, %v7115_v30 }
 0x186   : > { %6097 = vrot.lane.b32.xlu1 %v6081_v22, %s6516_s23  ;;  %6112 = vrot.lane.b32.xlu0 %v6111_v46, %s8453_s7  ;;  %v7102_v22 = vsub.s32 0, %v6865_v17 }
 0x188   : > { %8510 = vst [vmem:[#allocation34_spill] sm:$0xff] %v7102_v22  ;;  %v2201_v25 = vrot.slane %v6871_v19, %v7102_v22  ;;  %v2061_v35 = vrot.slane %v7027_v26, %v7102_v22  ;;  %v1906_v37 = vrot.slane %v6994_v0, %v7102_v22  ;;  %v1980_v61 = vrot.slane %v6998_v7, %v7102_v22 }
 0x189   : > { %v2370_v3 = vrot.slane %v7067_v51, %v7102_v22 }
 0x18a   : > { %6122 = vrot.lane.b32.xlu1 %v6111_v46, %s6515_s22  ;;  %6117 = vrot.lane.b32.xlu0 %v6111_v46, %s6513_s16  ;;  %vm7137_vm12 = vcmp.eq.s32.totalorder %v2201_v25, 1  ;;  %vm7149_vm15 = vcmp.eq.s32.totalorder %v2061_v35, 1  ;;  %vm7159_vm1 = vcmp.eq.s32.totalorder %v1906_v37, 1  ;;  %v2286_v35 = vrot.slane %v7051_v41, %v7102_v22  ;;  %s8451_s16 = smov 17   ;;  %s8449_s22 = smov 111  }
 0x18b   : > { %vm7197_vm8 = vcmp.eq.s32.totalorder %v1980_v61, 1  ;;  %v8555_v58 = vsel %vm7137_vm12, %v6909_v59, -1e+30 }
 0x18c   : > { %vm7237_vm3 = vcmp.eq.s32.totalorder %v2286_v35, 1 }
 0x18e   : > { %6127 = vrot.lane.b32.xlu0 %v6111_v46, %s6516_s23  ;;  %3357 = vperm.xlu1 %6131, %v3353_v11   ;;  %v2150_v11 = vrot.slane %v7030_v27, %v7105_v23  ;;  %s8744_s23 = sld [smem:[#allocation22_spill]] }
 0x190   : > { %vm7225_vm4 = vcmp.eq.s32.totalorder %v2150_v11, 1  ;;  %v2454_v11 = vrot.slane %v7070_v52, %v7102_v22 }
 0x192   : > { %3362 = vperm.xlu0 %6010, %v3354_v63   ;;  %3373 = vperm.xlu1 %6131, %v3369_v12   ;;  %v2234_v12 = vsel %vm7133_vm11, %v6915_v2, -1e+30  ;;  %vm8557_vm11 = vcmask 818176  }
 0x193   : > { %vm8558_vm12 = vmmov %vm8557_vm11 }
 0x196   : > { %3378 = vperm.xlu0 %6010, %v3370_v1   ;;  %3448 = vperm.xlu1 %6131, %v3444_v14  }
 0x19a   : > { %3453 = vperm.xlu0 %6010, %v3445_v5   ;;  %3464 = vperm.xlu1 %6131, %v3460_v15   ;;  %v2290_v5 = vrot.slane %v7051_v41, %v7105_v23 }
 0x19c   : > { %vm7215_vm10 = vcmp.eq.s32.totalorder %v2290_v5, 1 }
 0x19e   : > { %3469 = vperm.xlu0 %6010, %v3461_v6   ;;  %v2146_v6 = vrot.slane %v7030_v27, %v7102_v22 }
 0x1a0   : > { %vm7220_vm6 = vcmp.eq.s32.totalorder %v2146_v6, 1 }
 0x1be   : > { %v7123_v34 = vpop.permute.xlu1 %2247 }
 0x1c2   : > { %v7157_v46 = vpop.permute.xlu0 %6022  ;;  %v7167_v60 = vpop.permute.xlu1 %6012 }
 0x1c3   : > { %v8426_v63 = vunpack.i.h.bf16 %v7167_v60  ;;  %v6014_v1 = vunpack.i.l.bf16 %v7167_v60  ;;  %v8429_v15 = vunpack.i.h.bf16 %v7157_v46  ;;  %v6024_v24 = vunpack.i.l.bf16 %v7157_v46 }
 0x1c5   : > { %v1885_v20 = vsel %vm8425_vm14, %v6014_v1, %v8426_v63  ;;  %v1897_v61 = vsel %vm8425_vm14, 0.0, %v6014_v1  ;;  %v2039_v36 = vsel %vm8427_vm13, %v6024_v24, %v8429_v15  ;;  %v2051_v6 = vsel %vm8427_vm13, 0.0, %v6024_v24 }
 0x1c6   : > { %v7195_v43 = vpop.permute.xlu0 %6032  ;;  %v7205_v40 = vpop.permute.xlu1 %6017  ;;  %v1938_v9 = vsel %vm7159_vm1, %v1897_v61, -1e+30  ;;  %v1939_v63 = vsel %vm7163_vm2, %v1885_v20, -1e+30  ;;  %vm8538_vm13 = vcmask 228352   ;;  %vm7278_vm1 = vcmp.eq.s32.totalorder %v2454_v11, 1 }
 0x1c7   : > { %v8430_v62 = vunpack.i.h.bf16 %v7205_v40  ;;  %v6019_v54 = vunpack.i.l.bf16 %v7205_v40  ;;  %vm8539_vm14 = vmmov %vm8538_vm13  ;;  %v8437_v56 = vunpack.i.h.bf16 %v7195_v43  ;;  %v6034_v61 = vunpack.i.l.bf16 %v7195_v43 }
 0x1c8   : > { %v2093_v25 = vsel %vm7149_vm15, %v2051_v6, -1e+30  ;;  %v2094_v37 = vsel %vm7153_vm0, %v2039_v36, -1e+30  ;;  %vm7282_vm2 = vcmp.eq.s32.totalorder %v2458_v13, 1  ;;  %vm8548_vm15 = vcmask 7168  }
 0x1c9   : > { %v1958_v24 = vsel %vm8538_vm13, %v6019_v54, %v8430_v62  ;;  %v1970_v35 = vsel %vm8539_vm14, 0.0, %v6019_v54  ;;  %vm7267_vm13 = vcmp.eq.s32.totalorder %v2370_v3, 1  ;;  %vm8433_vm14 = vcmask 809984  }
 0x1ca   : > { %v7257_v47 = vpop.permute.xlu0 %6037  ;;  %v7259_v44 = vpop.permute.xlu1 %6027  ;;  %v2012_v20 = vsel %vm7197_vm8, %v1970_v35, -1e+30  ;;  %v2013_v57 = vsel %vm7201_vm9, %v1958_v24, -1e+30  ;;  %vm8549_vm0 = vcmask 1039360   ;;  %vm8550_vm8 = vmmov %vm8548_vm15  ;;  %vm7301_vm9 = vcmp.eq.s32.totalorder %v2213_v42, 1 }
 0x1cb   : > { %v2019_v4 = vmax.f32 %v1938_v9, %v2012_v20  ;;  %v2020_v62 = vmax.f32 %v1939_v63, %v2013_v57  ;;  %v6030_v5 = vunpack.i.h.bf16 %v7259_v44  ;;  %v6029_v1 = vunpack.i.l.bf16 %v7259_v44 }
 0x1cc   : > { %v8432_v38 = vunpack.i.h.bf16 %v7257_v47  ;;  %v6039_v9 = vunpack.i.l.bf16 %v7257_v47  ;;  %v2263_v6 = vsel %vm8549_vm0, %v6034_v61, %v8437_v56  ;;  %v2538_v42 = vrot.slane %v7075_v53, %v7102_v22 }
 0x1cd   : > { %v2100_v63 = vmax.f32 %v2019_v4, %v2093_v25  ;;  %v2101_v35 = vmax.f32 %v2020_v62, %v2094_v37  ;;  %v2123_v48 = vsel %vm8548_vm15, %v6029_v1, %v6030_v5  ;;  %v2136_v13 = vsel %vm8550_vm8, 0.0, %v6029_v1 }
 0x1ce   : > { %v7290_v49 = vpop.permute.xlu0 %6042  ;;  %v2333_v36 = vpop.permute.xlu1 %2332  ;;  %v2179_v11 = vsel %vm7225_vm4, %v2123_v48, -1e+30  ;;  %v2178_v20 = vsel %vm7220_vm6, %v2136_v13, -1e+30  ;;  %vm8553_vm4 = vmmov %vm8549_vm0  ;;  %v2069_v48 = vrot.slane %v7027_v26, %v7112_v29  ;;  %v2319_v62 = vsel %vm7215_vm10, %v2263_v6, -1e+30 }
 0x1cf   : > { %v2186_v57 = vmax.f32 %v2101_v35, %v2179_v11  ;;  %v8436_v1 = vunpack.i.h.bf16 %v7290_v49  ;;  %v6044_v45 = vunpack.i.l.bf16 %v7290_v49  ;;  %v2185_v4 = vmax.f32 %v2100_v63, %v2178_v20 }
 0x1d0   : > { %v2262_v37 = vsel %vm8553_vm4, %v7123_v34, %v6034_v61  ;;  %vm8554_vm6 = vcmask 826368   ;;  %v2542_v61 = vrot.slane %v7075_v53, %v7105_v23  ;;  %v2073_v20 = vrot.slane %v7027_v26, %v7115_v30 }
 0x1d1   : > { %v2348_v55 = vsel %vm8554_vm6, %v6039_v9, %v8432_v38  ;;  %v2241_v63 = vmax.f32 %v2186_v57, %v2234_v12  ;;  %v2240_v6 = vmax.f32 %v2185_v4, %v8555_v58  ;;  %vm8556_vm10 = vmmov %vm8554_vm6  ;;  %v2432_v2 = vsel %vm8557_vm11, %v6044_v45, %v8436_v1 }
 0x1d2   : > { %v7327_v35 = vpop.permute.xlu0 %6047  ;;  %v2417_v34 = vpop.permute.xlu1 %2416  ;;  %v2347_v13 = vsel %vm8556_vm10, %v2333_v36, %v6039_v9  ;;  %v2318_v12 = vsel %vm7237_vm3, %v2262_v37, -1e+30  ;;  %v2403_v59 = vsel %vm7253_vm5, %v2348_v55, -1e+30  ;;  %vm7348_vm15 = vcmp.eq.s32.totalorder %v2538_v42, 1 }
 0x1d3   : > { %v8431_v11 = vunpack.i.h.bf16 %v7327_v35  ;;  %v6049_v39 = vunpack.i.l.bf16 %v7327_v35  ;;  %v2326_v17 = vmax.f32 %v2241_v63, %v2319_v62  ;;  %v2325_v57 = vmax.f32 %v2240_v6, %v2318_v12 }
 0x1d4   : > { %v2431_v9 = vsel %vm8558_vm12, %v2417_v34, %v6044_v45  ;;  %v2402_v4 = vsel %vm7267_vm13, %v2347_v13, -1e+30  ;;  %vm7357_vm3 = vcmp.eq.s32.totalorder %v8561_v31, 1  ;;  %vm7366_vm5 = vcmp.eq.s32.totalorder %v2542_v61, 1 }
 0x1d5   : > { %v2410_v55 = vmax.f32 %v2326_v17, %v2403_v59  ;;  %v2516_v45 = vsel %vm8433_vm14, %v6049_v39, %v8431_v11  ;;  %v2409_v54 = vmax.f32 %v2325_v57, %v2402_v4  ;;  %v8566_v63 = vrot.slane %v6994_v0, %v7115_v30 }
 0x1d6   : > { %v7361_v62 = vpop.permute.xlu0 %6052  ;;  %v2501_v15 = vpop.permute.xlu1 %2500  ;;  %v1988_v6 = vrot.slane %v6998_v7, %v7112_v29  ;;  %v2487_v13 = vsel %vm7282_vm2, %v2432_v2, -1e+30  ;;  %v2486_v61 = vsel %vm7278_vm1, %v2431_v9, -1e+30  ;;  %v1992_v17 = vrot.slane %v6998_v7, %v7115_v30 }
 0x1d7   : > { %vm7373_vm13 = vcmp.eq.s32.totalorder %v8566_v63, 1  ;;  %v2515_v58 = vsel %vm8433_vm14, %v2501_v15, %v6049_v39  ;;  %v2494_v59 = vmax.f32 %v2410_v55, %v2487_v13  ;;  %v2493_v57 = vmax.f32 %v2409_v54, %v2486_v61 }
 0x1d8   : > { %v2570_v12 = vsel %vm7348_vm15, %v2515_v58, -1e+30  ;;  %v2571_v39 = vsel %vm7366_vm5, %v2516_v45, -1e+30  ;;  %v2154_v4 = vrot.slane %v7030_v27, %v7112_v29  ;;  %v2158_v24 = vrot.slane %v7030_v27, %v7115_v30  ;;  %v6321_v45 = vld [vmem:[%s6565_s25 + $0x240] ss:$8 sps:$4 sm:$0xff]  }
 0x1d9   : > { %v6054_v3 = vunpack.i.l.bf16 %v7361_v62  ;;  %vm7395_vm1 = vcmp.eq.s32.totalorder %v2069_v48, 1  ;;  %v2578_v36 = vmax.f32 %v2494_v59, %v2571_v39  ;;  %v8435_v15 = vunpack.i.h.bf16 %v7361_v62 }
 0x1da   : > { %v7399_v9 = vpop.permute.xlu1 %6057  ;;  %v2577_v55 = vmax.f32 %v2493_v57, %v2570_v12  ;;  %vm7405_vm2 = vcmp.eq.s32.totalorder %v2073_v20, 1  ;;  %v7409_v42 = vpop.permute.xlu0 %6062  ;;  %v8573_v54 = vrot.slane %v6871_v19, %v7118_v32  ;;  %v8574_v63 = vmov 0  ;;  %v6303_v57 = vld [vmem:[%s6565_s25 + $0x270] ss:$8 sps:$4 sm:$0xff]  }
 0x1db   : > { %v8434_v48 = vunpack.i.h.bf16 %v7399_v9  ;;  %v8576_v58 = vrot.slane %v6871_v19, %v7121_v33  ;;  %v8577_v13 = vmov 0  ;;  %vm7426_vm4 = vcmp.eq.s32.totalorder %v1988_v6, 1  ;;  %v6311_v6 = vld [vmem:[%s6565_s25 + $0x264] ss:$8 sps:$4 sm:$0xff]  }
 0x1dc   : > { %vm7415_vm0 = vcmp.eq.s32.totalorder %v8573_v54, 1  ;;  %vm7430_vm6 = vcmp.eq.s32.totalorder %v1992_v17, 1  ;;  %v6059_v12 = vunpack.i.l.bf16 %v7399_v9  ;;  %v2585_v59 = vpack.c.bf16 %v2578_v36, %v2578_v36 }
 0x1dd   : > { %v8575_v63 = vsel %vm7415_vm0, 4294967295, %v8574_v63  ;;  %vm7422_vm8 = vcmp.eq.s32.totalorder %v8576_v58, 1  ;;  %v2584_v39 = vpack.c.bf16 %v2577_v55, %v2577_v55  ;;  %vm7436_vm10 = vcmp.eq.s32.totalorder %v2154_v4, 1 }
 0x1de   : > { %v8578_v13 = vsel %vm7422_vm8, 4294967295, %v8577_v13  ;;  %vm7440_vm11 = vcmp.eq.s32.totalorder %v2158_v24, 1  ;;  %v2294_v17 = vrot.slane %v7051_v41, %v7112_v29  ;;  %v8587_v58 = vunpack.i.h.bf16 %v7167_v60  ;;  %3215 = vmatprep.mubr.bf16.mxu0 %v2585_v59  ;;  %v7457_v38 = vpop.permute.xlu1 %6067 }
 0x1df   : > { %vm8588_vm12 = vcmask 236544   ;;  %v6064_v36 = vunpack.i.l.bf16 %v7409_v42  ;;  %v8589_v4 = vunpack.i.h.bf16 %v7205_v40  ;;  %vm8590_vm15 = vcmask 228352   ;;  %3216 = vmatmul.mubr.bf16.vlgmr.msra.gmra.mxu0 %v2584_v39 }
 0x1e0   : > { %v1886_v11 = vsel %vm8588_vm12, %v8587_v58, %v6054_v3  ;;  %vm8591_vm5 = vmmov %vm8590_vm15  ;;  %v8438_v58 = vunpack.i.h.bf16 %v7409_v42  ;;  %v2462_v40 = vrot.slane %v7070_v52, %v7112_v29  ;;  %v6069_v59 = vunpack.i.l.bf16 %v7457_v38  ;;  %3266 = vmatpush1.bf16.msra.mxu0 %v6303_v57 }
 0x1e1   : > { %v1959_v55 = vsel %vm8590_vm15, %v8589_v4, %v6059_v12  ;;  %v1960_v24 = vsel %vm8591_vm5, %v6059_v12, %v8434_v48  ;;  %vm8592_vm14 = vmmov %vm8588_vm12  ;;  %v6309_v4 = vld [vmem:[%s6565_s25 + $0x260] ss:$8 sps:$4 sm:$0xff]   ;;  %v2298_v48 = vrot.slane %v7051_v41, %v7115_v30  ;;  %v1940_v20 = vsel %vm7357_vm3, %v1886_v11, -1e+30  ;;  %3267 = vmatprep.subr.bf16.mxu0 %v6311_v6 }
 0x1e2   : > { %v1887_v60 = vsel %vm8592_vm14, %v6054_v3, %v8435_v15  ;;  %v2014_v31 = vsel %vm7426_vm4, %v1959_v55, -1e+30  ;;  %v2015_v12 = vsel %vm7430_vm6, %v1960_v24, -1e+30  ;;  %v2378_v3 = vrot.slane %v7067_v51, %v7112_v29  ;;  %v6317_v55 = vld [vmem:[%s6565_s25 + $0x254] ss:$8 sps:$4 sm:$0xff]  }
 0x1e3   : > { %v2382_v61 = vrot.slane %v7067_v51, %v7115_v30  ;;  %v1926_v57 = vrot.slane %v6994_v0, %v7118_v32  ;;  %v1941_v24 = vsel %vm7373_vm13, %v1887_v60, -1e+30  ;;  %v8593_v15 = vunpack.i.h.bf16 %v7157_v46 }
 0x1e4   : > { %vm8594_vm14 = vcmask 220160   ;;  %v2021_v37 = vmax.f32 %v1940_v20, %v2014_v31  ;;  %vm7488_vm3 = vcmp.eq.s32.totalorder %v2294_v17, 1  ;;  %v1930_v6 = vrot.slane %v6994_v0, %v7121_v33  ;;  %3268 = vmatpush1.bf16.msra.mxu0 %v6309_v4  ;;  %v6323_v20 = vld [vmem:[%s6565_s25 + $0x244] ss:$8 sps:$4 sm:$0xff]  }
 0x1e5   : > { %v2040_v1 = vsel %vm8594_vm14, %v8593_v15, %v6064_v36  ;;  %vm8597_vm4 = vmmov %vm8594_vm14  ;;  %v2022_v39 = vmax.f32 %v1941_v24, %v2015_v12  ;;  %v2000_v34 = vrot.slane %v6998_v7, %v7118_v32  ;;  %v2004_v46 = vrot.slane %v6998_v7, %v7121_v33  ;;  %v6315_v15 = vld [vmem:[%s6565_s25 + $0x250] ss:$8 sps:$4 sm:$0xff]   ;;  %3269 = vmatprep.subr.bf16.mxu0 %v6317_v55 }
 0x1e6   : > { %v2041_v56 = vsel %vm8597_vm4, %v6064_v36, %v8438_v58  ;;  %vm8598_vm13 = vcmask 7168   ;;  %vm7505_vm6 = vcmp.eq.s32.totalorder %v2462_v40, 1  ;;  %v8599_v17 = vmov 0 }
 0x1e7   : > { %v2124_v31 = vsel %vm8598_vm13, %v6030_v5, %v6069_v59  ;;  %v8600_v17 = vsel %vm7505_vm6, 4294967295, %v8599_v17  ;;  %v2081_v36 = vrot.slane %v7027_v26, %v7118_v32  ;;  %v2085_v60 = vrot.slane %v7027_v26, %v7121_v33  ;;  %vm8602_vm12 = vmmov %vm8598_vm13 }
 0x1e8   : > { %v2394_v12 = vrot.slane %v7067_v51, %v7121_v33  ;;  %v2095_v44 = vsel %vm7395_vm1, %v2040_v1, -1e+30  ;;  %v8601_v5 = vunpack.i.h.bf16 %v7457_v38  ;;  %vm7520_vm15 = vcmp.eq.s32.totalorder %v2298_v48, 1  ;;  %3270 = vmatpush1.bf16.msra.mxu0 %v6315_v15  ;;  %v7559_v54 = vpop.permute.xlu1 %6072 }
 0x1e9   : > { %v2096_v2 = vsel %vm7405_vm2, %v2041_v56, -1e+30  ;;  %v2102_v1 = vmax.f32 %v2021_v37, %v2095_v44  ;;  %v8605_v23 = vrot.slane %v6994_v0, %v6868_v18  ;;  %v2180_v56 = vsel %vm7436_vm10, %v2124_v31, -1e+30  ;;  %3271 = vmatprep.subr.bf16.mxu0 %v6323_v20 }
 0x1ea   : > { %v2125_v40 = vsel %vm8602_vm12, %v6069_v59, %v8601_v5  ;;  %v2103_v5 = vmax.f32 %v2022_v39, %v2096_v2  ;;  %vm7547_vm2 = vcmp.eq.s32.totalorder %v2378_v3, 1  ;;  %v7557_v39 = vpop.permute.xlu0 %6082  ;;  %vm7561_vm10 = vcmp.eq.s32.totalorder %v2382_v61, 1 }
 0x1eb   : > { %vm7534_vm1 = vcmp.eq.s32.totalorder %v8605_v23, 1  ;;  %v2466_v23 = vrot.slane %v7070_v52, %v7115_v30  ;;  %v2181_v44 = vsel %vm7440_vm11, %v2125_v40, -1e+30  ;;  %vm7565_vm5 = vcmp.eq.s32.totalorder %v1930_v6, 1 }
 0x1ec   : > { %vm7569_vm14 = vcmp.eq.s32.totalorder %v2004_v46, 1  ;;  %vm7575_vm11 = vcmp.eq.s32.totalorder %v2394_v12, 1  ;;  %v6084_v61 = vunpack.i.l.bf16 %v7557_v39  ;;  %v8447_v40 = vunpack.i.h.bf16 %v7559_v54  ;;  %v6329_v46 = vld [vmem:[%s6565_s25 + $0x234] ss:$8 sps:$4 sm:$0xff]   ;;  %3272 = vmatpush1.bf16.msra.mxu0 %v6321_v45  ;;  %v6335_v12 = vld [vmem:[%s6565_s25 + $0x224] ss:$8 sps:$4 sm:$0xff]  }
 0x1ed   : > { %v6074_v6 = vunpack.i.l.bf16 %v7559_v54  ;;  %vm7582_vm4 = vcmp.eq.s32.totalorder %v1926_v57, 1  ;;  %v2187_v0 = vmax.f32 %v2102_v1, %v2180_v56  ;;  %v8620_v19 = vrot.slane %v6998_v7, %v6868_v18  ;;  %3273 = vmatprep.subr.bf16.mxu0 %v6329_v46  ;;  %v6345_v1 = vld [vmem:[%s6565_s25 + $0x200] ss:$8 sps:$4 sm:$0xff]  }
 0x1ee   : > { %v8621_v58 = vmov 0  ;;  %vm7597_vm12 = vcmp.eq.s32.totalorder %v2000_v34, 1  ;;  %v8623_v57 = vmov 0  ;;  %v2188_v56 = vmax.f32 %v2103_v5, %v2181_v44  ;;  %v6088_v44 = vpop.permute.xlu0 %6087 }
 0x1ef   : > { %vm7593_vm13 = vcmp.eq.s32.totalorder %v8620_v19, 1  ;;  %v8624_v57 = vsel %vm7597_vm12, 4294967295, %v8623_v57  ;;  %v8625_v55 = vunpack.i.h.bf16 %v7195_v43  ;;  %vm8626_vm8 = vcmask 1039360  }
 0x1f0   : > { %v8622_v58 = vsel %vm7593_vm13, 4294967295, %v8621_v58  ;;  %v8627_v19 = vrot.slane %v7027_v26, %v6868_v18  ;;  %v8628_v24 = vmov 0  ;;  %vm7615_vm13 = vcmp.eq.s32.totalorder %v2085_v60, 1  ;;  %v7633_v60 = vpop.permute.xlu1 %6077 }
 0x1f1   : > { %v2264_v7 = vsel %vm8626_vm8, %v8625_v55, %v6074_v6  ;;  %v8443_v20 = vmov -1e+30   ;;  %vm7624_vm12 = vcmp.eq.s32.totalorder %v2466_v23, 1  ;;  %v8634_v26 = vunpack.i.h.bf16 %v7290_v49 }
 0x1f2   : > { %vm7611_vm0 = vcmp.eq.s32.totalorder %v8627_v19, 1  ;;  %v7622_v5 = vsel %vm7575_vm11, 0.0, %v8443_v20  ;;  %vm8635_vm8 = vcmask 818176   ;;  %v6327_v19 = vld [vmem:[%s6565_s25 + $0x230] ss:$8 sps:$4 sm:$0xff]   ;;  %vm8638_vm11 = vcmask 1039360  }
 0x1f3   : > { %v8629_v24 = vsel %vm7611_vm0, 4294967295, %v8628_v24  ;;  %v7631_v55 = vsel %vm8635_vm8, %v8634_v26, %v6084_v61  ;;  %vm7636_vm0 = vcmp.eq.s32.totalorder %v2081_v36, 1  ;;  %v2265_v45 = vsel %vm8638_vm11, %v6074_v6, %v8447_v40  ;;  %3274 = vmatpush1.bf16.msra.mxu0 %v6327_v19 }
 0x1f4   : > { %v2320_v26 = vsel %vm7488_vm3, %v2264_v7, -1e+30  ;;  %v6080_v36 = vunpack.i.h.bf16 %v7633_v60  ;;  %v6079_v20 = vunpack.i.l.bf16 %v7633_v60  ;;  %v8639_v23 = vunpack.i.h.bf16 %v7557_v39  ;;  %3275 = vmatprep.subr.bf16.mxu0 %v6335_v12 }
 0x1f5   : > { %v8640_v49 = vsel %vm7184_vm7, %v6924_v8, -1e+30  ;;  %v6090_v6 = vunpack.i.h.bf16 %v6088_v44  ;;  %v6089_v11 = vunpack.i.l.bf16 %v6088_v44  ;;  %v8641_v46 = vsel %vm7301_vm9, %v6951_v28, -1e+30 }
 0x1f6   : > { %v7657_v15 = vsel %vm8635_vm8, %v6084_v61, %v8639_v23  ;;  %v2242_v22 = vmax.f32 %v2187_v0, %v8640_v49  ;;  %v2243_v40 = vmax.f32 %v2188_v56, %v8641_v46  ;;  %v8642_v61 = vunpack.i.h.bf16 %v7257_v47 }
 0x1f7   : > { %vm8643_vm3 = vcmask 826368   ;;  %v8644_v8 = vrot.slane %v7030_v27, %v6868_v18  ;;  %v8647_v0 = vrot.slane %v7030_v27, %v7118_v32  ;;  %v8650_v28 = vrot.slane %v7030_v27, %v7121_v33  ;;  %v6093_v27 = vpop.permute.xlu1 %6092 }
 0x1f8   : > { %v2349_v23 = vsel %vm8643_vm3, %v8642_v61, %v6079_v20  ;;  %v2321_v44 = vsel %vm7520_vm15, %v2265_v45, -1e+30  ;;  %v2327_v49 = vmax.f32 %v2242_v22, %v2320_v26  ;;  %vm8653_vm8 = vmmov %vm8643_vm3  ;;  %v8654_v61 = vunpack.i.h.bf16 %v7361_v62  ;;  %v6341_v22 = vld [vmem:[%s6565_s25 + $0x214] ss:$8 sps:$4 sm:$0xff]  }
 0x1f9   : > { %vm7676_vm7 = vcmp.eq.s32.totalorder %v8644_v8, 1  ;;  %vm7683_vm11 = vcmp.eq.s32.totalorder %v8647_v0, 1  ;;  %vm7690_vm9 = vcmp.eq.s32.totalorder %v8650_v28, 1  ;;  %v2350_v46 = vsel %vm8653_vm8, %v6079_v20, %v6080_v36  ;;  %v6103_v0 = vpop.permute.xlu0 %6102  ;;  %v6333_v28 = vld [vmem:[%s6565_s25 + $0x220] ss:$8 sps:$4 sm:$0xff]  }
 0x1fa   : > { %vm8655_vm3 = vcmask 236544   ;;  %v6095_v4 = vunpack.i.h.bf16 %v6093_v27  ;;  %v2489_v20 = vsel %vm7624_vm12, %v7657_v15, -1e+30  ;;  %v2404_v62 = vsel %vm7547_vm2, %v2349_v23, -1e+30  ;;  %3276 = vmatpush1.bf16.msra.mxu0 %v6333_v28 }
 0x1fb   : > { %v1888_v8 = vsel %vm8655_vm3, %v8654_v61, %v6089_v11  ;;  %vm8656_vm6 = vmmov %vm8655_vm3  ;;  %v6094_v45 = vunpack.i.l.bf16 %v6093_v27  ;;  %v6105_v19 = vunpack.i.h.bf16 %v6103_v0  ;;  %v6104_v26 = vunpack.i.l.bf16 %v6103_v0  ;;  %v2121_v2 = vpop.permute.xlu1 %2120  ;;  %3277 = vmatprep.subr.bf16.mxu0 %v6341_v22 }
 0x1fc   : > { %v1889_v7 = vsel %vm8656_vm6, %v6089_v11, %v6090_v6  ;;  %v1942_v56 = vsel %vm7534_vm1, %v1888_v8, -1e+30  ;;  %v2328_v61 = vmax.f32 %v2243_v40, %v2321_v44  ;;  %v2405_v59 = vsel %vm7561_vm10, %v2350_v46, -1e+30  ;;  %v6339_v46 = vld [vmem:[%s6565_s25 + $0x210] ss:$8 sps:$4 sm:$0xff]  }
 0x1fd   : > { %v1944_v12 = vsel %vm7565_vm5, %v6090_v6, -1e+30  ;;  %v2018_v11 = vsel %vm7569_vm14, %v6095_v4, -1e+30  ;;  %v8657_v8 = vrot.slane %v7051_v41, %v7121_v33  ;;  %v1943_v23 = vsel %vm7582_vm4, %v1889_v7, -1e+30  ;;  %v6108_v44 = vpop.permute.xlu0 %6107 }
 0x1fe   : > { %v8660_v40 = vunpack.i.h.bf16 %v7399_v9  ;;  %vm8661_vm1 = vcmask 228352   ;;  %v2025_v6 = vmax.f32 %v1944_v12, %v2018_v11  ;;  %v8663_v27 = vrot.slane %v7051_v41, %v6868_v18  ;;  %3278 = vmatpush1.bf16.msra.mxu0 %v6339_v46 }
 0x1ff   : > { %vm7723_vm6 = vcmp.eq.s32.totalorder %v8657_v8, 1  ;;  %vm8662_vm2 = vmmov %vm8661_vm1  ;;  %v8666_v9 = vrot.slane %v7051_v41, %v7118_v32  ;;  %vm8669_vm14 = vnez %v8622_v58  ;;  %vm8670_vm4 = vnez %v8624_v57  ;;  %v6347_v8 = vld [vmem:[%s6565_s25 + $0x204] ss:$8 sps:$4 sm:$0xff]  }
 0x200   : > { %v1961_v3 = vsel %vm8661_vm1, %v8660_v40, %v6094_v45  ;;  %v1962_v31 = vsel %vm8662_vm2, %v6094_v45, %v6095_v4  ;;  %vm7737_vm10 = vcmp.eq.s32.totalorder %v8663_v27, 1  ;;  %v8671_v4 = vunpack.i.h.bf16 %v7409_v42  ;;  %3279 = vmatprep.subr.bf16.mxu0 %v6347_v8  ;;  %v6360_v27 = vld [vmem:[%s6565_s25 + $0x2d0] ss:$8 sps:$4 sm:$0xff]  }
 0x201   : > { %vm7744_vm5 = vcmp.eq.s32.totalorder %v8666_v9, 1  ;;  %v2016_v7 = vsel %vm8669_vm14, %v1961_v3, -1e+30  ;;  %v2017_v28 = vsel %vm8670_vm4, %v1962_v31, -1e+30  ;;  %vm8672_vm8 = vcmask 220160  }
 0x202   : > { %v2042_v45 = vsel %vm8672_vm8, %v8671_v4, %v6104_v26  ;;  %vm8673_vm3 = vmmov %vm8672_vm8  ;;  %v8674_v41 = vrot.slane %v7075_v53, %v7112_v29  ;;  %v2023_v58 = vmax.f32 %v1942_v56, %v2016_v7  ;;  %v2024_v40 = vmax.f32 %v1943_v23, %v2017_v28  ;;  %3280 = vmatpush1.bf16.msra.mxu0 %v6345_v1  ;;  %v6369_v1 = vld [vmem:[%s6565_s25 + $0x2b0] ss:$8 sps:$4 sm:$0xff]  }
 0x203   : > { %v2043_v12 = vsel %vm8673_vm3, %v6104_v26, %v6105_v19  ;;  %v2099_v57 = vsel %vm7615_vm13, %v6105_v19, -1e+30  ;;  %vm8677_vm2 = vnez %v8629_v24  ;;  %v6110_v3 = vunpack.i.h.bf16 %v6108_v44  ;;  %v7777_v24 = vpop.permute.xlu1 %6097  ;;  %v6113_v19 = vpop.permute.xlu0 %6112 }
 0x204   : > { %vm7759_vm1 = vcmp.eq.s32.totalorder %v8674_v41, 1  ;;  %v2097_v42 = vsel %vm8677_vm2, %v2042_v45, -1e+30  ;;  %v2098_v22 = vsel %vm7636_vm0, %v2043_v12, -1e+30  ;;  %v2106_v26 = vmax.f32 %v2025_v6, %v2099_v57 }
 0x205   : > { %v6109_v29 = vunpack.i.l.bf16 %v6108_v44  ;;  %v8678_v31 = vrot.slane %v7070_v52, %v6868_v18  ;;  %v2411_v56 = vmax.f32 %v2327_v49, %v2404_v62  ;;  %v2104_v23 = vmax.f32 %v2023_v58, %v2097_v42  ;;  %v6363_v57 = vld [vmem:[%s6565_s25 + $0x300] ss:$8 sps:$4 sm:$0xff]  }
 0x206   : > { %v2105_v34 = vmax.f32 %v2024_v40, %v2098_v22  ;;  %v2412_v9 = vmax.f32 %v2328_v61, %v2405_v59  ;;  %v8681_v6 = vrot.slane %v7075_v53, %v7115_v30  ;;  %vm8684_vm13 = vcmask 7168   ;;  %v6353_v59 = vld [vmem:[%s6565_s25 + $0x2f4] ss:$8 sps:$4 sm:$0xff]   ;;  %v6368_v61 = vld [vmem:[%s6565_s25 + $0x2c4] ss:$8 sps:$4 sm:$0xff]  }
 0x207   : > { %vm7773_vm14 = vcmp.eq.s32.totalorder %v8678_v31, 1  ;;  %v2128_v7 = vsel %vm8684_vm13, %v6110_v3, %v2121_v2  ;;  %v8685_v49 = vunpack.i.h.bf16 %v7457_v38  ;;  %vm8686_vm4 = vmmov %vm8684_vm13  ;;  %v6100_v28 = vunpack.i.h.bf16 %v7777_v24  ;;  %v6351_v31 = vld [vmem:[%s6565_s25 + $0x2f0] ss:$8 sps:$4 sm:$0xff]   ;;  %3281 = vmatprep.subr.bf16.mxu0 %v6353_v59  ;;  %v6357_v59 = vld [vmem:[%s6565_s25 + $0x2e0] ss:$8 sps:$4 sm:$0xff]  }
 0x208   : > { %vm7783_vm0 = vcmp.eq.s32.totalorder %v8681_v6, 1  ;;  %vm8687_vm8 = vmmov %vm8686_vm4  ;;  %v8688_v30 = vrot.slane %v7067_v51, %v6868_v18  ;;  %v2184_v38 = vsel %vm7690_vm9, %v2128_v7, -1e+30  ;;  %v6099_v45 = vunpack.i.l.bf16 %v7777_v24  ;;  %3282 = vmatpush2.bf16.msra.mxu0 %v6351_v31 }
 0x209   : > { %v2126_v62 = vsel %vm8686_vm4, %v8685_v49, %v6109_v29  ;;  %v2127_v46 = vsel %vm8687_vm8, %v6109_v29, %v6110_v3  ;;  %v8691_v12 = vrot.slane %v7067_v51, %v7118_v32  ;;  %v8694_v47 = vrot.slane %v7075_v53, %v6868_v18  ;;  %v6123_v3 = vpop.permute.xlu1 %6122  ;;  %v6118_v29 = vpop.permute.xlu0 %6117 }
 0x20a   : > { %vm7796_vm15 = vcmp.eq.s32.totalorder %v8688_v30, 1  ;;  %v2182_v2 = vsel %vm7676_vm7, %v2126_v62, -1e+30  ;;  %v2183_v4 = vsel %vm7683_vm11, %v2127_v46, -1e+30  ;;  %v2191_v25 = vmax.f32 %v2106_v26, %v2184_v38 }
 0x20b   : > { %vm7811_vm13 = vcmp.eq.s32.totalorder %v8691_v12, 1  ;;  %vm7818_vm9 = vcmp.eq.s32.totalorder %v8694_v47, 1  ;;  %v2189_v14 = vmax.f32 %v2104_v23, %v2182_v2  ;;  %v2190_v58 = vmax.f32 %v2105_v34, %v2183_v4 }
 0x20c   : > { %v8697_v40 = vrot.slane %v7070_v52, %v7121_v33  ;;  %v6115_v51 = vunpack.i.h.bf16 %v6113_v19  ;;  %v8700_v42 = vunpack.i.h.bf16 %v7327_v35  ;;  %vm8701_vm11 = vcmask 809984  }
 0x20d   : > { %v6114_v22 = vunpack.i.l.bf16 %v6113_v19  ;;  %v2496_v26 = vmax.f32 %v2412_v9, %v2489_v20  ;;  %vm8702_vm4 = vnez %v8600_v17  ;;  %v8704_v35 = vrot.slane %v7070_v52, %v7118_v32  ;;  %vm8707_vm2 = vmmov %vm8701_vm11 }
 0x20e   : > { %vm7825_vm7 = vcmp.eq.s32.totalorder %v8697_v40, 1  ;;  %v2517_v18 = vsel %vm8701_vm11, %v8700_v42, %v6099_v45  ;;  %v8703_v23 = vsel %vm8702_vm4, %v7631_v55, -1e+30  ;;  %v2518_v43 = vsel %vm8707_vm2, %v6099_v45, %v6100_v28  ;;  %v6362_v45 = vld [vmem:[%s6565_s25 + $0x2d4] ss:$8 sps:$4 sm:$0xff]  }
 0x20f   : > { %v2495_v34 = vmax.f32 %v2411_v56, %v8703_v23  ;;  %vm7844_vm8 = vcmp.eq.s32.totalorder %v8704_v35, 1  ;;  %vm8708_vm3 = vcmask 121856   ;;  %vm8709_vm12 = vnez %v8509_v16  ;;  %v6359_v56 = vld [vmem:[%s6565_s25 + $0x2e4] ss:$8 sps:$4 sm:$0xff]  }
 0x210   : > { %v2276_v15 = vsel %vm8708_vm3, %v6115_v51, 0.0  ;;  %v8710_v17 = vsel %vm8709_vm12, %v7002_v10, -1e+30  ;;  %vm8711_vm4 = vnez %v8575_v63  ;;  %v8713_v19 = vrot.slane %v7075_v53, %v7118_v32  ;;  %3283 = vmatprep.subr.bf16.mxu0 %v6359_v56 }
 0x211   : > { %v2244_v55 = vmax.f32 %v2189_v14, %v8710_v17  ;;  %v8712_v52 = vsel %vm8711_vm4, %v7015_v21, -1e+30  ;;  %v2324_v16 = vsel %vm7723_vm6, %v2276_v15, -1e+30  ;;  %vm8716_vm3 = vnez %v8578_v13  ;;  %3284 = vmatpush2.bf16.msra.mxu0 %v6357_v59  ;;  %v6366_v17 = vld [vmem:[%s6565_s25 + $0x2c0] ss:$8 sps:$4 sm:$0xff]  }
 0x212   : > { %v2245_v20 = vmax.f32 %v2190_v58, %v8712_v52  ;;  %vm7864_vm11 = vcmp.eq.s32.totalorder %v8713_v19, 1  ;;  %v8717_v10 = vsel %vm8716_vm3, %v7059_v50, -1e+30  ;;  %v8718_v21 = vunpack.i.h.bf16 %v7559_v54  ;;  %v6128_v54 = vpop.permute.xlu0 %6127  ;;  %3285 = vmatprep.subr.bf16.mxu0 %v6362_v45  ;;  %v6371_v52 = vld [vmem:[%s6565_s25 + $0x2b4] ss:$8 sps:$4 sm:$0xff]  }
 0x213   : > { %v2246_v63 = vmax.f32 %v2191_v25, %v8717_v10  ;;  %vm8719_vm2 = vcmask 1039360   ;;  %v6125_v37 = vunpack.i.h.bf16 %v6123_v3  ;;  %v6124_v62 = vunpack.i.l.bf16 %v6123_v3 }
 0x214   : > { %v2266_v9 = vsel %vm8719_vm2, %v8718_v21, %v6114_v22  ;;  %vm8720_vm12 = vmmov %vm8719_vm2  ;;  %v2572_v13 = vsel %vm7759_vm1, %v2517_v18, -1e+30  ;;  %v6120_v30 = vunpack.i.h.bf16 %v6118_v29  ;;  %v8721_v38 = vunpack.i.h.bf16 %v7557_v39  ;;  %v6377_v21 = vld [vmem:[%s6565_s25 + $0x294] ss:$8 sps:$4 sm:$0xff]  }
 0x215   : > { %v2267_v7 = vsel %vm8720_vm12, %v6114_v22, %v6115_v51  ;;  %v2322_v32 = vsel %vm7737_vm10, %v2266_v9, -1e+30  ;;  %v2331_v46 = vmax.f32 %v2246_v63, %v2324_v16  ;;  %vm8722_vm6 = vcmask 818176   ;;  %3286 = vmatpush2.bf16.msra.mxu0 %v6360_v27  ;;  %v6374_v16 = vld [vmem:[%s6565_s25 + $0x2a4] ss:$8 sps:$4 sm:$0xff]  }
 0x216   : > { %v2323_v49 = vsel %vm7744_vm5, %v2267_v7, -1e+30  ;;  %v2329_v50 = vmax.f32 %v2244_v55, %v2322_v32  ;;  %v2435_v0 = vsel %vm8722_vm6, %v8721_v38, %v6124_v62  ;;  %vm8723_vm10 = vmmov %vm8722_vm6  ;;  %v6119_v48 = vunpack.i.l.bf16 %v6118_v29  ;;  %3287 = vmatprep.subr.bf16.mxu0 %v6368_v61  ;;  %v6372_v63 = vld [vmem:[%s6565_s25 + $0x2a0] ss:$8 sps:$4 sm:$0xff]   ;;  %v6375_v9 = vld [vmem:[%s6565_s25 + $0x290] ss:$8 sps:$4 sm:$0xff]  }
 0x217   : > { %v2436_v2 = vsel %vm8723_vm10, %v6124_v62, %v6125_v37  ;;  %v6130_v4 = vunpack.i.h.bf16 %v6128_v54  ;;  %v2330_v12 = vmax.f32 %v2245_v20, %v2323_v49  ;;  %v2415_v11 = vmax.f32 %v2331_v46, %v7622_v5  ;;  %v6380_v7 = vld [vmem:[%s6565_s25 + $0x284] ss:$8 sps:$4 sm:$0xff]   ;;  %v6378_v32 = vld [vmem:[%s6565_s25 + $0x280] ss:$8 sps:$4 sm:$0xff]  }
 0x218   : > { %v2490_v47 = vsel %vm7773_vm14, %v2435_v0, -1e+30  ;;  %v6129_v14 = vunpack.i.l.bf16 %v6128_v54  ;;  %vm8724_vm5 = vcmask 826368   ;;  %v2573_v25 = vsel %vm7783_vm0, %v2518_v43, -1e+30 }
 0x219   : > { %v2351_v39 = vsel %vm8724_vm5, %v6080_v36, %v6119_v48  ;;  %vm8725_vm1 = vmmov %vm8724_vm5  ;;  %v2579_v40 = vmax.f32 %v2495_v34, %v2572_v13  ;;  %vm8726_vm4 = vcmask 949248   ;;  %vm8727_vm3 = vcmask 957440   ;;  %3288 = vmatpush2.bf16.msra.mxu0 %v6366_v17 }
 0x21a   : > { %v2352_v58 = vsel %vm8725_vm1, %v6119_v48, %v6120_v30  ;;  %v2444_v51 = vsel %vm8726_vm4, %v2436_v2, 0.0  ;;  %v2406_v5 = vsel %vm7796_vm15, %v2351_v39, -1e+30  ;;  %vm8728_vm14 = vcmask 809984   ;;  %3289 = vmatprep.subr.bf16.mxu0 %v6371_v52 }
 0x21b   : > { %v2360_v42 = vsel %vm8727_vm3, %v2352_v58, 0.0  ;;  %v2519_v60 = vsel %vm8728_vm14, %v6100_v28, %v6129_v14  ;;  %v2413_v44 = vmax.f32 %v2329_v50, %v2406_v5  ;;  %vm8729_vm0 = vmmov %vm8728_vm14  ;;  %v8730_v3 = vmov -1e+30  }
 0x21c   : > { %v2407_v36 = vsel %vm7811_vm13, %v2360_v42, -1e+30  ;;  %v2520_v18 = vsel %vm8729_vm0, %v6129_v14, %v6130_v4  ;;  %v2574_v22 = vsel %vm7818_vm9, %v2519_v60, -1e+30  ;;  %v2492_v24 = vsel %vm7825_vm7, 0.0, %v8730_v3  ;;  %v3363_v4 = vpop.permute.xlu0 %3362 }
 0x21d   : > { %v8731_v28 = vrot.slane %v7075_v53, %v7121_v33  ;;  %v2580_v29 = vmax.f32 %v2496_v26, %v2573_v25  ;;  %v2414_v31 = vmax.f32 %v2330_v12, %v2407_v36  ;;  %v2586_v23 = vpack.c.bf16 %v2579_v40, %v2579_v40  ;;  %3290 = vmatpush2.bf16.msra.mxu0 %v6369_v1  ;;  %v3358_v12 = vpop.permute.xlu1 %3357 }
 0x21e   : > { %v2491_v8 = vsel %vm7844_vm8, %v2444_v51, -1e+30  ;;  %vm8734_vm13 = vcmask 941056   ;;  %v2497_v35 = vmax.f32 %v2413_v44, %v2490_v47  ;;  %v2499_v33 = vmax.f32 %v2415_v11, %v2492_v24  ;;  %3291 = vmatprep.subr.bf16.mxu0 %v6374_v16 }
 0x21f   : > { %vm7919_vm15 = vcmp.eq.s32.totalorder %v8731_v28, 1  ;;  %v2528_v34 = vsel %vm8734_vm13, %v2520_v18, 0.0  ;;  %v2587_v43 = vpack.c.bf16 %v2580_v29, %v2580_v29  ;;  %v2498_v15 = vmax.f32 %v2414_v31, %v2491_v8  ;;  %v6381_v31 = vld [vmem:[%s6630_s12] sm:$0xff]  }
 0x220   : > { %v2575_v53 = vsel %vm7864_vm11, %v2528_v34, -1e+30  ;;  %v2581_v26 = vmax.f32 %v2497_v35, %v2574_v22  ;;  %v2576_v6 = vsel %vm7919_vm15, 0.0, %v8730_v3  ;;  %v8735_v20 = vmov 0   ;;  %v3379_v40 = vpop.permute.xlu0 %3378 }
 0x221   : > { %3256 = vmatprep.mubr.bf16.mxu1 %v2587_v43  ;;  %v2582_v55 = vmax.f32 %v2498_v15, %v2575_v53  ;;  %v2583_v19 = vmax.f32 %v2499_v33, %v2576_v6  ;;  %vm3179_vm9 = vcmask 130048   ;;  %3292 = vmatpush2.bf16.msra.mxu0 %v6372_v63  ;;  %v3367_v42 = vmul.f32 0.0, %v3363_v4  ;;  %v3374_v27 = vpop.permute.xlu1 %3373  ;;  %v8736_v53 = vld [vmem:[#allocation34_spill] sm:$0xff]  ;;  %v3856_v4 = vld [vmem:[%s6655_s19 + $0x8] sm:$0xff] }
 0x222   : > { %3257 = vmatmul.mubr.bf16.vlgmr.msra.gmra.mxu1 %v2586_v23  ;;  %3293 = vmatprep.subr.bf16.mxu0 %v6377_v21  ;;  %v2588_v49 = vpack.c.bf16 %v2581_v26, %v2581_v26  ;;  %v3480_v23 = vld [vmem:[%s6570_s29] sm:$0x3]  ;;  %v8737_v26 = vld [vmem:[#allocation35_spill] sm:$0xff]  ;;  %vm3632_vm2 = vcmask 916480   ;;  %vm3612_vm12 = vcmask 924672   ;;  %vm8745_vm6 = vcmask 1039360  }
 0x223   : > { %3321 = vmatpush1.bf16.msra.mxu1 %v6363_v57  ;;  %3338 = vmatprep.mubr.bf16.mxu1 %v8735_v20  ;;  %v2589_v56 = vpack.c.bf16 %v2582_v55, %v2582_v55  ;;  %v2590_v10 = vpack.c.bf16 %v2583_v19, %v2583_v19  ;;  %v3383_v44 = vadd.f32 %v3379_v40, %v3367_v42  ;;  %vm3481_vm7 = vcmp.gt.f32.partialorder %v3480_v23, 0.5  ;;  %vm8747_vm5 = vmmov %vm8745_vm6 }
 0x224   : > { %v3482_v34 = vsel %vm3481_vm7, 1, %v8735_v20  ;;  %v3454_v35 = vpop.permute.xlu0 %3453  ;;  %vm8746_vm10 = vcmask 7168   ;;  %vm8748_vm4 = vcmask 121856   ;;  %vm3505_vm14 = vcmask 138240  }
 0x225   : > { %3297 = vmatprep.mubr.bf16.mxu0 %v2589_v56  ;;  %3294 = vmatpush2.bf16.msra.mxu0 %v6375_v9  ;;  %v3387_v24 = vmax.f32 %v3383_v44, 0.0  ;;  %v3449_v8 = vpop.permute.xlu1 %3448  ;;  %v3486_v33 = vrot.slane %v3482_v34, %v8736_v53  ;;  %v3490_v6 = vrot.slane %v3482_v34, %v8737_v26  ;;  %vm8749_vm0 = vmmov %vm8746_vm10  ;;  %vm3652_vm13 = vcmask 908288  }
 0x226   : > { %3295 = vmatprep.subr.bf16.mxu0 %v6380_v7  ;;  %vm8047_vm15 = vmneg %vm8749_vm0 }
 0x227   : > { %vm7962_vm8 = vcmp.eq.s32.totalorder %v3486_v33, 1  ;;  %vm7966_vm11 = vcmp.eq.s32.totalorder %v3490_v6, 1  ;;  %vm8752_vm7 = vmmov %vm8748_vm4 }
 0x228   : > { %vm6425_vm1 = vmpackc.low %vm7966_vm11, %vm7966_vm11 }
 0x229   : > { %3296 = vmatpush2.bf16.msra.mxu0 %v6378_v32  ;;  %v3465_v15 = vpop.permute.xlu1 %3464  ;;  %vm6428_vm3 = vmpackc.low %vm7962_vm8, %vm7962_vm8 }
 0x22a   : > { %5715 = vmatmul.mubr.msk.bf16.vlgmr.msra.gmra.mxu1 %vm3179_vm9, %v2590_v10  ;;  %v3470_v10 = vpop.permute.xlu0 %3469 }
 0x22b   : > { %3433 = vmatprep.mubr.bf16.mxu1 %v8735_v20 }
 0x22c   : > { %3298 = vmatmul.mubr.bf16.vlgmr.msra.gmra.mxu0 %v2588_v49 }
 0x22d   : > { %4392 = vmatprep.mubr.bf16.mxu0 %v8735_v20 }
 0x29f   : > { %v3217_v37 = vpop.f32.mrf.mxu0 }
 0x2a1   : > { %v3219_v62 = vpop.f32.mrf.mxu0 }
 0x2a3   : > { %v3221_v13 = vpop.f32.mrf.mxu0 }
 0x2a5   : > { %v3222_v50 = vpop.f32.mrf.mxu0 }
 0x2e2   : > { %v3258_v46 = vpop.f32.mrf.mxu1 }
 0x2e3   : > { %v3259_v45 = vadd.f32 %v3258_v46, %v3217_v37 }
 0x2e4   : > { %v3260_v30 = vpop.f32.mrf.mxu1 }
 0x2e5   : > { %v3261_v47 = vadd.f32 %v3260_v30, %v3219_v62 }
 0x2e6   : > { %v3262_v54 = vpop.f32.mrf.mxu1 }
 0x2e8   : > { %v3263_v59 = vpop.f32.mrf.mxu1 }
 0x2ea   : > { %v3340_v38 = vpop.f32.mrf.mxu1 }
 0x2ec   : > { %v3342_v0 = vpop.f32.mrf.mxu1  ;;  %v3299_v11 = vpop.f32.mrf.mxu0 }
 0x2ed   : > { %v3300_v14 = vadd.f32 %v3299_v11, %v3259_v45  ;;  %v8014_v45 = vld.sshfl [vmem:[%s8742_s10] sm:$0x33 pattern:$0x76325410]  ;;  %s8759_s10 = sld [smem:[#allocation20_spill]] }
 0x2ee   : > { %v3344_v2 = vpop.f32.mrf.mxu1  ;;  %v3301_v39 = vpop.f32.mrf.mxu0  ;;  %v3930_v11 = vld [vmem:[%s8743_s15] sm:$0xff] }
 0x2ef   : > { %v7945_v58 = vadd.f32 %v3340_v38, %v3300_v14  ;;  %v3302_v25 = vadd.f32 %v3301_v39, %v3261_v47  ;;  %v3840_v2 = vld [vmem:[%s8503_s3 + $0x8] sm:$0xff]  ;;  %v3946_v14 = vld [vmem:[%s8744_s23] sm:$0xff] }
 0x2f0   : > { %v3345_v48 = vpop.f32.mrf.mxu1  ;;  %v3303_v51 = vpop.f32.mrf.mxu0  ;;  %v3931_v47 = vld [vmem:[%s8743_s15 + $0x8] sm:$0xff] }
 0x2f1   : > { %v7947_v5 = vadd.f32 %v3342_v0, %v3302_v25  ;;  %v3365_v60 = vmul.f32 %v3358_v12, %v7945_v58  ;;  %v3839_v0 = vld [vmem:[%s8503_s3] sm:$0xff]  ;;  %v3947_v39 = vld [vmem:[%s8744_s23 + $0x8] sm:$0xff]  ;;  %s8788_s3 = sld [smem:[#allocation31_spill]] }
 0x2f2   : > { %v3304_v36 = vpop.f32.mrf.mxu0  ;;  %v3855_v48 = vld [vmem:[%s6655_s19] sm:$0xff] }
 0x2f3   : > { %v3366_v18 = vmul.f32 %v3358_v12, %v7947_v5  ;;  %v3381_v22 = vadd.f32 %v3374_v27, %v3365_v60  ;;  %v3695_v12 = vcombine.high %v8014_v45, %v8014_v45 }
 0x2f5   : > { %v3382_v61 = vadd.f32 %v3374_v27, %v3366_v18  ;;  %v3385_v3 = vmax.f32 %v3381_v22, 0.0 }
 0x2f7   : > { %v3386_v28 = vmax.f32 %v3382_v61, 0.0  ;;  %v3391_v29 = vpack.c.bf16 %v3387_v24, %v3385_v3 }
 0x2f9   : > { %v3392_v41 = vpack.c.bf16 %v3387_v24, %v3386_v28 }
 0x2fb   : > { %3415 = vmatprep.subr.bf16.mxu1 %v3392_v41 }
 0x2fc   : > { %3416 = vmatpush1.bf16.msra.mxu1 %v3391_v29 }
 0x2ff   : > { %5717 = vmatmul.mubr.msk.bf16.vlgmr.msra.gmra.mxu1 %vm3179_vm9, %v6381_v31 }
 0x300   : > { %5755 = vmatprep.mubr.msk.bf16.mxu1 %vm3179_vm9, %v3695_v12 }
 0x3bf   : > { %v3435_v43 = vpop.f32.mrf.mxu1 }
 0x3c0   : > { %v3456_v57 = vmul.f32 %v3449_v8, %v3435_v43 }
 0x3c1   : > { %v3437_v17 = vpop.f32.mrf.mxu1 }
 0x3c2   : > { %v7957_v55 = vadd.f32 %v3465_v15, %v3456_v57  ;;  %v3457_v52 = vmul.f32 %v3449_v8, %v3437_v17 }
 0x3c3   : > { %v3439_v56 = vpop.f32.mrf.mxu1 }
 0x3c4   : > { %v3476_v19 = vmax.f32 %v7957_v55, 0.0  ;;  %v7960_v1 = vadd.f32 %v3465_v15, %v3457_v52  ;;  %v3458_v16 = vmul.f32 %v3454_v35, %v3439_v56 }
 0x3c5   : > { %v3441_v9 = vpop.f32.mrf.mxu1 }
 0x3c6   : > { %v3477_v7 = vmax.f32 %v7960_v1, 0.0  ;;  %v7971_v32 = vadd.f32 %v3470_v10, %v3458_v16  ;;  %v3459_v49 = vmul.f32 %v3454_v35, %v3441_v9  ;;  %v3493_v37 = vsel %vm7962_vm8, %v3476_v19, 0.0 }
 0x3c8   : > { %v3494_v62 = vsel %vm7966_vm11, %v3477_v7, 0.0  ;;  %v3478_v13 = vmax.f32 %v7971_v32, 0.0  ;;  %v7982_v50 = vadd.f32 %v3470_v10, %v3459_v49 }
 0x3ca   : > { %v3495_v46 = vsel %vm7962_vm8, %v3478_v13, 0.0  ;;  %v3479_v30 = vmax.f32 %v7982_v50, 0.0  ;;  %v6429_v23 = vpack.c.bf16 %v3478_v13, %v3476_v19 }
 0x3cb   : > { %v3497_v54 = vpack.c.bf16 %v3495_v46, %v3493_v37 }
 0x3cc   : > { %v3496_v59 = vsel %vm7966_vm11, %v3479_v30, 0.0  ;;  %v6426_v41 = vpack.c.bf16 %v3479_v30, %v3477_v7 }
 0x3cd   : > { %v3498_v38 = vpack.c.bf16 %v3496_v59, %v3494_v62  ;;  %3628 = vrot.lane.b32.xlu1 %v3497_v54, %s6519_s26 }
 0x3cf   : > { %3630 = vrot.lane.b32.xlu0 %v3498_v38, %s6519_s26 }
 0x3d1   : > { %3608 = vrot.lane.b32.xlu1 %v3497_v54, %s6520_s0 }
 0x3d3   : > { %3610 = vrot.lane.b32.xlu0 %v3498_v38, %s6520_s0 }
 0x3d5   : > { %3589 = vrot.lane.b32.xlu1 %v3497_v54, %s8453_s7 }
 0x3d7   : > { %3591 = vrot.lane.b32.xlu0 %v3498_v38, %s8453_s7 }
 0x3d9   : > { %3560 = vrot.lane.b32.xlu1 %v3497_v54, %s8455_s18 }
 0x3db   : > { %3562 = vrot.lane.b32.xlu0 %v3498_v38, %s8455_s18 }
 0x3dd   : > { %3541 = vrot.lane.b32.xlu1 %v3497_v54, %s6521_s2 }
 0x3df   : > { %3543 = vrot.lane.b32.xlu0 %v3498_v38, %s6521_s2 }
 0x3e1   : > { %3522 = vrot.lane.b32.xlu1 %v3497_v54, %s6522_s11 }
 0x3e3   : > { %3524 = vrot.lane.b32.xlu0 %v3498_v38, %s6522_s11 }
 0x3e5   : > { %3501 = vrot.lane.b32.xlu1 %v3497_v54, %s8451_s16 }
 0x3e7   : > { %3503 = vrot.lane.b32.xlu0 %v3498_v38, %s8451_s16  ;;  %s8766_s16 = sld [smem:[#allocation23_spill]] }
 0x3e9   : > { %3648 = vrot.lane.b32.xlu1 %v3497_v54, %s8449_s22 }
 0x3eb   : > { %3650 = vrot.lane.b32.xlu0 %v3498_v38, %s8449_s22  ;;  %s8765_s22 = sld [smem:[#allocation9_spill]] }
 0x3ed   : > { %3843 = vperm.xlu1 %6131, %v3839_v0  }
 0x3ef   : > { %3848 = vperm.xlu0 %6010, %v3840_v2  }
 0x3f1   : > { %3859 = vperm.xlu1 %6131, %v3855_v48  }
 0x3f3   : > { %3864 = vperm.xlu0 %6010, %v3856_v4  }
 0x3f5   : > { %3934 = vperm.xlu1 %6131, %v3930_v11  }
 0x3f7   : > { %3939 = vperm.xlu0 %6010, %v3931_v47   ;;  %v6382_v47 = vld [vmem:[%s8759_s10] sm:$0xff]   ;;  %s8764_s10 = sld [smem:[#allocation8_spill]] }
 0x3f9   : > { %3950 = vperm.xlu1 %6131, %v3946_v14   ;;  %v3966_v14 = vld [vmem:[%s6570_s29] sm:$0x3] }
 0x3fb   : > { %3955 = vperm.xlu0 %6010, %v3947_v39  }
 0x43f   : > { %v3629_v25 = vpop.permute.xlu1 %3628 }
 0x441   : > { %v3631_v40 = vpop.permute.xlu0 %3630 }
 0x442   : > { %v3633_v51 = vsel %vm3632_vm2, %v3629_v25, %v3631_v40  ;;  %6422 = vmatprep.subr.msk.bf16.mxu1 %vm3632_vm2, %v3631_v40 }
 0x443   : > { %v3609_v42 = vpop.permute.xlu1 %3608  ;;  %3791 = vmatpush1.bf16.msra.mxu1 %v3633_v51 }
 0x445   : > { %v3611_v60 = vpop.permute.xlu0 %3610 }
 0x446   : > { %v3613_v27 = vsel %vm3612_vm12, %v3609_v42, %v3611_v60  ;;  %6423 = vmatprep.subr.msk.bf16.mxu1 %vm3612_vm12, %v3611_v60 }
 0x447   : > { %v3590_v36 = vpop.permute.xlu1 %3589  ;;  %3793 = vmatpush1.bf16.msra.mxu1 %v3613_v27 }
 0x449   : > { %v3592_v44 = vpop.permute.xlu0 %3591 }
 0x44a   : > { %v3594_v18 = vsel %vm8745_vm6, %v3590_v36, %v3592_v44  ;;  %6424 = vmatprep.subr.msk.bf16.mxu1 %vm8747_vm5, %v3592_v44  ;;  %vm8055_vm6 = vmneg %vm8752_vm7  ;;  %vm8776_vm7 = vcmask 7168  }
 0x44b   : > { %v3561_v22 = vpop.permute.xlu1 %3560  ;;  %3795 = vmatpush1.bf16.msra.mxu1 %v3594_v18  ;;  %vm8070_vm5 = vmneg %vm3505_vm14 }
 0x44c   : > { %6427 = vmatprep.subr.msk.bf16.mxu1 %vm6425_vm1, %v6426_v41 }
 0x44d   : > { %v3563_v61 = vpop.permute.xlu0 %3562 }
 0x44e   : > { %v3565_v3 = vsel %vm8746_vm10, %v3561_v22, %v3563_v61  ;;  %vm8063_vm10 = vmneg %vm3179_vm9 }
 0x44f   : > { %v3542_v24 = vpop.permute.xlu1 %3541  ;;  %6430 = vmatpush1.bf16.msk.msra.mxu1 %vm6428_vm3, %v6429_v23  ;;  %vm8774_vm3 = vcmask 1039360  }
 0x450   : > { %3798 = vmatprep.subr.bf16.mxu1 %v3565_v3  ;;  %vm8775_vm0 = vmmov %vm8774_vm3 }
 0x451   : > { %v3544_v28 = vpop.permute.xlu0 %3543 }
 0x452   : > { %v3546_v29 = vsel %vm8748_vm4, %v3542_v24, %v3544_v28  ;;  %vm1216_vm4 = vcmask 662528  }
 0x453   : > { %v3523_v31 = vpop.permute.xlu1 %3522  ;;  %6432 = vmatpush1.bf16.msk.msra.mxu1 %vm8047_vm15, %v3561_v22 }
 0x454   : > { %3800 = vmatprep.subr.bf16.mxu1 %v3546_v29 }
 0x455   : > { %v3525_v8 = vpop.permute.xlu0 %3524 }
 0x456   : > { %v3527_v34 = vsel %vm3179_vm9, %v3523_v31, %v3525_v8 }
 0x457   : > { %v3502_v35 = vpop.permute.xlu1 %3501  ;;  %6434 = vmatpush1.bf16.msk.msra.mxu1 %vm8055_vm6, %v3542_v24 }
 0x458   : > { %3802 = vmatprep.subr.bf16.mxu1 %v3527_v34 }
 0x459   : > { %v3504_v57 = vpop.permute.xlu0 %3503 }
 0x45a   : > { %v3506_v15 = vsel %vm3505_vm14, %v3502_v35, %v3504_v57 }
 0x45b   : > { %v3649_v17 = vpop.permute.xlu1 %3648  ;;  %6436 = vmatpush1.bf16.msk.msra.mxu1 %vm8063_vm10, %v3523_v31 }
 0x45c   : > { %3804 = vmatprep.subr.bf16.mxu1 %v3506_v15 }
 0x45d   : > { %v3651_v6 = vpop.permute.xlu0 %3650 }
 0x45e   : > { %v3653_v55 = vsel %vm3652_vm13, %v3649_v17, %v3651_v6 }
 0x45f   : > { %6438 = vmatpush1.bf16.msk.msra.mxu1 %vm8070_vm5, %v3502_v35 }
 0x460   : > { %6439 = vmatprep.subr.msk.bf16.mxu1 %vm3652_vm13, %v3651_v6 }
 0x463   : > { %3821 = vmatpush2.bf16.msra.mxu1 %v3653_v55 }
 0x466   : > { %3823 = vmatmul.mubr.bf16.vlgmr.msra.gmra.mxu1 %v8014_v45 }
 0x467   : > { %3919 = vmatprep.mubr.bf16.mxu1 %v8735_v20 }
 0x468   : > { %v3844_v10 = vpop.permute.xlu1 %3843 }
 0x469   : > { %v3852_v13 = vmul.f32 %v3844_v10, %v7947_v5  ;;  %v3851_v46 = vmul.f32 %v3844_v10, %v7945_v58 }
 0x46a   : > { %v3849_v32 = vpop.permute.xlu0 %3848 }
 0x46c   : > { %v3860_v37 = vpop.permute.xlu1 %3859 }
 0x46d   : > { %v3868_v54 = vadd.f32 %v3860_v37, %v3852_v13  ;;  %v3867_v21 = vadd.f32 %v3860_v37, %v3851_v46  ;;  %v4335_v37 = vld [vmem:[%s8765_s22 + $0x8] sm:$0xff] }
 0x46e   : > { %v3865_v63 = vpop.permute.xlu0 %3864 }
 0x46f   : > { %v3872_v48 = vmax.f32 %v3868_v54, 0.0  ;;  %v3871_v45 = vmax.f32 %v3867_v21, 0.0 }
 0x470   : > { %v3935_v39 = vpop.permute.xlu1 %3934 }
 0x472   : > { %v3940_v40 = vpop.permute.xlu0 %3939 }
 0x474   : > { %v3951_v60 = vpop.permute.xlu1 %3950 }
 0x476   : > { %v3956_v41 = vpop.permute.xlu0 %3955 }
 0x526   : > { %v3824_v19 = vpop.f32.mrf.mxu1 }
 0x527   : > { %v3831_v1 = vsel %vm7962_vm8, %v3824_v19, 0.0  ;;  %vm3967_vm8 = vcmp.gt.f32.partialorder %v3966_v14, 0.5 }
 0x528   : > { %3833 = vst [vmem:[#allocation2 + $0x18] sm:$0xf] %v3831_v1  ;;  %v3826_v16 = vpop.f32.mrf.mxu1  ;;  %v3968_v25 = vsel %vm3967_vm8, 1, %v8735_v20  ;;  %vm8778_vm8 = vmmov %vm8775_vm0 }
 0x529   : > { %v3832_v9 = vsel %vm7966_vm11, %v3826_v16, 0.0  ;;  %v3972_v27 = vrot.slane %v3968_v25, %v8736_v53  ;;  %v3976_v44 = vrot.slane %v3968_v25, %v8737_v26 }
 0x52a   : > { %3834 = vst [vmem:[#allocation2 + $0x8] sm:$0xf] %v3832_v9  ;;  %v3828_v7 = vpop.f32.mrf.mxu1 }
 0x52b   : > { %vm8096_vm11 = vcmp.eq.s32.totalorder %v3972_v27, 1  ;;  %vm8100_vm1 = vcmp.eq.s32.totalorder %v3976_v44, 1  ;;  %v4318_v7 = vld [vmem:[%s8764_s10] sm:$0xff] }
 0x52c   : > { %v3829_v49 = vpop.f32.mrf.mxu1 }
 0x52d   : > { %v4334_v49 = vld [vmem:[%s8765_s22] sm:$0xff] }
 0x52f   : > { %v3837_v62 = vld [vmem:[#allocation2 + $0x18] sm:$0xff] }
 0x530   : > { %v3853_v50 = vmul.f32 %v3849_v32, %v3837_v62  ;;  %v8148_v62 = vld.sshfl [vmem:[%s8766_s16] sm:$0x33 pattern:$0x76325410]  ;;  %s8782_s16 = sld [smem:[#allocation10_spill]] }
 0x531   : > { %v3838_v30 = vld [vmem:[#allocation2 + $0x8] sm:$0xff]  ;;  %v4168_v13 = vcombine.high %v8148_v62, %v8148_v62 }
 0x532   : > { %v3854_v59 = vmul.f32 %v3849_v32, %v3838_v30  ;;  %v3869_v38 = vadd.f32 %v3865_v63, %v3853_v50  ;;  %v4319_v32 = vld [vmem:[%s8764_s10 + $0x8] sm:$0xff]  ;;  %v8772_v50 = vmov 0.0   ;;  %s8802_s10 = smov 10  }
 0x533   : > { %1218 = vst.msk [vmem:[#allocation3 + $0x8] sm:$0xff] %vm1216_vm4, %v8772_v50  ;;  %1217 = vst.msk [vmem:[#allocation3] sm:$0xff] %vm1216_vm4, %v8772_v50 }
 0x534   : > { %v3870_v0 = vadd.f32 %v3865_v63, %v3854_v59  ;;  %v3873_v2 = vmax.f32 %v3869_v38, 0.0 }
 0x536   : > { %v3874_v4 = vmax.f32 %v3870_v0, 0.0  ;;  %v3877_v11 = vpack.c.bf16 %v3873_v2, %v3871_v45 }
 0x538   : > { %v3878_v12 = vpack.c.bf16 %v3874_v4, %v3872_v48 }
 0x53a   : > { %3901 = vmatprep.subr.bf16.mxu1 %v3878_v12 }
 0x53b   : > { %3902 = vmatpush1.bf16.msra.mxu1 %v3877_v11 }
 0x53e   : > { %5757 = vmatmul.mubr.msk.bf16.vlgmr.msra.gmra.mxu1 %vm3179_vm9, %v6382_v47 }
 0x53f   : > { %5795 = vmatprep.mubr.msk.bf16.mxu1 %vm3179_vm9, %v4168_v13 }
 0x5fe   : > { %v3921_v51 = vpop.f32.mrf.mxu1 }
 0x5ff   : > { %v3942_v42 = vmul.f32 %v3935_v39, %v3921_v51 }
 0x600   : > { %v3923_v36 = vpop.f32.mrf.mxu1 }
 0x601   : > { %v8091_v18 = vadd.f32 %v3951_v60, %v3942_v42  ;;  %v3943_v22 = vmul.f32 %v3935_v39, %v3923_v36 }
 0x602   : > { %v3925_v61 = vpop.f32.mrf.mxu1 }
 0x603   : > { %v3962_v3 = vmax.f32 %v8091_v18, 0.0  ;;  %v8094_v24 = vadd.f32 %v3951_v60, %v3943_v22  ;;  %v3944_v28 = vmul.f32 %v3940_v40, %v3925_v61 }
 0x604   : > { %v3927_v23 = vpop.f32.mrf.mxu1 }
 0x605   : > { %v3963_v26 = vmax.f32 %v8094_v24, 0.0  ;;  %v8105_v8 = vadd.f32 %v3956_v41, %v3944_v28  ;;  %v3945_v34 = vmul.f32 %v3940_v40, %v3927_v23  ;;  %v3979_v35 = vsel %vm8096_vm11, %v3962_v3, 0.0 }
 0x607   : > { %v3980_v57 = vsel %vm8100_vm1, %v3963_v26, 0.0  ;;  %v3964_v15 = vmax.f32 %v8105_v8, 0.0  ;;  %v8116_v17 = vadd.f32 %v3956_v41, %v3945_v34 }
 0x608   : > { %v5885_v6 = vpack.c.bf16 %v3980_v57, %v3979_v35 }
 0x609   : > { %v3981_v55 = vsel %vm8096_vm11, %v3964_v15, 0.0  ;;  %v3965_v19 = vmax.f32 %v8116_v17, 0.0  ;;  %v6449_v24 = vpack.c.bf16 %v3964_v15, %v3962_v3 }
 0x60a   : > { %4067 = vst [vmem:[#allocation4 + $0x40] sm:$0xff] %v5885_v6  ;;  %v3983_v1 = vpack.c.bf16 %v3981_v55, %v3979_v35 }
 0x60b   : > { %v3982_v16 = vsel %vm8100_vm1, %v3965_v19, 0.0 }
 0x60c   : > { %v3984_v10 = vpack.c.bf16 %v3982_v16, %v3980_v57  ;;  %v5886_v9 = vpack.c.bf16 %v3982_v16, %v3981_v55  ;;  %4105 = vrot.lane.b32.xlu1 %v3983_v1, %s6519_s26  ;;  %v6446_v55 = vpack.c.bf16 %v3965_v19, %v3963_v26 }
 0x60e   : > { %4068 = vst [vmem:[#allocation4 + $0x48] sm:$0xff] %v5886_v9  ;;  %4107 = vrot.lane.b32.xlu0 %v3984_v10, %s6519_s26  ;;  %s8767_s26 = smov 17  }
 0x610   : > { %4087 = vrot.lane.b32.xlu1 %v3983_v1, %s6520_s0 }
 0x612   : > { %4089 = vrot.lane.b32.xlu0 %v3984_v10, %s6520_s0  ;;  %s8768_s0 = sld [smem:[#allocation24_spill]] }
 0x614   : > { %4069 = vrot.lane.b32.xlu1 %v3983_v1, %s8453_s7 }
 0x616   : > { %4071 = vrot.lane.b32.xlu0 %v3984_v10, %s8453_s7  ;;  %s8769_s7 = smov 111  }
 0x618   : > { %4041 = vrot.lane.b32.xlu1 %v3983_v1, %s8455_s18  ;;  %v4574_v46 = vld [vmem:[%s8768_s0] sm:$0xff]  ;;  %v4575_v63 = vld [vmem:[%s8768_s0 + $0x8] sm:$0xff]  ;;  %s8463_s0 = smov 120  }
 0x61a   : > { %4043 = vrot.lane.b32.xlu0 %v3984_v10, %s8455_s18  ;;  %s8770_s18 = sld [smem:[#allocation25_spill]] }
 0x61c   : > { %4023 = vrot.lane.b32.xlu1 %v3983_v1, %s6521_s2 }
 0x61e   : > { %4025 = vrot.lane.b32.xlu0 %v3984_v10, %s6521_s2  ;;  %s8771_s2 = sld [smem:[#allocation27_spill]] }
 0x620   : > { %4005 = vrot.lane.b32.xlu1 %v3983_v1, %s6522_s11  ;;  %v4588_v30 = vld [vmem:[%s8770_s18] sm:$0xff]  ;;  %v4589_v54 = vld [vmem:[%s8770_s18 + $0x8] sm:$0xff] }
 0x622   : > { %4007 = vrot.lane.b32.xlu0 %v3984_v10, %s6522_s11  ;;  %s8773_s11 = sld [smem:[#allocation28_spill]] }
 0x624   : > { %3987 = vrot.lane.b32.xlu1 %v3983_v1, %s8767_s26  ;;  %v4656_v59 = vld [vmem:[%s8771_s2] sm:$0xff]  ;;  %v4657_v38 = vld [vmem:[%s8771_s2 + $0x8] sm:$0xff]  ;;  %s8464_s2 = smov 119  }
 0x626   : > { %3989 = vrot.lane.b32.xlu0 %v3984_v10, %s8767_s26  ;;  %s8783_s26 = sld [smem:[#allocation26_spill]] }
 0x628   : > { %4123 = vrot.lane.b32.xlu1 %v3983_v1, %s8769_s7  ;;  %v4670_v21 = vld [vmem:[%s8773_s11] sm:$0xff]  ;;  %v4671_v0 = vld [vmem:[%s8773_s11 + $0x8] sm:$0xff] }
 0x62a   : > { %4125 = vrot.lane.b32.xlu0 %v3984_v10, %s8769_s7  ;;  %s8781_s7 = sld [smem:[#allocation11_spill]] }
 0x62c   : > { %4322 = vperm.xlu1 %6131, %v4318_v7  }
 0x62e   : > { %4327 = vperm.xlu0 %6010, %v4319_v32  }
 0x630   : > { %4338 = vperm.xlu1 %6131, %v4334_v49  }
 0x632   : > { %4343 = vperm.xlu0 %6010, %v4335_v37  }
 0x634   : > { %4578 = vperm.xlu1 %6131, %v4574_v46  }
 0x636   : > { %4583 = vperm.xlu0 %6010, %v4575_v63  }
 0x638   : > { %4592 = vperm.xlu1 %6131, %v4588_v30  }
 0x63a   : > { %4597 = vperm.xlu0 %6010, %v4589_v54  }
 0x63c   : > { %4660 = vperm.xlu1 %6131, %v4656_v59  }
 0x63e   : > { %4665 = vperm.xlu0 %6010, %v4657_v38  }
 0x640   : > { %4674 = vperm.xlu1 %6131, %v4670_v21  }
 0x642   : > { %4679 = vperm.xlu0 %6010, %v4671_v0  }
 0x67e   : > { %v4106_v2 = vpop.permute.xlu1 %4105 }
 0x680   : > { %v4108_v48 = vpop.permute.xlu0 %4107 }
 0x681   : > { %v4109_v4 = vsel %vm3632_vm2, %v4106_v2, %v4108_v48  ;;  %v4111_v45 = vsel %vm3632_vm2, %v4108_v48, 0  ;;  %6442 = vmatprep.subr.msk.bf16.mxu1 %vm3632_vm2, %v4108_v48  ;;  %vm8777_vm2 = vmmov %vm8776_vm7 }
 0x682   : > { %v5772_v12 = vcombine.low %v4109_v4, %v4111_v45  ;;  %v5773_v11 = vcombine.high %v4109_v4, %v4111_v45  ;;  %v4088_v47 = vpop.permute.xlu1 %4087  ;;  %4264 = vmatpush1.bf16.msra.mxu1 %v4109_v4 }
 0x684   : > { %4121 = vst [vmem:[#allocation4 + $0x70] sm:$0xff] %v5772_v12  ;;  %4122 = vst [vmem:[#allocation4 + $0x78] sm:$0xff] %v5773_v11  ;;  %v4090_v14 = vpop.permute.xlu0 %4089 }
 0x685   : > { %v4091_v39 = vsel %vm3612_vm12, %v4088_v47, %v4090_v14  ;;  %v4093_v25 = vsel %vm3612_vm12, %v4090_v14, 0  ;;  %6443 = vmatprep.subr.msk.bf16.mxu1 %vm3612_vm12, %v4090_v14  ;;  %vm6445_vm12 = vmpackc.low %vm8100_vm1, %vm8100_vm1 }
 0x686   : > { %v5770_v40 = vcombine.low %v4091_v39, %v4093_v25  ;;  %v5771_v51 = vcombine.high %v4091_v39, %v4093_v25  ;;  %v4070_v42 = vpop.permute.xlu1 %4069  ;;  %4266 = vmatpush1.bf16.msra.mxu1 %v4091_v39 }
 0x688   : > { %4103 = vst [vmem:[#allocation4 + $0x60] sm:$0xff] %v5770_v40  ;;  %4104 = vst [vmem:[#allocation4 + $0x68] sm:$0xff] %v5771_v51  ;;  %v4072_v60 = vpop.permute.xlu0 %4071 }
 0x689   : > { %v4073_v27 = vsel %vm8774_vm3, %v4070_v42, %v4072_v60  ;;  %v4075_v36 = vsel %vm8775_vm0, %v4072_v60, 0  ;;  %6444 = vmatprep.subr.msk.bf16.mxu1 %vm8778_vm8, %v4072_v60  ;;  %vm8779_vm3 = vcmask 121856   ;;  %vm4729_vm8 = vcmask 64512  }
 0x68a   : > { %v5768_v44 = vcombine.low %v4073_v27, %v4075_v36  ;;  %v5769_v22 = vcombine.high %v4073_v27, %v4075_v36  ;;  %v4042_v61 = vpop.permute.xlu1 %4041  ;;  %4268 = vmatpush1.bf16.msra.mxu1 %v4073_v27  ;;  %vm8780_vm0 = vmmov %vm8779_vm3 }
 0x68b   : > { %v4047_v41 = vsel %vm8776_vm7, 0, %v4042_v61  ;;  %6447 = vmatprep.subr.msk.bf16.mxu1 %vm6445_vm12, %v6446_v55  ;;  %vm6448_vm7 = vmpackc.low %vm8096_vm11, %vm8096_vm11  ;;  %v6391_v55 = vld [vmem:[%s8781_s7 + $0x58] sm:$0xff]   ;;  %vm4806_vm12 = vcmask 580608  }
 0x68c   : > { %4085 = vst [vmem:[#allocation4 + $0x50] sm:$0xff] %v5768_v44  ;;  %4086 = vst [vmem:[#allocation4 + $0x58] sm:$0xff] %v5769_v22  ;;  %v4044_v28 = vpop.permute.xlu0 %4043  ;;  %v6383_v22 = vld [vmem:[%s8781_s7 + $0x78] sm:$0xff]  }
 0x68d   : > { %v4045_v23 = vsel %vm8777_vm2, %v4042_v61, %v4044_v28  ;;  %v6384_v28 = vld [vmem:[%s8781_s7 + $0x38] sm:$0xff]  }
 0x68e   : > { %v5764_v34 = vcombine.low %v4047_v41, %v4045_v23  ;;  %v5765_v35 = vcombine.high %v4047_v41, %v4045_v23  ;;  %v4024_v57 = vpop.permute.xlu1 %4023  ;;  %6450 = vmatpush1.bf16.msk.msra.mxu1 %vm6448_vm7, %v6449_v24  ;;  %v6385_v41 = vld [vmem:[%s8781_s7 + $0x70] sm:$0xff]   ;;  %v6397_v24 = vld [vmem:[%s8781_s7 + $0x40] sm:$0xff]  }
 0x68f   : > { %v4029_v1 = vsel %vm8779_vm3, 0, %v4024_v57  ;;  %4271 = vmatprep.subr.bf16.mxu1 %v4045_v23  ;;  %v6386_v23 = vld [vmem:[%s8781_s7 + $0x30] sm:$0xff]   ;;  %vm4700_vm3 = vcmask 80896  }
 0x690   : > { %4057 = vst [vmem:[#allocation4 + $0x30] sm:$0xff] %v5764_v34  ;;  %4058 = vst [vmem:[#allocation4 + $0x38] sm:$0xff] %v5765_v35  ;;  %v4026_v6 = vpop.permute.xlu0 %4025  ;;  %v6387_v34 = vld [vmem:[%s8781_s7 + $0x68] sm:$0xff]  }
 0x691   : > { %v4027_v16 = vsel %vm8780_vm0, %v4024_v57, %v4026_v6  ;;  %v6388_v35 = vld [vmem:[%s8781_s7 + $0x28] sm:$0xff]   ;;  %v6390_v6 = vld [vmem:[%s8781_s7 + $0x20] sm:$0xff]  }
 0x692   : > { %v5762_v10 = vcombine.low %v4029_v1, %v4027_v16  ;;  %v5763_v9 = vcombine.high %v4029_v1, %v4027_v16  ;;  %v4006_v7 = vpop.permute.xlu1 %4005  ;;  %6452 = vmatpush1.bf16.msk.msra.mxu1 %vm8047_vm15, %v4042_v61  ;;  %v4354_v61 = vld [vmem:[%s8782_s16] sm:$0xf]  ;;  %v6392_v1 = vld [vmem:[%s8781_s7 + $0x18] sm:$0xff]   ;;  %s8784_s16 = sld [smem:[#allocation7_spill]] }
 0x693   : > { %v4011_v17 = vsel %vm3179_vm9, 0, %v4006_v7  ;;  %4273 = vmatprep.subr.bf16.mxu1 %v4027_v16  ;;  %v6393_v16 = vld [vmem:[%s8781_s7 + $0x50] sm:$0xff]  }
 0x694   : > { %4039 = vst [vmem:[#allocation4 + $0x20] sm:$0xff] %v5762_v10  ;;  %4040 = vst [vmem:[#allocation4 + $0x28] sm:$0xff] %v5763_v9  ;;  %v4008_v26 = vpop.permute.xlu0 %4007  ;;  %v6394_v10 = vld [vmem:[%s8781_s7 + $0x10] sm:$0xff]   ;;  %v6395_v9 = vld [vmem:[%s8781_s7 + $0x48] sm:$0xff]  }
 0x695   : > { %v4009_v19 = vsel %vm3179_vm9, %v4006_v7, %v4008_v26  ;;  %v6398_v26 = vld [vmem:[%s8781_s7] sm:$0xff]  }
 0x696   : > { %v5760_v32 = vcombine.low %v4011_v17, %v4009_v19  ;;  %v5761_v49 = vcombine.high %v4011_v17, %v4009_v19  ;;  %v3988_v37 = vpop.permute.xlu1 %3987  ;;  %6454 = vmatpush1.bf16.msk.msra.mxu1 %vm8055_vm6, %v4024_v57  ;;  %v6389_v57 = vld [vmem:[%s8781_s7 + $0x60] sm:$0xff]   ;;  %vm4710_vm6 = vcmask 658432  }
 0x697   : > { %v3993_v3 = vsel %vm3505_vm14, 0, %v3988_v37  ;;  %4275 = vmatprep.subr.bf16.mxu1 %v4009_v19 }
 0x698   : > { %4021 = vst [vmem:[#allocation4 + $0x10] sm:$0xff] %v5760_v32  ;;  %4022 = vst [vmem:[#allocation4 + $0x18] sm:$0xff] %v5761_v49  ;;  %v3990_v18 = vpop.permute.xlu0 %3989 }
 0x699   : > { %v3991_v8 = vsel %vm3505_vm14, %v3988_v37, %v3990_v18  ;;  %vm6525_vm14 = vmmov 0  }
 0x69a   : > { %v5758_v15 = vcombine.low %v3993_v3, %v3991_v8  ;;  %v5759_v13 = vcombine.high %v3993_v3, %v3991_v8  ;;  %v4124_v46 = vpop.permute.xlu1 %4123  ;;  %6456 = vmatpush1.bf16.msk.msra.mxu1 %vm8063_vm10, %v4006_v7  ;;  %v6396_v7 = vld [vmem:[%s8781_s7 + $0x8] sm:$0xff]   ;;  %s8467_s7 = smov 8   ;;  %vm4778_vm10 = vcmask 596992  }
 0x69b   : > { %4277 = vmatprep.subr.bf16.mxu1 %v3991_v8 }
 0x69c   : > { %4003 = vst [vmem:[#allocation4] sm:$0xff] %v5758_v15  ;;  %4004 = vst [vmem:[#allocation4 + $0x8] sm:$0xff] %v5759_v13  ;;  %v4126_v63 = vpop.permute.xlu0 %4125 }
 0x69d   : > { %v4127_v43 = vsel %vm3652_vm13, %v4124_v46, %v4126_v63  ;;  %v4129_v30 = vsel %vm3652_vm13, %v4126_v63, 0 }
 0x69e   : > { %v5774_v54 = vcombine.low %v4127_v43, %v4129_v30  ;;  %v5775_v59 = vcombine.high %v4127_v43, %v4129_v30  ;;  %6458 = vmatpush1.bf16.msk.msra.mxu1 %vm8070_vm5, %v3988_v37  ;;  %v4573_v30 = vld [vmem:[#allocation3 + $0x8] sm:$0xff]  ;;  %vm4792_vm5 = vcmask 588800  }
 0x69f   : > { %6459 = vmatprep.subr.msk.bf16.mxu1 %vm3652_vm13, %v4126_v63 }
 0x6a0   : > { %4139 = vst [vmem:[#allocation4 + $0x80] sm:$0xff] %v5774_v54  ;;  %4140 = vst [vmem:[#allocation4 + $0x88] sm:$0xff] %v5775_v59 }
 0x6a2   : > { %4294 = vmatpush2.bf16.msra.mxu1 %v4127_v43 }
 0x6a3   : > { %5919 = vmatprep.subr.bf16.mxu1 %v8772_v50 }
 0x6a5   : > { %4296 = vmatmul.mubr.bf16.vlgmr.msra.gmra.mxu1 %v8148_v62 }
 0x6a6   : > { %5921 = vmatprep.mubr.msk.bf16.mxu1 %vm6525_vm14, %v8772_v50 }
 0x6a7   : > { %v4323_v48 = vpop.permute.xlu1 %4322 }
 0x6a8   : > { %v4331_v62 = vmul.f32 %v4323_v48, %v7947_v5  ;;  %v4330_v29 = vmul.f32 %v4323_v48, %v7945_v58 }
 0x6a9   : > { %v4328_v45 = vpop.permute.xlu0 %4327 }
 0x6ab   : > { %v4339_v12 = vpop.permute.xlu1 %4338 }
 0x6ac   : > { %v4347_v31 = vadd.f32 %v4339_v12, %v4331_v62  ;;  %v4346_v51 = vadd.f32 %v4339_v12, %v4330_v29 }
 0x6ad   : > { %v4344_v14 = vpop.permute.xlu0 %4343 }
 0x6ae   : > { %v4351_v27 = vmax.f32 %v4347_v31, 0.0  ;;  %v4350_v44 = vmax.f32 %v4346_v51, 0.0 }
 0x6af   : > { %v4579_v43 = vpop.permute.xlu1 %4578 }
 0x6b1   : > { %v4584_v13 = vpop.permute.xlu0 %4583 }
 0x6b2   : > { %v4587_v59 = vmul.f32 %v4584_v13, %v4573_v30 }
 0x6b5   : > { %v4598_v54 = vpop.permute.xlu0 %4597 }
 0x6b9   : > { %v4666_v62 = vpop.permute.xlu0 %4665 }
 0x765   : > { %v4297_v33 = vpop.f32.mrf.mxu1 }
 0x766   : > { %v4304_v38 = vsel %vm8096_vm11, %v4297_v33, 0.0  ;;  %vm4764_vm11 = vcmask 654336  }
 0x767   : > { %v4308_v21 = vrot.slane %v4304_v38, 4  ;;  %v4299_v52 = vpop.f32.mrf.mxu1  ;;  %v4601_v38 = vadd.f32 %v4598_v54, %v4587_v59 }
 0x768   : > { %v4305_v0 = vsel %vm8100_vm1, %v4299_v52, 0.0  ;;  %v4593_v52 = vpop.permute.xlu1 %4592  ;;  %vm8792_vm1 = vmmov %vm8777_vm2  ;;  %vm4715_vm2 = vcmask 72704  }
 0x769   : > { %4312 = vst [vmem:[#allocation2 + $0x18] sm:$0xf0] %v4308_v21  ;;  %v4309_v2 = vrot.slane %v4305_v0, 4  ;;  %v4301_v56 = vpop.f32.mrf.mxu1 }
 0x76b   : > { %4313 = vst [vmem:[#allocation2 + $0x8] sm:$0xf0] %v4309_v2  ;;  %v4302_v4 = vpop.f32.mrf.mxu1  ;;  %v4603_v2 = vmax.f32 %v4601_v38, 0.0 }
 0x76c   : > { %v6399_v4 = vld [vmem:[%s8783_s26] sm:$0xff]   ;;  %v4661_v12 = vpop.permute.xlu1 %4660  ;;  %s8787_s26 = sld [smem:[#allocation30_spill]] }
 0x770   : > { %v4316_v11 = vld [vmem:[#allocation2 + $0x18] sm:$0xff] }
 0x771   : > { %v4332_v47 = vmul.f32 %v4328_v45, %v4316_v11 }
 0x772   : > { %v4317_v39 = vld [vmem:[#allocation2 + $0x8] sm:$0xff] }
 0x773   : > { %v4333_v25 = vmul.f32 %v4328_v45, %v4317_v39  ;;  %v4348_v40 = vadd.f32 %v4344_v14, %v4332_v47  ;;  %v4686_v45 = vld [vmem:[%s8784_s16] sm:$0x1]  ;;  %v4675_v39 = vpop.permute.xlu1 %4674 }
 0x774   : > { %vm4687_vm15 = vcmp.gt.f32.partialorder %v4686_v45, 0.5 }
 0x775   : > { %v4349_v42 = vadd.f32 %v4344_v14, %v4333_v25  ;;  %v4352_v60 = vmax.f32 %v4348_v40, 0.0  ;;  %v4688_v11 = vsel %vm4687_vm15, 1, %v8735_v20 }
 0x776   : > { %v4692_v29 = vrot.slane %v4688_v11, %v8736_v53 }
 0x777   : > { %v4353_v36 = vmax.f32 %v4349_v42, 0.0  ;;  %v4355_v58 = vpack.c.bf16 %v4352_v60, %v4350_v44 }
 0x778   : > { %vm8248_vm13 = vcmp.eq.s32.totalorder %v4692_v29, 1 }
 0x779   : > { %v4356_v5 = vpack.c.bf16 %v4353_v36, %v4351_v27  ;;  %v4680_v27 = vpop.permute.xlu0 %4679 }
 0x77b   : > { %4374 = vmatprep.subr.bf16.mxu0 %v4356_v5 }
 0x77c   : > { %4375 = vmatpush1.bf16.msra.mxu0 %v4355_v58 }
 0x77d   : > { %5891 = vmatprep.subr.bf16.mxu0 %v6383_v22 }
 0x77f   : > { %5796 = vmatmul.mubr.msk.bf16.vlgmr.msra.gmra.mxu0 %vm3179_vm9, %v4354_v61 }
 0x780   : > { %5892 = vmatpush3.bf16.msra.mxu0 %v6384_v28 }
 0x781   : > { %5893 = vmatprep.subr.bf16.mxu0 %v6385_v41 }
 0x784   : > { %5894 = vmatpush3.bf16.msra.mxu0 %v6386_v23  ;;  %v4949_v23 = vld [vmem:[%s8787_s26 + $0x8] sm:$0xff] }
 0x785   : > { %5895 = vmatprep.subr.bf16.mxu0 %v6387_v34  ;;  %v4948_v34 = vld [vmem:[%s8787_s26] sm:$0xff] }
 0x788   : > { %5896 = vmatpush3.bf16.msra.mxu0 %v6388_v35  ;;  %v4963_v35 = vld [vmem:[%s8788_s3 + $0x8] sm:$0xff] }
 0x789   : > { %5897 = vmatprep.subr.bf16.mxu0 %v6389_v57  ;;  %v4962_v57 = vld [vmem:[%s8788_s3] sm:$0xff]  ;;  %s8800_s3 = smov 8  }
 0x78c   : > { %5898 = vmatpush3.bf16.msra.mxu0 %v6390_v6  ;;  %v5031_v6 = vld [vmem:[%s6725_s14 + $0x8] sm:$0xff] }
 0x78d   : > { %5899 = vmatprep.subr.bf16.mxu0 %v6391_v55  ;;  %v5030_v55 = vld [vmem:[%s6725_s14] sm:$0xff] }
 0x790   : > { %5900 = vmatpush3.bf16.msra.mxu0 %v6392_v1  ;;  %v5045_v1 = vld [vmem:[%s8500_s8 + $0x8] sm:$0xff] }
 0x791   : > { %5901 = vmatprep.subr.bf16.mxu0 %v6393_v16  ;;  %v5044_v16 = vld [vmem:[%s8500_s8] sm:$0xff]  ;;  %s8801_s8 = smov 118  }
 0x794   : > { %5902 = vmatpush3.bf16.msra.mxu0 %v6394_v10 }
 0x795   : > { %5903 = vmatprep.subr.bf16.mxu0 %v6395_v9 }
 0x798   : > { %5904 = vmatpush3.bf16.msra.mxu0 %v6396_v7 }
 0x799   : > { %5905 = vmatprep.subr.bf16.mxu0 %v6397_v24 }
 0x79c   : > { %5906 = vmatpush3.bf16.msra.mxu0 %v6398_v26 }
 0x79d   : > { %4904 = vmatprep.subr.bf16.mxu0 %v8735_v20 }
 0x83f   : > { %v4394_v17 = vpop.f32.mrf.mxu0 }
 0x840   : > { %v4401_v49 = vpack.c.bf16 %v4394_v17, %v4394_v17 }
 0x841   : > { %v4396_v19 = vpop.f32.mrf.mxu0 }
 0x842   : > { %v4402_v32 = vpack.c.bf16 %v4396_v19, %v4396_v19 }
 0x843   : > { %v4398_v37 = vpop.f32.mrf.mxu0 }
 0x844   : > { %4563 = vmatprep.mubr.bf16.mxu0 %v4402_v32 }
 0x845   : > { %v4399_v18 = vpop.f32.mrf.mxu0  ;;  %4564 = vmatmul.mubr.bf16.vlgmr.msra.gmra.mxu0 %v4401_v49 }
 0x905   : > { %v5907_v3 = vpop.f32.mrf.mxu0 }
 0x907   : > { %v5908_v8 = vpop.f32.mrf.mxu0 }
 0x908   : > { %v5909_v15 = vadd.f32 %v5908_v8, %v5907_v3 }
 0x909   : > { %v5910_v46 = vpop.f32.mrf.mxu0 }
 0x90a   : > { %4571 = vst.msk [vmem:[#allocation3] sm:$0xff] %vm1216_vm4, %v5909_v15 }
 0x90b   : > { %v5911_v63 = vpop.f32.mrf.mxu0 }
 0x911   : > { %v8237_v33 = vld [vmem:[#allocation3] sm:$0xff] }
 0x912   : > { %v4586_v21 = vmul.f32 %v4579_v43, %v8237_v33 }
 0x914   : > { %v4600_v0 = vadd.f32 %v4593_v52, %v4586_v21 }
 0x916   : > { %v4602_v56 = vmax.f32 %v4600_v0, 0.0 }
 0x918   : > { %v4606_v48 = vpack.c.bf16 %v4603_v2, %v4602_v56 }
 0x91a   : > { %5920 = vmatpush3.bf16.msra.mxu1 %v4606_v48 }
 0x91b   : > { %5925 = vmatprep.subr.bf16.mxu1 %v8772_v50 }
 0x91d   : > { %5922 = vmatmul.mubr.msk.bf16.vlgmr.msra.gmra.mxu1 %vm3179_vm9, %v6399_v4 }
 0x91e   : > { %5927 = vmatprep.mubr.msk.bf16.mxu1 %vm6525_vm14, %v8772_v50 }
 0x9dd   : > { %v4649_v47 = vpop.f32.mrf.mxu1 }
 0x9de   : > { %v4668_v14 = vmul.f32 %v4661_v12, %v4649_v47 }
 0x9df   : > { %v5923_v31 = vpop.f32.mrf.mxu1 }
 0x9e0   : > { %v4682_v25 = vadd.f32 %v4675_v39, %v4668_v14 }
 0x9e1   : > { %v4652_v51 = vpop.f32.mrf.mxu1 }
 0x9e2   : > { %v4684_v42 = vmax.f32 %v4682_v25, 0.0  ;;  %v4669_v60 = vmul.f32 %v4666_v62, %v4652_v51 }
 0x9e3   : > { %v5924_v36 = vpop.f32.mrf.mxu1 }
 0x9e4   : > { %v4694_v44 = vsel %vm8248_vm13, %v4684_v42, 0.0  ;;  %v4683_v5 = vadd.f32 %v4680_v27, %v4669_v60 }
 0x9e5   : > { %v5887_v22 = vpack.c.bf16 %v4694_v44, %v4694_v44 }
 0x9e6   : > { %v4685_v58 = vmax.f32 %v4683_v5, 0.0 }
 0x9e7   : > { %4760 = vst.msk [vmem:[#allocation4 + $0x40] sm:$0xf] %vm4710_vm6, %v5887_v22 }
 0x9e8   : > { %v4695_v61 = vsel %vm8248_vm13, %v4685_v58, 0.0 }
 0x9e9   : > { %v4696_v28 = vpack.c.bf16 %v4695_v61, %v4694_v44  ;;  %v5888_v41 = vpack.c.bf16 %v4695_v61, %v4695_v61 }
 0x9eb   : > { %4761 = vst.msk [vmem:[#allocation4 + $0x48] sm:$0xf] %vm4710_vm6, %v5888_v41  ;;  %4776 = vrot.lane.b32.xlu0 %v4696_v28, %s8463_s0  ;;  %4790 = vrot.lane.b32.xlu1 %v4696_v28, %s8464_s2  ;;  %s8465_s0 = smov 10   ;;  %s8791_s2 = sld [smem:[#allocation29_spill]] }
 0x9ef   : > { %4741 = vrot.lane.b32.xlu0 %v4696_v28, %s8789_s4  ;;  %4762 = vrot.lane.b32.xlu1 %v4696_v28, %s8790_s5 }
 0x9f1   : > { %v8275_v10 = vld.sshfl [vmem:[%s8791_s2] sm:$0x33 pattern:$0x76325410]  ;;  %s8793_s2 = sld [smem:[#allocation32_spill]] }
 0x9f2   : > { %v4845_v9 = vcombine.high %v8275_v10, %v8275_v10  ;;  %v6403_v31 = vld [vmem:[#allocation4 + $0x40] ss:$8 sps:$4 sm:$0xff]  }
 0x9f3   : > { %4713 = vrot.lane.b32.xlu0 %v4696_v28, %s6528_s6  ;;  %4727 = vrot.lane.b32.xlu1 %v4696_v28, %s8467_s7  ;;  %s8799_s7 = smov 119  }
 0x9f4   : > { %5843 = vmatprep.mubr.msk.bf16.mxu0 %vm3179_vm9, %v4845_v9 }
 0x9f7   : > { %4804 = vrot.lane.b32.xlu0 %v4696_v28, %s8466_s9  ;;  %4698 = vrot.lane.b32.xlu1 %v4696_v28, %s8465_s0  ;;  %s8797_s0 = sld [smem:[#allocation13_spill]]  ;;  %s8798_s9 = smov 120  }
 0x9fb   : > { %4957 = vperm.xlu0 %6010, %v4949_v23   ;;  %4952 = vperm.xlu1 %6131, %v4948_v34  }
 0x9ff   : > { %4971 = vperm.xlu0 %6010, %v4963_v35   ;;  %4966 = vperm.xlu1 %6131, %v4962_v57  }
 0xa03   : > { %5039 = vperm.xlu0 %6010, %v5031_v6   ;;  %5034 = vperm.xlu1 %6131, %v5030_v55  }
 0xa07   : > { %5053 = vperm.xlu0 %6010, %v5045_v1   ;;  %5048 = vperm.xlu1 %6131, %v5044_v16   ;;  %v6409_v16 = vld [vmem:[%s8793_s2] sm:$0xff]   ;;  %s8796_s2 = sld [smem:[#allocation12_spill]] }
 0xa5d   : > { %v4777_v7 = vpop.permute.xlu0 %4776  ;;  %v4791_v24 = vpop.permute.xlu1 %4790 }
 0xa5e   : > { %v4780_v26 = vsel %vm4778_vm10, %v4777_v7, 0  ;;  %v4794_v17 = vsel %vm4792_vm5, %v4791_v24, 0 }
 0xa5f   : > { %v5827_v19 = vcombine.low %v4780_v26, %v4780_v26  ;;  %v5828_v32 = vcombine.high %v4780_v26, %v4780_v26  ;;  %v5829_v49 = vcombine.low %v4794_v17, %v4794_v17  ;;  %v5830_v37 = vcombine.high %v4794_v17, %v4794_v17 }
 0xa61   : > { %4788 = vst.msk [vmem:[#allocation4 + $0x60] sm:$0xf] %vm4710_vm6, %v5827_v19  ;;  %4789 = vst.msk [vmem:[#allocation4 + $0x68] sm:$0xf] %vm4710_vm6, %v5828_v32  ;;  %v4742_v18 = vpop.permute.xlu0 %4741  ;;  %v4763_v3 = vpop.permute.xlu1 %4762 }
 0xa62   : > { %4802 = vst.msk [vmem:[#allocation4 + $0x70] sm:$0xf] %vm4710_vm6, %v5829_v49  ;;  %4803 = vst.msk [vmem:[#allocation4 + $0x78] sm:$0xf] %vm4710_vm6, %v5830_v37  ;;  %v4744_v8 = vsel %vm8792_vm1, 0, %v4742_v18  ;;  %v4766_v15 = vsel %vm4764_vm11, %v4763_v3, 0 }
 0xa63   : > { %v5821_v13 = vcombine.low %v4744_v8, %v4744_v8  ;;  %v5822_v46 = vcombine.high %v4744_v8, %v4744_v8  ;;  %v5825_v63 = vcombine.low %v4766_v15, %v4766_v15  ;;  %v5826_v43 = vcombine.high %v4766_v15, %v4766_v15 }
 0xa65   : > { %4752 = vst.msk [vmem:[#allocation4 + $0x30] sm:$0xf] %vm4710_vm6, %v5821_v13  ;;  %4753 = vst.msk [vmem:[#allocation4 + $0x38] sm:$0xf] %vm4710_vm6, %v5822_v46  ;;  %v4714_v30 = vpop.permute.xlu0 %4713  ;;  %v4728_v54 = vpop.permute.xlu1 %4727 }
 0xa66   : > { %4774 = vst.msk [vmem:[#allocation4 + $0x50] sm:$0xf] %vm4710_vm6, %v5825_v63  ;;  %4775 = vst.msk [vmem:[#allocation4 + $0x58] sm:$0xf] %vm4710_vm6, %v5826_v43  ;;  %v4717_v59 = vsel %vm4715_vm2, 0, %v4714_v30  ;;  %v4731_v38 = vsel %vm4729_vm8, 0, %v4728_v54 }
 0xa67   : > { %v5817_v21 = vcombine.low %v4717_v59, %v4717_v59  ;;  %v5818_v52 = vcombine.high %v4717_v59, %v4717_v59  ;;  %v5819_v0 = vcombine.low %v4731_v38, %v4731_v38  ;;  %v5820_v2 = vcombine.high %v4731_v38, %v4731_v38 }
 0xa68   : > { %v6401_v14 = vld [vmem:[#allocation4 + $0x60] ss:$8 sps:$4 sm:$0xff]  }
 0xa69   : > { %v6400_v56 = vld [vmem:[#allocation4 + $0x70] ss:$8 sps:$4 sm:$0xff]   ;;  %4725 = vst.msk [vmem:[#allocation4 + $0x10] sm:$0xf] %vm4710_vm6, %v5817_v21  ;;  %4726 = vst.msk [vmem:[#allocation4 + $0x18] sm:$0xf] %vm4710_vm6, %v5818_v52  ;;  %v4805_v48 = vpop.permute.xlu0 %4804  ;;  %v4699_v4 = vpop.permute.xlu1 %4698 }
 0xa6a   : > { %4739 = vst.msk [vmem:[#allocation4 + $0x20] sm:$0xf] %vm4710_vm6, %v5819_v0  ;;  %4740 = vst.msk [vmem:[#allocation4 + $0x28] sm:$0xf] %vm4710_vm6, %v5820_v2  ;;  %v4808_v45 = vsel %vm4806_vm12, %v4805_v48, 0  ;;  %v4702_v12 = vsel %vm4700_vm3, 0, %v4699_v4  ;;  %4905 = vmatpush1.bf16.msra.mxu0 %v6400_v56 }
 0xa6b   : > { %v5831_v11 = vcombine.low %v4808_v45, %v4808_v45  ;;  %v5832_v62 = vcombine.high %v4808_v45, %v4808_v45  ;;  %v5815_v47 = vcombine.low %v4702_v12, %v4702_v12  ;;  %v5816_v29 = vcombine.high %v4702_v12, %v4702_v12  ;;  %4906 = vmatprep.subr.bf16.mxu0 %v8735_v20  ;;  %v5315_v52 = vld [vmem:[%s8796_s2 + $0x8] sm:$0xff]  ;;  %v5314_v0 = vld [vmem:[%s8796_s2] sm:$0xff] }
 0xa6c   : > { %v6404_v25 = vld [vmem:[#allocation4 + $0x30] ss:$8 sps:$4 sm:$0xff]  }
 0xa6d   : > { %4816 = vst.msk [vmem:[#allocation4 + $0x80] sm:$0xf] %vm4710_vm6, %v5831_v11  ;;  %4817 = vst.msk [vmem:[#allocation4 + $0x88] sm:$0xf] %vm4710_vm6, %v5832_v62  ;;  %v6402_v39 = vld [vmem:[#allocation4 + $0x50] ss:$8 sps:$4 sm:$0xff]  }
 0xa6e   : > { %4711 = vst.msk [vmem:[#allocation4] sm:$0xf] %vm4710_vm6, %v5815_v47  ;;  %4712 = vst.msk [vmem:[#allocation4 + $0x8] sm:$0xf] %vm4710_vm6, %v5816_v29  ;;  %4907 = vmatpush1.bf16.msra.mxu0 %v6401_v14  ;;  %v5329_v2 = vld [vmem:[%s8797_s0 + $0x8] sm:$0xff]  ;;  %v5328_v56 = vld [vmem:[%s8797_s0] sm:$0xff] }
 0xa6f   : > { %4908 = vmatprep.subr.bf16.mxu0 %v8735_v20  ;;  %v8349_v48 = vld.sshfl [vmem:[%s6735_s30] sm:$0x33 pattern:$0x76325410] }
 0xa70   : > { %v6406_v42 = vld [vmem:[#allocation4 + $0x10] ss:$8 sps:$4 sm:$0xff]   ;;  %v5211_v4 = vcombine.high %v8349_v48, %v8349_v48 }
 0xa71   : > { %v6405_v51 = vld [vmem:[#allocation4 + $0x20] ss:$8 sps:$4 sm:$0xff]  }
 0xa72   : > { %4909 = vmatpush1.bf16.msra.mxu0 %v6402_v39 }
 0xa73   : > { %4910 = vmatprep.subr.bf16.mxu0 %v8735_v20 }
 0xa74   : > { %v6408_v27 = vld [vmem:[#allocation4 + $0x80] ss:$8 sps:$4 sm:$0xff]  }
 0xa75   : > { %v6407_v60 = vld [vmem:[#allocation4] ss:$8 sps:$4 sm:$0xff]  }
 0xa76   : > { %4911 = vmatpush1.bf16.msra.mxu0 %v6403_v31  ;;  %v4953_v44 = vpop.permute.xlu1 %4952  ;;  %v4958_v61 = vpop.permute.xlu0 %4957 }
 0xa77   : > { %4912 = vmatprep.subr.bf16.mxu0 %v8735_v20  ;;  %v4960_v23 = vmul.f32 %v4953_v44, %v8237_v33 }
 0xa7a   : > { %4913 = vmatpush1.bf16.msra.mxu0 %v6404_v25  ;;  %v4967_v41 = vpop.permute.xlu1 %4966 }
 0xa7b   : > { %4914 = vmatprep.subr.bf16.mxu0 %v8735_v20  ;;  %v4974_v35 = vadd.f32 %v4967_v41, %v4960_v23 }
 0xa7d   : > { %v4976_v55 = vmax.f32 %v4974_v35, 0.0 }
 0xa7e   : > { %4915 = vmatpush1.bf16.msra.mxu0 %v6405_v51  ;;  %v5035_v9 = vpop.permute.xlu1 %5034 }
 0xa7f   : > { %4916 = vmatprep.subr.bf16.mxu0 %v8735_v20 }
 0xa82   : > { %4917 = vmatpush1.bf16.msra.mxu0 %v6406_v42  ;;  %v5049_v32 = vpop.permute.xlu1 %5048 }
 0xa83   : > { %4918 = vmatprep.subr.bf16.mxu0 %v8735_v20 }
 0xa86   : > { %4919 = vmatpush1.bf16.msra.mxu0 %v6407_v60 }
 0xa87   : > { %4934 = vmatprep.subr.bf16.mxu0 %v8735_v20 }
 0xa8a   : > { %4935 = vmatpush2.bf16.msra.mxu0 %v6408_v27 }
 0xa8b   : > { %5931 = vmatprep.subr.bf16.mxu0 %v8772_v50 }
 0xa8d   : > { %4937 = vmatmul.mubr.bf16.vlgmr.msra.gmra.mxu0 %v8275_v10  ;;  %v5060_v10 = vld [vmem:[%s8784_s16] sm:$0x1] }
 0xa8e   : > { %5933 = vmatprep.mubr.msk.bf16.mxu0 %vm6525_vm14, %v8772_v50  ;;  %v4972_v50 = vpop.permute.xlu0 %4971  ;;  %vm5061_vm0 = vcmp.gt.f32.partialorder %v5060_v10, 0.5  ;;  %vm8803_vm14 = vmmov %vm8792_vm1 }
 0xa8f   : > { %v5062_v7 = vsel %vm5061_vm0, 1, %v8735_v20 }
 0xa90   : > { %v5066_v17 = vrot.slane %v5062_v7, %v8736_v53 }
 0xa92   : > { %v5040_v24 = vpop.permute.xlu0 %5039  ;;  %vm8326_vm7 = vcmp.eq.s32.totalorder %v5066_v17, 1 }
 0xa96   : > { %v5054_v13 = vpop.permute.xlu0 %5053 }
 0xb4d   : > { %v4938_v36 = vpop.f32.mrf.mxu0 }
 0xb4e   : > { %v4944_v5 = vsel %vm8248_vm13, %v4938_v36, 0.0 }
 0xb4f   : > { %4945 = vst.msk [vmem:[#allocation3 + $0x8] sm:$0xf] %vm4710_vm6, %v4944_v5  ;;  %v4940_v22 = vpop.f32.mrf.mxu0 }
 0xb51   : > { %v4941_v58 = vpop.f32.mrf.mxu0 }
 0xb53   : > { %v4942_v28 = vpop.f32.mrf.mxu0 }
 0xb56   : > { %v4947_v34 = vld [vmem:[#allocation3 + $0x8] sm:$0xff] }
 0xb57   : > { %v4961_v57 = vmul.f32 %v4958_v61, %v4947_v34 }
 0xb59   : > { %v4975_v6 = vadd.f32 %v4972_v50, %v4961_v57 }
 0xb5b   : > { %v4977_v1 = vmax.f32 %v4975_v6, 0.0 }
 0xb5d   : > { %v4980_v40 = vpack.c.bf16 %v4977_v1, %v4976_v55 }
 0xb5f   : > { %5926 = vmatpush3.bf16.msra.mxu1 %v4980_v40 }
 0xb60   : > { %5270 = vmatprep.subr.bf16.mxu1 %v8735_v20 }
 0xb62   : > { %5928 = vmatmul.mubr.msk.bf16.vlgmr.msra.gmra.mxu1 %vm3179_vm9, %v6409_v16 }
 0xb63   : > { %5874 = vmatprep.mubr.msk.bf16.mxu1 %vm3179_vm9, %v5211_v4 }
 0xc22   : > { %v5023_v26 = vpop.f32.mrf.mxu1 }
 0xc23   : > { %v5042_v19 = vmul.f32 %v5035_v9, %v5023_v26 }
 0xc24   : > { %v5929_v49 = vpop.f32.mrf.mxu1 }
 0xc25   : > { %v5056_v37 = vadd.f32 %v5049_v32, %v5042_v19 }
 0xc26   : > { %v5026_v3 = vpop.f32.mrf.mxu1 }
 0xc27   : > { %v5058_v8 = vmax.f32 %v5056_v37, 0.0  ;;  %v5043_v15 = vmul.f32 %v5040_v24, %v5026_v3  ;;  %v5344_v37 = vld [vmem:[%s8784_s16] sm:$0x1] }
 0xc28   : > { %v5930_v46 = vpop.f32.mrf.mxu1  ;;  %vm5345_vm15 = vcmp.gt.f32.partialorder %v5344_v37, 0.5 }
 0xc29   : > { %v5068_v63 = vsel %vm8326_vm7, %v5058_v8, 0.0  ;;  %v5057_v43 = vadd.f32 %v5054_v13, %v5043_v15 }
 0xc2a   : > { %v5889_v30 = vpack.c.bf16 %v5068_v63, %v5068_v63 }
 0xc2b   : > { %v5059_v54 = vmax.f32 %v5057_v43, 0.0  ;;  %v5346_v43 = vsel %vm5345_vm15, 1, %v8735_v20 }
 0xc2c   : > { %5130 = vst.msk [vmem:[#allocation4 + $0x40] sm:$0xf] %vm4710_vm6, %v5889_v30 }
 0xc2d   : > { %v5069_v59 = vsel %vm8326_vm7, %v5059_v54, 0.0 }
 0xc2e   : > { %v5070_v38 = vpack.c.bf16 %v5069_v59, %v5068_v63  ;;  %v5890_v21 = vpack.c.bf16 %v5069_v59, %v5069_v59 }
 0xc30   : > { %5131 = vst.msk [vmem:[#allocation4 + $0x48] sm:$0xf] %vm4710_vm6, %v5890_v21  ;;  %5145 = vrot.lane.b32.xlu0 %v5070_v38, %s8798_s9  ;;  %5158 = vrot.lane.b32.xlu1 %v5070_v38, %s8799_s7  ;;  %s8805_s9 = sld [smem:[#allocation15_spill]] }
 0xc34   : > { %5111 = vrot.lane.b32.xlu0 %v5070_v38, %s8789_s4  ;;  %5132 = vrot.lane.b32.xlu1 %v5070_v38, %s8790_s5  ;;  %s8804_s5 = sld [smem:[#allocation14_spill]] }
 0xc37   : > { %v6413_v24 = vld [vmem:[#allocation4 + $0x40] ss:$8 sps:$4 sm:$0xff]  }
 0xc38   : > { %5085 = vrot.lane.b32.xlu0 %v5070_v38, %s6528_s6  ;;  %5098 = vrot.lane.b32.xlu1 %v5070_v38, %s8800_s3  ;;  %s5882_s3 = sshll.u32 %s8808_s1, 4 }
 0xc3c   : > { %5171 = vrot.lane.b32.xlu0 %v5070_v38, %s8801_s8  ;;  %5072 = vrot.lane.b32.xlu1 %v5070_v38, %s8802_s10  ;;  %v5350_v38 = vrot.slane %v5346_v43, %v8736_v53  ;;  %s1210_s8 = scalar_lea.vmem %s6740_s24, %s5882_s3 }
 0xc3e   : > { %vm5351_vm13 = vcmp.eq.s32.totalorder %v5350_v38, 1 }
 0xc40   : > { %5323 = vperm.xlu0 %6010, %v5315_v52   ;;  %5318 = vperm.xlu1 %6131, %v5314_v0  }
 0xc44   : > { %5337 = vperm.xlu0 %6010, %v5329_v2   ;;  %5332 = vperm.xlu1 %6131, %v5328_v56  }
 0xca2   : > { %v5146_v45 = vpop.permute.xlu0 %5145  ;;  %v5159_v12 = vpop.permute.xlu1 %5158 }
 0xca3   : > { %v5148_v11 = vsel %vm4778_vm10, %v5146_v45, 0  ;;  %v5161_v62 = vsel %vm4792_vm5, %v5159_v12, 0  ;;  %v6419_v45 = vld [vmem:[%s8804_s5] sm:$0x1f]   ;;  %vm5409_vm10 = vcmask 656384   ;;  %vm5420_vm5 = vcmask 1024  }
 0xca4   : > { %v5858_v47 = vcombine.low %v5148_v11, %v5148_v11  ;;  %v5859_v29 = vcombine.high %v5148_v11, %v5148_v11  ;;  %v5860_v14 = vcombine.low %v5161_v62, %v5161_v62  ;;  %v5861_v39 = vcombine.high %v5161_v62, %v5161_v62 }
 0xca6   : > { %5156 = vst.msk [vmem:[#allocation4 + $0x60] sm:$0xf] %vm4710_vm6, %v5858_v47  ;;  %5157 = vst.msk [vmem:[#allocation4 + $0x68] sm:$0xf] %vm4710_vm6, %v5859_v29  ;;  %v5112_v31 = vpop.permute.xlu0 %5111  ;;  %v5133_v25 = vpop.permute.xlu1 %5132  ;;  %v5415_v47 = vld [vmem:[%s8805_s9] sm:$0xff] }
 0xca7   : > { %5169 = vst.msk [vmem:[#allocation4 + $0x70] sm:$0xf] %vm4710_vm6, %v5860_v14  ;;  %5170 = vst.msk [vmem:[#allocation4 + $0x78] sm:$0xf] %vm4710_vm6, %v5861_v39  ;;  %v5114_v51 = vsel %vm8803_vm14, 0, %v5112_v31  ;;  %v5135_v42 = vsel %vm4764_vm11, %v5133_v25, 0 }
 0xca8   : > { %v5852_v60 = vcombine.low %v5114_v51, %v5114_v51  ;;  %v5853_v27 = vcombine.high %v5114_v51, %v5114_v51  ;;  %v5856_v36 = vcombine.low %v5135_v42, %v5135_v42  ;;  %v5857_v44 = vcombine.high %v5135_v42, %v5135_v42  ;;  %v5416_v31 = vld [vmem:[%s8805_s9 + $0x8] sm:$0x3] }
 0xcaa   : > { %5122 = vst.msk [vmem:[#allocation4 + $0x30] sm:$0xf] %vm4710_vm6, %v5852_v60  ;;  %5123 = vst.msk [vmem:[#allocation4 + $0x38] sm:$0xf] %vm4710_vm6, %v5853_v27  ;;  %v5086_v5 = vpop.permute.xlu0 %5085  ;;  %v5099_v22 = vpop.permute.xlu1 %5098 }
 0xcab   : > { %5143 = vst.msk [vmem:[#allocation4 + $0x50] sm:$0xf] %vm4710_vm6, %v5856_v36  ;;  %5144 = vst.msk [vmem:[#allocation4 + $0x58] sm:$0xf] %vm4710_vm6, %v5857_v44  ;;  %v5088_v58 = vsel %vm4715_vm2, 0, %v5086_v5  ;;  %v5101_v61 = vsel %vm4729_vm8, 0, %v5099_v22 }
 0xcac   : > { %v5848_v28 = vcombine.low %v5088_v58, %v5088_v58  ;;  %v5849_v41 = vcombine.high %v5088_v58, %v5088_v58  ;;  %v5850_v23 = vcombine.low %v5101_v61, %v5101_v61  ;;  %v5851_v34 = vcombine.high %v5101_v61, %v5101_v61 }
 0xcad   : > { %v6411_v9 = vld [vmem:[#allocation4 + $0x60] ss:$8 sps:$4 sm:$0xff]  }
 0xcae   : > { %v6410_v35 = vld [vmem:[#allocation4 + $0x70] ss:$8 sps:$4 sm:$0xff]   ;;  %5096 = vst.msk [vmem:[#allocation4 + $0x10] sm:$0xf] %vm4710_vm6, %v5848_v28  ;;  %5097 = vst.msk [vmem:[#allocation4 + $0x18] sm:$0xf] %vm4710_vm6, %v5849_v41  ;;  %v5172_v57 = vpop.permute.xlu0 %5171  ;;  %v5073_v50 = vpop.permute.xlu1 %5072 }
 0xcaf   : > { %5109 = vst.msk [vmem:[#allocation4 + $0x20] sm:$0xf] %vm4710_vm6, %v5850_v23  ;;  %5110 = vst.msk [vmem:[#allocation4 + $0x28] sm:$0xf] %vm4710_vm6, %v5851_v34  ;;  %v5174_v6 = vsel %vm4806_vm12, %v5172_v57, 0  ;;  %v5075_v55 = vsel %vm4700_vm3, 0, %v5073_v50  ;;  %5271 = vmatpush1.bf16.msra.mxu1 %v6410_v35 }
 0xcb0   : > { %v5862_v1 = vcombine.low %v5174_v6, %v5174_v6  ;;  %v5863_v40 = vcombine.high %v5174_v6, %v5174_v6  ;;  %v5846_v16 = vcombine.low %v5075_v55, %v5075_v55  ;;  %v5847_v10 = vcombine.high %v5075_v55, %v5075_v55  ;;  %5272 = vmatprep.subr.bf16.mxu1 %v8735_v20 }
 0xcb1   : > { %v6414_v26 = vld [vmem:[#allocation4 + $0x30] ss:$8 sps:$4 sm:$0xff]  }
 0xcb2   : > { %5182 = vst.msk [vmem:[#allocation4 + $0x80] sm:$0xf] %vm4710_vm6, %v5862_v1  ;;  %5183 = vst.msk [vmem:[#allocation4 + $0x88] sm:$0xf] %vm4710_vm6, %v5863_v40  ;;  %v6412_v7 = vld [vmem:[#allocation4 + $0x50] ss:$8 sps:$4 sm:$0xff]  }
 0xcb3   : > { %5083 = vst.msk [vmem:[#allocation4] sm:$0xf] %vm4710_vm6, %v5846_v16  ;;  %5084 = vst.msk [vmem:[#allocation4 + $0x8] sm:$0xf] %vm4710_vm6, %v5847_v10  ;;  %5273 = vmatpush1.bf16.msra.mxu1 %v6411_v9 }
 0xcb4   : > { %5274 = vmatprep.subr.bf16.mxu1 %v8735_v20 }
 0xcb5   : > { %v6416_v19 = vld [vmem:[#allocation4 + $0x10] ss:$8 sps:$4 sm:$0xff]  }
 0xcb6   : > { %v6415_v17 = vld [vmem:[#allocation4 + $0x20] ss:$8 sps:$4 sm:$0xff]  }
 0xcb7   : > { %5275 = vmatpush1.bf16.msra.mxu1 %v6412_v7 }
 0xcb8   : > { %5276 = vmatprep.subr.bf16.mxu1 %v8735_v20 }
 0xcb9   : > { %v6418_v49 = vld [vmem:[#allocation4 + $0x80] ss:$8 sps:$4 sm:$0xff]  }
 0xcba   : > { %v6417_v32 = vld [vmem:[#allocation4] ss:$8 sps:$4 sm:$0xff]  }
 0xcbb   : > { %5277 = vmatpush1.bf16.msra.mxu1 %v6413_v24  ;;  %v5319_v8 = vpop.permute.xlu1 %5318  ;;  %v5324_v63 = vpop.permute.xlu0 %5323 }
 0xcbc   : > { %5278 = vmatprep.subr.bf16.mxu1 %v8735_v20  ;;  %v5326_v59 = vmul.f32 %v5319_v8, %v8237_v33 }
 0xcbf   : > { %5279 = vmatpush1.bf16.msra.mxu1 %v6414_v26  ;;  %v5333_v54 = vpop.permute.xlu1 %5332  ;;  %v5338_v18 = vpop.permute.xlu0 %5337 }
 0xcc0   : > { %5280 = vmatprep.subr.bf16.mxu1 %v8735_v20  ;;  %v5340_v52 = vadd.f32 %v5333_v54, %v5326_v59 }
 0xcc2   : > { %v5342_v56 = vmax.f32 %v5340_v52, 0.0 }
 0xcc3   : > { %5281 = vmatpush1.bf16.msra.mxu1 %v6415_v17 }
 0xcc4   : > { %5282 = vmatprep.subr.bf16.mxu1 %v8735_v20 }
 0xcc7   : > { %5283 = vmatpush1.bf16.msra.mxu1 %v6416_v19 }
 0xcc8   : > { %5284 = vmatprep.subr.bf16.mxu1 %v8735_v20 }
 0xccb   : > { %5285 = vmatpush1.bf16.msra.mxu1 %v6417_v32 }
 0xccc   : > { %5300 = vmatprep.subr.bf16.mxu1 %v8735_v20 }
 0xccf   : > { %5301 = vmatpush2.bf16.msra.mxu1 %v6418_v49 }
 0xcd2   : > { %5303 = vmatmul.mubr.bf16.vlgmr.msra.gmra.mxu1 %v8349_v48 }
 0xd92   : > { %v5304_v3 = vpop.f32.mrf.mxu1 }
 0xd93   : > { %v5310_v15 = vsel %vm8326_vm7, %v5304_v3, 0.0 }
 0xd94   : > { %5311 = vst.msk [vmem:[#allocation3 + $0xc] sm:$0xf] %vm4710_vm6, %v5310_v15  ;;  %v5306_v13 = vpop.f32.mrf.mxu1  ;;  %vm5876_vm6 = vmpackc.low %vm5351_vm13, %vm5351_vm13 }
 0xd96   : > { %v5307_v46 = vpop.f32.mrf.mxu1 }
 0xd98   : > { %v5308_v30 = vpop.f32.mrf.mxu1 }
 0xd9b   : > { %v5313_v21 = vld [vmem:[#allocation3 + $0x8] sm:$0xff] }
 0xd9c   : > { %v5327_v0 = vmul.f32 %v5324_v63, %v5313_v21 }
 0xd9e   : > { %v5341_v2 = vadd.f32 %v5338_v18, %v5327_v0 }
 0xda0   : > { %v5343_v48 = vmax.f32 %v5341_v2, 0.0 }
 0xda2   : > { %v5877_v4 = vpack.c.bf16 %v5343_v48, %v5342_v56 }
 0xda4   : > { %5932 = vmatpush3.bf16.msk.msra.mxu0 %vm5876_vm6, %v5877_v4 }
 0xda7   : > { %5934 = vmatmul.mubr.msk.bf16.vlgmr.msra.gmra.mxu0 %vm3179_vm9, %v6419_v45  ;;  %vm8806_vm9 = vmmov %vm8792_vm1 }
 0xe67   : > { %v5399_v20 = vpop.f32.mrf.mxu0 }
 0xe68   : > { %v5406_v53 = vsel %vm1216_vm4, %v5399_v20, 0.0 }
 0xe69   : > { %v5935_v33 = vpop.f32.mrf.mxu0  ;;  %5407 = vadd.xlane.f32.xlu1 %v5406_v53 }
 0xe6b   : > { %v5402_v12 = vpop.f32.mrf.mxu0 }
 0xe6c   : > { %v5410_v11 = vsel %vm5409_vm10, %v5402_v12, 0.0 }
 0xe6d   : > { %v5936_v62 = vpop.f32.mrf.mxu0  ;;  %5411 = vadd.xlane.f32.xlu0 %v5410_v11 }
 0xef2   : > { %v5408_v29 = vpop.xlane.xlu1 %5407 }
 0xef3   : > { %v5413_v14 = vmul.f32 0.020408163, %v5408_v29 }
 0xef5   : > { %v5417_v39 = vadd.f32 %v5415_v47, %v5413_v14 }
 0xef6   : > { %v5412_v25 = vpop.xlane.xlu0 %5411 }
 0xef7   : > { %5419 = vst.msk [vmem:[%s1210_s8] sm:$0xff] %vm8806_vm9, %v5417_v39  ;;  %v5414_v51 = vmul.f32 0.020408163, %v5412_v25 }
 0xef9   : > { %v5418_v42 = vadd.f32 %v5416_v31, %v5414_v51 }
 0xefb   : > { %5421 = vst.msk [vmem:[%s1210_s8 + $0x8] sm:$0x3] %vm5420_vm5, %v5418_v42 }
 0xefc PF: > { %s91_s28 = sadd.s32 1, %s6466_s28  }
 0xefd   : > { %p88_p4 = scmp.ge.s32.totalorder %s91_s28, 4  }
 0xeff   :  { %90 = sbr.rel (!%p88_p4) target bundleno = 72 (0x48), region = 258 }

</bundles_post_ra>
